<compile_context>
chip_gen: v6e
topology: v6e:2x2x1
jax: 0.10.0
libtpu: 0.0.40
codegen_flags: <defaults>
</compile_context>

<pallas_src>
import functools

import jax
import jax.numpy as jnp
from jax.experimental import pallas as pl
from jax.experimental.pallas import tpu as pltpu


# ----------------------------------------------------------------------------
# In-kernel helpers (pure jnp on values / small refs; traced inside the kernel)
# ----------------------------------------------------------------------------

def _elu(y):
    # ELU(alpha=1):  y if y > 0 else exp(y) - 1
    return jnp.where(y > 0, y, jnp.exp(jnp.minimum(y, 0.0)) - 1.0)


def _pad_matrix(L, pad):
    # (L, L + 2*pad) 0/1 matrix:  (x @ P)[:, c] = x[:, c - pad]  (zero outside).
    Lp = L + 2 * pad
    r = jax.lax.broadcasted_iota(jnp.int32, (L, Lp), 0)
    c = jax.lax.broadcasted_iota(jnp.int32, (L, Lp), 1)
    return (c == r + pad).astype(jnp.float32)


def _conv_multi(xs, w_ref, b, pad):
    # xs: list (per batch sample) of (Cin, L);  w_ref: (K, Cout, Cin) ref;
    # b: (Cout, 1).  Returns list of (Cout, Lout),  Lout = L + 2*pad - K + 1.
    # PyTorch Conv1d (cross-correlation, stride 1).
    K = w_ref.shape[0]
    L = xs[0].shape[1]
    Lp = L + 2 * pad
    Lout = Lp - K + 1
    wks = [w_ref[k] for k in range(K)]                     # each (Cout, Cin)
    P = _pad_matrix(L, pad) if pad > 0 else None
    outs = []
    for x in xs:
        xp = jnp.dot(x, P, preferred_element_type=jnp.float32) if pad > 0 else x
        acc = jnp.dot(wks[0], xp[:, 0:Lout], preferred_element_type=jnp.float32)
        for k in range(1, K):
            acc = acc + jnp.dot(wks[k], xp[:, k:k + Lout],
                                preferred_element_type=jnp.float32)
        outs.append(acc + b)
    return outs


def _bn_elu_multi(xs, gamma, beta):
    # BatchNorm1d(track_running_stats=False): batch statistics over (B, L) per
    # channel (biased variance), fused with the following ELU.
    n = float(len(xs) * xs[0].shape[1])
    s = jnp.sum(xs[0], axis=1, keepdims=True)
    ss = jnp.sum(xs[0] * xs[0], axis=1, keepdims=True)
    for x in xs[1:]:
        s = s + jnp.sum(x, axis=1, keepdims=True)
        ss = ss + jnp.sum(x * x, axis=1, keepdims=True)
    mean = s / n
    var = jnp.maximum(ss / n - mean * mean, 0.0)
    scale = gamma * jax.lax.rsqrt(var + 1e-5)
    shift = beta - mean * scale
    return [_elu(x * scale + shift) for x in xs]


def _maxpool4_multi(xs):
    # MaxPool1d(kernel=4, stride=4); trailing remainder dropped (floor), exactly
    # like PyTorch.  Shifted 4-way max + 0/1 column-selection matmul (no strided
    # slices, no reshape).
    L = xs[0].shape[1]
    Lout = L // 4
    W = 4 * Lout - 3
    r = jax.lax.broadcasted_iota(jnp.int32, (W, Lout), 0)
    c = jax.lax.broadcasted_iota(jnp.int32, (W, Lout), 1)
    S = (r == 4 * c).astype(jnp.float32)                   # picks columns 0,4,8,...
    outs = []
    for x in xs:
        m = jnp.maximum(jnp.maximum(x[:, 0:W], x[:, 1:W + 1]),
                        jnp.maximum(x[:, 2:W + 2], x[:, 3:W + 3]))
        outs.append(jnp.dot(m, S, preferred_element_type=jnp.float32))
    return outs


def _res_block(xs, p):
    # SACLResBlock: BN -> ELU -> {1x1 conv residual | conv(pad=K-1) -> BN -> ELU
    # -> conv} -> add.  Residual add is a fused epilogue in the same kernel.
    g1, b1, wr_ref, br, w1_ref, c1b, g2, b2, w2_ref, c2b = p
    xs = _bn_elu_multi(xs, g1, b1)
    resid = _conv_multi(xs, wr_ref, br, 0)
    k = w1_ref.shape[0]
    xs = _conv_multi(xs, w1_ref, c1b, k - 1)
    xs = _bn_elu_multi(xs, g2, b2)
    xs = _conv_multi(xs, w2_ref, c2b, 0)
    return [a + r for a, r in zip(xs, resid)]


# ----------------------------------------------------------------------------
# The single fused forward kernel
# ----------------------------------------------------------------------------

def _sacl_forward_kernel(*args):
    out_ref = args[-1]
    it = iter(args[:-1])

    x_ref = next(it)                                        # (B, C, T)
    conv0_w = next(it)                                      # (K, C//2, C) ref
    conv0_b = next(it)[...]                                 # (C//2, 1)

    res_ps = []
    for _ in range(3):
        g1 = next(it)[...]; b1 = next(it)[...]
        wr = next(it);      br = next(it)[...]
        w1 = next(it);      c1b = next(it)[...]
        g2 = next(it)[...]; b2 = next(it)[...]
        w2 = next(it);      c2b = next(it)[...]
        res_ps.append((g1, b1, wr, br, w1, c1b, g2, b2, w2, c2b))

    fc_w = next(it)                                         # (2C, Lf, E) ref
    fc_b = next(it)[...]                                    # (1, E)
    dec = [(next(it)[...], next(it)[...]) for _ in range(4)]  # (din,dout),(1,dout)

    B = x_ref.shape[0]
    xs = [x_ref[b] for b in range(B)]                       # per-sample (C, T)

    # --- SACLEncoder.sequential_process ---
    xs = _conv_multi(xs, conv0_w, conv0_b, 0)               # Conv1d(C, C//2, T//32)
    xs = _res_block(xs, res_ps[0])                          # SACLResBlock(C//2, C//2)
    xs = _maxpool4_multi(xs)                                # MaxPool1d(4)
    xs = _res_block(xs, res_ps[1])                          # SACLResBlock(C//2, C)
    xs = _maxpool4_multi(xs)                                # MaxPool1d(4)
    xs = _res_block(xs, res_ps[2])                          # SACLResBlock(C, 2C)
    xs = [_elu(x) for x in xs]                              # ELU

    # --- SACLFlatten + Linear(2C*Lf -> E) + decode_model (all still in VMEM) ---
    n_ch = fc_w.shape[0]
    for b in range(B):
        act = xs[b]                                         # (2C, Lf)
        h = fc_b                                            # (1, E)
        for c in range(n_ch):                               # flatten folded into FC
            h = h + jnp.dot(act[c:c + 1, :], fc_w[c],
                            preferred_element_type=jnp.float32)
        for li, (dw, db) in enumerate(dec):
            h = jnp.dot(h, dw, preferred_element_type=jnp.float32) + db
            if li < len(dec) - 1:
                h = jnp.maximum(h, 0.0)                     # ReLU between decoders
        out_ref[pl.ds(b, 1), :] = h


# ----------------------------------------------------------------------------
# Parameters (kernel-ready layouts, prepared once at init) + forward wrapper
# ----------------------------------------------------------------------------

def _encoder_seq_len(T):
    # Length trace of the encoder (res blocks preserve length; pools floor-div).
    L = T - (T // 32) + 1
    L = L // 4
    L = L // 4
    return L


def init_params(key, num_channels, temporal_len, embed_dim=100, num_decode=20):
    C, T = num_channels, temporal_len
    keys = iter(jax.random.split(key, 64))

    def conv_p(cout, cin, k):
        w = 0.1 * jax.random.normal(next(keys), (cout, cin, k), jnp.float32)
        b = 0.1 * jax.random.normal(next(keys), (cout,), jnp.float32)
        return {"w": jnp.transpose(w, (2, 0, 1)),           # (K, Cout, Cin)
                "b": b.reshape(cout, 1)}

    def lin_p(dout, din):
        w = 0.1 * jax.random.normal(next(keys), (dout, din), jnp.float32)
        b = 0.1 * jax.random.normal(next(keys), (dout,), jnp.float32)
        return {"w": jnp.transpose(w),                      # (din, dout)
                "b": b.reshape(1, dout)}

    def bn_p(c):
        return {"gamma": 1.0 + 0.1 * jax.random.normal(next(keys), (c, 1), jnp.float32),
                "beta": 0.1 * jax.random.normal(next(keys), (c, 1), jnp.float32)}

    def res_p(cin, cout, k):
        return {"bn1": bn_p(cin), "conv_res": conv_p(cout, cin, 1),
                "conv1": conv_p(cout, cin, k), "bn2": bn_p(cout),
                "conv2": conv_p(cout, cout, k)}

    Lf = _encoder_seq_len(T)
    flat_torch = 2 * C * int(T / 16.5)
    flat_actual = 2 * C * Lf
    if flat_torch != flat_actual:
        raise ValueError(
            f"Flatten size mismatch: PyTorch Linear expects {flat_torch}, "
            f"encoder actually produces {flat_actual} (same failure as PyTorch).")

    w_fc = 0.1 * jax.random.normal(next(keys), (embed_dim, flat_actual), jnp.float32)
    b_fc = 0.1 * jax.random.normal(next(keys), (embed_dim,), jnp.float32)
    fc = {"w": jnp.transpose(w_fc.reshape(embed_dim, 2 * C, Lf), (1, 2, 0)),  # (2C,Lf,E)
          "b": b_fc.reshape(1, embed_dim)}

    return {
        "conv0": conv_p(C // 2, C, T // 32),
        "res1": res_p(C // 2, C // 2, T // 16),
        "res2": res_p(C // 2, C, T // 16),
        "res3": res_p(C, 2 * C, T // 32),
        "fc": fc,
        "dec1": lin_p(embed_dim // 2, embed_dim),
        "dec2": lin_p(embed_dim // 2, embed_dim // 2),
        "dec3": lin_p(embed_dim // 2, embed_dim // 2),
        "dec4": lin_p(num_decode, embed_dim // 2),
    }
    # TODO(synk): dropout_rate is stored but never used in the PyTorch forward;
    # nothing to emit.


def _flatten_params(p):
    flat = [p["conv0"]["w"], p["conv0"]["b"]]
    for name in ("res1", "res2", "res3"):
        rp = p[name]
        flat += [rp["bn1"]["gamma"], rp["bn1"]["beta"],
                 rp["conv_res"]["w"], rp["conv_res"]["b"],
                 rp["conv1"]["w"], rp["conv1"]["b"],
                 rp["bn2"]["gamma"], rp["bn2"]["beta"],
                 rp["conv2"]["w"], rp["conv2"]["b"]]
    flat += [p["fc"]["w"], p["fc"]["b"]]
    for name in ("dec1", "dec2", "dec3", "dec4"):
        flat += [p[name]["w"], p[name]["b"]]
    return flat


def sacl_net_forward(params, x_btc):
    # x_btc: (B, temporal_len, num_channels), same as the PyTorch module.
    B = x_btc.shape[0]
    x_bct = jnp.transpose(x_btc, (0, 2, 1))                 # the permute(0, 2, 1)
    inputs = [x_bct] + _flatten_params(params)
    num_decode = params["dec4"]["b"].shape[1]
    vmem = pl.BlockSpec(memory_space=pltpu.MemorySpace.VMEM)
    return pl.pallas_call(
        _sacl_forward_kernel,
        out_shape=jax.ShapeDtypeStruct((B, num_decode), jnp.float32),
        in_specs=[vmem] * len(inputs),
        out_specs=vmem,
    )(*inputs)


# ----------------------------------------------------------------------------
# Pure-JAX reference (for a sanity check only; runs in plain XLA)
# ----------------------------------------------------------------------------

def reference_forward(params, x_btc):
    def conv(x, w, b, pad):                                 # x: (B, Cin, L)
        if pad:
            x = jnp.pad(x, ((0, 0), (0, 0), (pad, pad)))
        K = w.shape[0]
        Lout = x.shape[-1] - K + 1
        acc = sum(jnp.einsum("oi,bil->bol", w[k], x[:, :, k:k + Lout])
                  for k in range(K))
        return acc + b[None]

    def bn_elu(x, g, bt):
        mean = jnp.mean(x, axis=(0, 2), keepdims=True)
        var = jnp.mean((x - mean) ** 2, axis=(0, 2), keepdims=True)
        y = (x - mean) * jax.lax.rsqrt(var + 1e-5) * g[None] + bt[None]
        return jnp.where(y > 0, y, jnp.exp(jnp.minimum(y, 0.0)) - 1.0)

    def pool4(x):
        Bb, Cc, Ll = x.shape
        Lo = Ll // 4
        return jnp.max(x[:, :, :4 * Lo].reshape(Bb, Cc, Lo, 4), axis=-1)

    def res(x, p):
        x = bn_elu(x, p["bn1"]["gamma"], p["bn1"]["beta"])
        xr = conv(x, p["conv_res"]["w"], p["conv_res"]["b"], 0)
        k = p["conv1"]["w"].shape[0]
        x = conv(x, p["conv1"]["w"], p["conv1"]["b"], k - 1)
        x = bn_elu(x, p["bn2"]["gamma"], p["bn2"]["beta"])
        x = conv(x, p["conv2"]["w"], p["conv2"]["b"], 0)
        return x + xr

    x = jnp.transpose(x_btc, (0, 2, 1))
    x = conv(x, params["conv0"]["w"], params["conv0"]["b"], 0)
    x = res(x, params["res1"]); x = pool4(x)
    x = res(x, params["res2"]); x = pool4(x)
    x = res(x, params["res3"])
    x = jnp.where(x > 0, x, jnp.exp(jnp.minimum(x, 0.0)) - 1.0)
    h = jnp.einsum("bcl,cle->be", x, params["fc"]["w"]) + params["fc"]["b"]
    for name in ("dec1", "dec2", "dec3"):
        h = jnp.maximum(h @ params[name]["w"] + params[name]["b"], 0.0)
    return h @ params["dec4"]["w"] + params["dec4"]["b"]


# ----------------------------------------------------------------------------
# Main
# ----------------------------------------------------------------------------

if __name__ == "__main__":
    B, C, T = 2, 4, 64          # batch, num_channels, temporal_len
    EMBED, NDEC = 100, 20

    key = jax.random.PRNGKey(0)
    kx, kp = jax.random.split(key)
    x = jax.random.normal(kx, (B, T, C), jnp.float32)       # (B, temporal_len, channels)
    params = init_params(kp, C, T, embed_dim=EMBED, num_decode=NDEC)

    fwd = jax.jit(functools.partial(sacl_net_forward, params))
    out = jax.block_until_ready(fwd(x))
    assert out.shape == (B, NDEC), out.shape
    assert bool(jnp.all(jnp.isfinite(out)))

    # Sanity-check against a pure-JAX reference (loose tol: MXU matmul precision).
    ref = jax.block_until_ready(jax.jit(functools.partial(reference_forward, params))(x))
    diff = float(jnp.max(jnp.abs(out - ref)))
    scale = float(jnp.max(jnp.abs(ref)))
    assert diff <= 5e-3 + 5e-2 * scale, (diff, scale)

    print("KERNEL_OK")
</pallas_src>

<mosaic_0001>
module attributes {stable_mosaic.version = 11 : i64} {
  func.func @_sacl_forward_kernel(%arg0: memref<2x4x64xf32, #tpu.memory_space<vmem>>, %arg1: memref<2x2x4xf32, #tpu.memory_space<vmem>>, %arg2: memref<2x1xf32, #tpu.memory_space<vmem>>, %arg3: memref<2x1xf32, #tpu.memory_space<vmem>>, %arg4: memref<2x1xf32, #tpu.memory_space<vmem>>, %arg5: memref<1x2x2xf32, #tpu.memory_space<vmem>>, %arg6: memref<2x1xf32, #tpu.memory_space<vmem>>, %arg7: memref<4x2x2xf32, #tpu.memory_space<vmem>>, %arg8: memref<2x1xf32, #tpu.memory_space<vmem>>, %arg9: memref<2x1xf32, #tpu.memory_space<vmem>>, %arg10: memref<2x1xf32, #tpu.memory_space<vmem>>, %arg11: memref<4x2x2xf32, #tpu.memory_space<vmem>>, %arg12: memref<2x1xf32, #tpu.memory_space<vmem>>, %arg13: memref<2x1xf32, #tpu.memory_space<vmem>>, %arg14: memref<2x1xf32, #tpu.memory_space<vmem>>, %arg15: memref<1x4x2xf32, #tpu.memory_space<vmem>>, %arg16: memref<4x1xf32, #tpu.memory_space<vmem>>, %arg17: memref<4x4x2xf32, #tpu.memory_space<vmem>>, %arg18: memref<4x1xf32, #tpu.memory_space<vmem>>, %arg19: memref<4x1xf32, #tpu.memory_space<vmem>>, %arg20: memref<4x1xf32, #tpu.memory_space<vmem>>, %arg21: memref<4x4x4xf32, #tpu.memory_space<vmem>>, %arg22: memref<4x1xf32, #tpu.memory_space<vmem>>, %arg23: memref<4x1xf32, #tpu.memory_space<vmem>>, %arg24: memref<4x1xf32, #tpu.memory_space<vmem>>, %arg25: memref<1x8x4xf32, #tpu.memory_space<vmem>>, %arg26: memref<8x1xf32, #tpu.memory_space<vmem>>, %arg27: memref<2x8x4xf32, #tpu.memory_space<vmem>>, %arg28: memref<8x1xf32, #tpu.memory_space<vmem>>, %arg29: memref<8x1xf32, #tpu.memory_space<vmem>>, %arg30: memref<8x1xf32, #tpu.memory_space<vmem>>, %arg31: memref<2x8x8xf32, #tpu.memory_space<vmem>>, %arg32: memref<8x1xf32, #tpu.memory_space<vmem>>, %arg33: memref<8x3x100xf32, #tpu.memory_space<vmem>>, %arg34: memref<1x100xf32, #tpu.memory_space<vmem>>, %arg35: memref<100x50xf32, #tpu.memory_space<vmem>>, %arg36: memref<1x50xf32, #tpu.memory_space<vmem>>, %arg37: memref<50x50xf32, #tpu.memory_space<vmem>>, %arg38: memref<1x50xf32, #tpu.memory_space<vmem>>, %arg39: memref<50x50xf32, #tpu.memory_space<vmem>>, %arg40: memref<1x50xf32, #tpu.memory_space<vmem>>, %arg41: memref<50x20xf32, #tpu.memory_space<vmem>>, %arg42: memref<1x20xf32, #tpu.memory_space<vmem>>, %arg43: memref<2x20xf32, #tpu.memory_space<vmem>>) attributes {dimension_semantics = [], scalar_prefetch = 0 : i64, scratch_operands = 0 : i64, tpu.core_type = #tpu.core_type<tc>} {
    %c0 = arith.constant 0 : index
    %c0_0 = arith.constant 0 : index
    %0 = vector.load %arg2[%c0, %c0_0] : memref<2x1xf32, #tpu.memory_space<vmem>>, vector<2x1xf32>
    %c0_1 = arith.constant 0 : index
    %c0_2 = arith.constant 0 : index
    %1 = vector.load %arg3[%c0_1, %c0_2] : memref<2x1xf32, #tpu.memory_space<vmem>>, vector<2x1xf32>
    %c0_3 = arith.constant 0 : index
    %c0_4 = arith.constant 0 : index
    %2 = vector.load %arg4[%c0_3, %c0_4] : memref<2x1xf32, #tpu.memory_space<vmem>>, vector<2x1xf32>
    %c0_5 = arith.constant 0 : index
    %c0_6 = arith.constant 0 : index
    %3 = vector.load %arg6[%c0_5, %c0_6] : memref<2x1xf32, #tpu.memory_space<vmem>>, vector<2x1xf32>
    %c0_7 = arith.constant 0 : index
    %c0_8 = arith.constant 0 : index
    %4 = vector.load %arg8[%c0_7, %c0_8] : memref<2x1xf32, #tpu.memory_space<vmem>>, vector<2x1xf32>
    %c0_9 = arith.constant 0 : index
    %c0_10 = arith.constant 0 : index
    %5 = vector.load %arg9[%c0_9, %c0_10] : memref<2x1xf32, #tpu.memory_space<vmem>>, vector<2x1xf32>
    %c0_11 = arith.constant 0 : index
    %c0_12 = arith.constant 0 : index
    %6 = vector.load %arg10[%c0_11, %c0_12] : memref<2x1xf32, #tpu.memory_space<vmem>>, vector<2x1xf32>
    %c0_13 = arith.constant 0 : index
    %c0_14 = arith.constant 0 : index
    %7 = vector.load %arg12[%c0_13, %c0_14] : memref<2x1xf32, #tpu.memory_space<vmem>>, vector<2x1xf32>
    %c0_15 = arith.constant 0 : index
    %c0_16 = arith.constant 0 : index
    %8 = vector.load %arg13[%c0_15, %c0_16] : memref<2x1xf32, #tpu.memory_space<vmem>>, vector<2x1xf32>
    %c0_17 = arith.constant 0 : index
    %c0_18 = arith.constant 0 : index
    %9 = vector.load %arg14[%c0_17, %c0_18] : memref<2x1xf32, #tpu.memory_space<vmem>>, vector<2x1xf32>
    %c0_19 = arith.constant 0 : index
    %c0_20 = arith.constant 0 : index
    %10 = vector.load %arg16[%c0_19, %c0_20] : memref<4x1xf32, #tpu.memory_space<vmem>>, vector<4x1xf32>
    %c0_21 = arith.constant 0 : index
    %c0_22 = arith.constant 0 : index
    %11 = vector.load %arg18[%c0_21, %c0_22] : memref<4x1xf32, #tpu.memory_space<vmem>>, vector<4x1xf32>
    %c0_23 = arith.constant 0 : index
    %c0_24 = arith.constant 0 : index
    %12 = vector.load %arg19[%c0_23, %c0_24] : memref<4x1xf32, #tpu.memory_space<vmem>>, vector<4x1xf32>
    %c0_25 = arith.constant 0 : index
    %c0_26 = arith.constant 0 : index
    %13 = vector.load %arg20[%c0_25, %c0_26] : memref<4x1xf32, #tpu.memory_space<vmem>>, vector<4x1xf32>
    %c0_27 = arith.constant 0 : index
    %c0_28 = arith.constant 0 : index
    %14 = vector.load %arg22[%c0_27, %c0_28] : memref<4x1xf32, #tpu.memory_space<vmem>>, vector<4x1xf32>
    %c0_29 = arith.constant 0 : index
    %c0_30 = arith.constant 0 : index
    %15 = vector.load %arg23[%c0_29, %c0_30] : memref<4x1xf32, #tpu.memory_space<vmem>>, vector<4x1xf32>
    %c0_31 = arith.constant 0 : index
    %c0_32 = arith.constant 0 : index
    %16 = vector.load %arg24[%c0_31, %c0_32] : memref<4x1xf32, #tpu.memory_space<vmem>>, vector<4x1xf32>
    %c0_33 = arith.constant 0 : index
    %c0_34 = arith.constant 0 : index
    %17 = vector.load %arg26[%c0_33, %c0_34] : memref<8x1xf32, #tpu.memory_space<vmem>>, vector<8x1xf32>
    %c0_35 = arith.constant 0 : index
    %c0_36 = arith.constant 0 : index
    %18 = vector.load %arg28[%c0_35, %c0_36] : memref<8x1xf32, #tpu.memory_space<vmem>>, vector<8x1xf32>
    %c0_37 = arith.constant 0 : index
    %c0_38 = arith.constant 0 : index
    %19 = vector.load %arg29[%c0_37, %c0_38] : memref<8x1xf32, #tpu.memory_space<vmem>>, vector<8x1xf32>
    %c0_39 = arith.constant 0 : index
    %c0_40 = arith.constant 0 : index
    %20 = vector.load %arg30[%c0_39, %c0_40] : memref<8x1xf32, #tpu.memory_space<vmem>>, vector<8x1xf32>
    %c0_41 = arith.constant 0 : index
    %c0_42 = arith.constant 0 : index
    %21 = vector.load %arg32[%c0_41, %c0_42] : memref<8x1xf32, #tpu.memory_space<vmem>>, vector<8x1xf32>
    %c0_43 = arith.constant 0 : index
    %c0_44 = arith.constant 0 : index
    %22 = vector.load %arg34[%c0_43, %c0_44] : memref<1x100xf32, #tpu.memory_space<vmem>>, vector<1x100xf32>
    %c0_45 = arith.constant 0 : index
    %c0_46 = arith.constant 0 : index
    %23 = vector.load %arg35[%c0_45, %c0_46] : memref<100x50xf32, #tpu.memory_space<vmem>>, vector<100x50xf32>
    %c0_47 = arith.constant 0 : index
    %c0_48 = arith.constant 0 : index
    %24 = vector.load %arg36[%c0_47, %c0_48] : memref<1x50xf32, #tpu.memory_space<vmem>>, vector<1x50xf32>
    %c0_49 = arith.constant 0 : index
    %c0_50 = arith.constant 0 : index
    %25 = vector.load %arg37[%c0_49, %c0_50] : memref<50x50xf32, #tpu.memory_space<vmem>>, vector<50x50xf32>
    %c0_51 = arith.constant 0 : index
    %c0_52 = arith.constant 0 : index
    %26 = vector.load %arg38[%c0_51, %c0_52] : memref<1x50xf32, #tpu.memory_space<vmem>>, vector<1x50xf32>
    %c0_53 = arith.constant 0 : index
    %c0_54 = arith.constant 0 : index
    %27 = vector.load %arg39[%c0_53, %c0_54] : memref<50x50xf32, #tpu.memory_space<vmem>>, vector<50x50xf32>
    %c0_55 = arith.constant 0 : index
    %c0_56 = arith.constant 0 : index
    %28 = vector.load %arg40[%c0_55, %c0_56] : memref<1x50xf32, #tpu.memory_space<vmem>>, vector<1x50xf32>
    %c0_57 = arith.constant 0 : index
    %c0_58 = arith.constant 0 : index
    %29 = vector.load %arg41[%c0_57, %c0_58] : memref<50x20xf32, #tpu.memory_space<vmem>>, vector<50x20xf32>
    %c0_59 = arith.constant 0 : index
    %c0_60 = arith.constant 0 : index
    %30 = vector.load %arg42[%c0_59, %c0_60] : memref<1x20xf32, #tpu.memory_space<vmem>>, vector<1x20xf32>
    %c0_61 = arith.constant 0 : index
    %c0_62 = arith.constant 0 : index
    %c0_63 = arith.constant 0 : index
    %31 = vector.load %arg0[%c0_61, %c0_62, %c0_63] : memref<2x4x64xf32, #tpu.memory_space<vmem>>, vector<1x4x64xf32>
    %32 = vector.shape_cast %31 : vector<1x4x64xf32> to vector<4x64xf32>
    %c1 = arith.constant 1 : index
    %c0_64 = arith.constant 0 : index
    %c0_65 = arith.constant 0 : index
    %33 = vector.load %arg0[%c1, %c0_64, %c0_65] : memref<2x4x64xf32, #tpu.memory_space<vmem>>, vector<1x4x64xf32>
    %34 = vector.shape_cast %33 : vector<1x4x64xf32> to vector<4x64xf32>
    %c0_66 = arith.constant 0 : index
    %c0_67 = arith.constant 0 : index
    %c0_68 = arith.constant 0 : index
    %35 = vector.load %arg1[%c0_66, %c0_67, %c0_68] : memref<2x2x4xf32, #tpu.memory_space<vmem>>, vector<1x2x4xf32>
    %36 = vector.shape_cast %35 : vector<1x2x4xf32> to vector<2x4xf32>
    %c1_69 = arith.constant 1 : index
    %c0_70 = arith.constant 0 : index
    %c0_71 = arith.constant 0 : index
    %37 = vector.load %arg1[%c1_69, %c0_70, %c0_71] : memref<2x2x4xf32, #tpu.memory_space<vmem>>, vector<1x2x4xf32>
    %38 = vector.shape_cast %37 : vector<1x2x4xf32> to vector<2x4xf32>
    %39 = vector.extract_strided_slice %32 {offsets = [0, 0], sizes = [4, 63], strides = [1, 1]} : vector<4x64xf32> to vector<4x63xf32>
    %cst = arith.constant dense<0.000000e+00> : vector<2x63xf32>
    %40 = tpu.matmul %36, %39, %cst {dimension_numbers = #tpu.dot_dimension_numbers<[1], [0], [0], [1], [0, 0, 1, 1], [], []>} : vector<2x4xf32>, vector<4x63xf32>, vector<2x63xf32> -> vector<2x63xf32>
    %41 = vector.extract_strided_slice %32 {offsets = [0, 1], sizes = [4, 63], strides = [1, 1]} : vector<4x64xf32> to vector<4x63xf32>
    %cst_72 = arith.constant dense<0.000000e+00> : vector<2x63xf32>
    %42 = tpu.matmul %38, %41, %cst_72 {dimension_numbers = #tpu.dot_dimension_numbers<[1], [0], [0], [1], [0, 0, 1, 1], [], []>} : vector<2x4xf32>, vector<4x63xf32>, vector<2x63xf32> -> vector<2x63xf32>
    %43 = arith.addf %40, %42 : vector<2x63xf32>
    %44 = vector.broadcast %0 : vector<2x1xf32> to vector<2x63xf32>
    %45 = arith.addf %43, %44 : vector<2x63xf32>
    %46 = vector.extract_strided_slice %34 {offsets = [0, 0], sizes = [4, 63], strides = [1, 1]} : vector<4x64xf32> to vector<4x63xf32>
    %cst_73 = arith.constant dense<0.000000e+00> : vector<2x63xf32>
    %47 = tpu.matmul %36, %46, %cst_73 {dimension_numbers = #tpu.dot_dimension_numbers<[1], [0], [0], [1], [0, 0, 1, 1], [], []>} : vector<2x4xf32>, vector<4x63xf32>, vector<2x63xf32> -> vector<2x63xf32>
    %48 = vector.extract_strided_slice %34 {offsets = [0, 1], sizes = [4, 63], strides = [1, 1]} : vector<4x64xf32> to vector<4x63xf32>
    %cst_74 = arith.constant dense<0.000000e+00> : vector<2x63xf32>
    %49 = tpu.matmul %38, %48, %cst_74 {dimension_numbers = #tpu.dot_dimension_numbers<[1], [0], [0], [1], [0, 0, 1, 1], [], []>} : vector<2x4xf32>, vector<4x63xf32>, vector<2x63xf32> -> vector<2x63xf32>
    %50 = arith.addf %47, %49 : vector<2x63xf32>
    %51 = vector.broadcast %0 : vector<2x1xf32> to vector<2x63xf32>
    %52 = arith.addf %50, %51 : vector<2x63xf32>
    %cst_75 = arith.constant dense<0.000000e+00> : vector<2xf32>
    %53 = vector.multi_reduction <add>, %45, %cst_75 [1] : vector<2x63xf32> to vector<2xf32>
    %54 = vector.shape_cast %53 : vector<2xf32> to vector<2x1xf32>
    %55 = arith.mulf %45, %45 : vector<2x63xf32>
    %cst_76 = arith.constant dense<0.000000e+00> : vector<2xf32>
    %56 = vector.multi_reduction <add>, %55, %cst_76 [1] : vector<2x63xf32> to vector<2xf32>
    %57 = vector.shape_cast %56 : vector<2xf32> to vector<2x1xf32>
    %cst_77 = arith.constant dense<0.000000e+00> : vector<2xf32>
    %58 = vector.multi_reduction <add>, %52, %cst_77 [1] : vector<2x63xf32> to vector<2xf32>
    %59 = vector.shape_cast %58 : vector<2xf32> to vector<2x1xf32>
    %60 = arith.addf %54, %59 : vector<2x1xf32>
    %61 = arith.mulf %52, %52 : vector<2x63xf32>
    %cst_78 = arith.constant dense<0.000000e+00> : vector<2xf32>
    %62 = vector.multi_reduction <add>, %61, %cst_78 [1] : vector<2x63xf32> to vector<2xf32>
    %63 = vector.shape_cast %62 : vector<2xf32> to vector<2x1xf32>
    %64 = arith.addf %57, %63 : vector<2x1xf32>
    %cst_79 = arith.constant 1.260000e+02 : f32
    %65 = vector.broadcast %cst_79 : f32 to vector<2x1xf32>
    %66 = arith.divf %60, %65 : vector<2x1xf32>
    %cst_80 = arith.constant 1.260000e+02 : f32
    %67 = vector.broadcast %cst_80 : f32 to vector<2x1xf32>
    %68 = arith.divf %64, %67 : vector<2x1xf32>
    %69 = arith.mulf %66, %66 : vector<2x1xf32>
    %70 = arith.subf %68, %69 : vector<2x1xf32>
    %cst_81 = arith.constant 0.000000e+00 : f32
    %71 = vector.broadcast %cst_81 : f32 to vector<2x1xf32>
    %72 = arith.maximumf %70, %71 : vector<2x1xf32>
    %cst_82 = arith.constant 9.99999974E-6 : f32
    %73 = vector.broadcast %cst_82 : f32 to vector<2x1xf32>
    %74 = arith.addf %72, %73 : vector<2x1xf32>
    %75 = math.rsqrt %74 : vector<2x1xf32>
    %76 = arith.mulf %1, %75 : vector<2x1xf32>
    %77 = arith.mulf %66, %76 : vector<2x1xf32>
    %78 = arith.subf %2, %77 : vector<2x1xf32>
    %79 = vector.broadcast %76 : vector<2x1xf32> to vector<2x63xf32>
    %80 = arith.mulf %45, %79 : vector<2x63xf32>
    %81 = vector.broadcast %78 : vector<2x1xf32> to vector<2x63xf32>
    %82 = arith.addf %80, %81 : vector<2x63xf32>
    %cst_83 = arith.constant 0.000000e+00 : f32
    %83 = vector.broadcast %cst_83 : f32 to vector<2x63xf32>
    %84 = arith.cmpf ogt, %82, %83 : vector<2x63xf32>
    %cst_84 = arith.constant 0.000000e+00 : f32
    %85 = vector.broadcast %cst_84 : f32 to vector<2x63xf32>
    %86 = arith.minimumf %82, %85 : vector<2x63xf32>
    %87 = math.exp %86 : vector<2x63xf32>
    %cst_85 = arith.constant 1.000000e+00 : f32
    %88 = vector.broadcast %cst_85 : f32 to vector<2x63xf32>
    %89 = arith.subf %87, %88 : vector<2x63xf32>
    %90 = arith.select %84, %82, %89 : vector<2x63xi1>, vector<2x63xf32>
    %91 = vector.broadcast %76 : vector<2x1xf32> to vector<2x63xf32>
    %92 = arith.mulf %52, %91 : vector<2x63xf32>
    %93 = vector.broadcast %78 : vector<2x1xf32> to vector<2x63xf32>
    %94 = arith.addf %92, %93 : vector<2x63xf32>
    %cst_86 = arith.constant 0.000000e+00 : f32
    %95 = vector.broadcast %cst_86 : f32 to vector<2x63xf32>
    %96 = arith.cmpf ogt, %94, %95 : vector<2x63xf32>
    %cst_87 = arith.constant 0.000000e+00 : f32
    %97 = vector.broadcast %cst_87 : f32 to vector<2x63xf32>
    %98 = arith.minimumf %94, %97 : vector<2x63xf32>
    %99 = math.exp %98 : vector<2x63xf32>
    %cst_88 = arith.constant 1.000000e+00 : f32
    %100 = vector.broadcast %cst_88 : f32 to vector<2x63xf32>
    %101 = arith.subf %99, %100 : vector<2x63xf32>
    %102 = arith.select %96, %94, %101 : vector<2x63xi1>, vector<2x63xf32>
    %c0_89 = arith.constant 0 : index
    %c0_90 = arith.constant 0 : index
    %c0_91 = arith.constant 0 : index
    %103 = vector.load %arg5[%c0_89, %c0_90, %c0_91] : memref<1x2x2xf32, #tpu.memory_space<vmem>>, vector<1x2x2xf32>
    %104 = vector.shape_cast %103 : vector<1x2x2xf32> to vector<2x2xf32>
    %cst_92 = arith.constant dense<0.000000e+00> : vector<2x63xf32>
    %105 = tpu.matmul %104, %90, %cst_92 {dimension_numbers = #tpu.dot_dimension_numbers<[1], [0], [0], [1], [0, 0, 1, 1], [], []>} : vector<2x2xf32>, vector<2x63xf32>, vector<2x63xf32> -> vector<2x63xf32>
    %106 = vector.broadcast %3 : vector<2x1xf32> to vector<2x63xf32>
    %107 = arith.addf %105, %106 : vector<2x63xf32>
    %cst_93 = arith.constant dense<0.000000e+00> : vector<2x63xf32>
    %108 = tpu.matmul %104, %102, %cst_93 {dimension_numbers = #tpu.dot_dimension_numbers<[1], [0], [0], [1], [0, 0, 1, 1], [], []>} : vector<2x2xf32>, vector<2x63xf32>, vector<2x63xf32> -> vector<2x63xf32>
    %109 = vector.broadcast %3 : vector<2x1xf32> to vector<2x63xf32>
    %110 = arith.addf %108, %109 : vector<2x63xf32>
    %c0_94 = arith.constant 0 : index
    %c0_95 = arith.constant 0 : index
    %c0_96 = arith.constant 0 : index
    %111 = vector.load %arg7[%c0_94, %c0_95, %c0_96] : memref<4x2x2xf32, #tpu.memory_space<vmem>>, vector<1x2x2xf32>
    %112 = vector.shape_cast %111 : vector<1x2x2xf32> to vector<2x2xf32>
    %c1_97 = arith.constant 1 : index
    %c0_98 = arith.constant 0 : index
    %c0_99 = arith.constant 0 : index
    %113 = vector.load %arg7[%c1_97, %c0_98, %c0_99] : memref<4x2x2xf32, #tpu.memory_space<vmem>>, vector<1x2x2xf32>
    %114 = vector.shape_cast %113 : vector<1x2x2xf32> to vector<2x2xf32>
    %c2 = arith.constant 2 : index
    %c0_100 = arith.constant 0 : index
    %c0_101 = arith.constant 0 : index
    %115 = vector.load %arg7[%c2, %c0_100, %c0_101] : memref<4x2x2xf32, #tpu.memory_space<vmem>>, vector<1x2x2xf32>
    %116 = vector.shape_cast %115 : vector<1x2x2xf32> to vector<2x2xf32>
    %c3 = arith.constant 3 : index
    %c0_102 = arith.constant 0 : index
    %c0_103 = arith.constant 0 : index
    %117 = vector.load %arg7[%c3, %c0_102, %c0_103] : memref<4x2x2xf32, #tpu.memory_space<vmem>>, vector<1x2x2xf32>
    %118 = vector.shape_cast %117 : vector<1x2x2xf32> to vector<2x2xf32>
    %119 = tpu.iota {dimensions = array<i32: 0>} : vector<63x69xi32>
    %120 = tpu.iota {dimensions = array<i32: 1>} : vector<63x69xi32>
    %c3_i32 = arith.constant 3 : i32
    %121 = vector.broadcast %c3_i32 : i32 to vector<63x69xi32>
    %122 = arith.addi %119, %121 : vector<63x69xi32>
    %123 = arith.cmpi eq, %120, %122 : vector<63x69xi32>
    %124 = arith.extui %123 : vector<63x69xi1> to vector<63x69xi32>
    %125 = arith.sitofp %124 : vector<63x69xi32> to vector<63x69xf32>
    %cst_104 = arith.constant dense<0.000000e+00> : vector<2x69xf32>
    %126 = tpu.matmul %90, %125, %cst_104 {dimension_numbers = #tpu.dot_dimension_numbers<[1], [0], [0], [1], [0, 0, 1, 1], [], []>} : vector<2x63xf32>, vector<63x69xf32>, vector<2x69xf32> -> vector<2x69xf32>
    %127 = vector.extract_strided_slice %126 {offsets = [0, 0], sizes = [2, 66], strides = [1, 1]} : vector<2x69xf32> to vector<2x66xf32>
    %cst_105 = arith.constant dense<0.000000e+00> : vector<2x66xf32>
    %128 = tpu.matmul %112, %127, %cst_105 {dimension_numbers = #tpu.dot_dimension_numbers<[1], [0], [0], [1], [0, 0, 1, 1], [], []>} : vector<2x2xf32>, vector<2x66xf32>, vector<2x66xf32> -> vector<2x66xf32>
    %129 = vector.extract_strided_slice %126 {offsets = [0, 1], sizes = [2, 66], strides = [1, 1]} : vector<2x69xf32> to vector<2x66xf32>
    %cst_106 = arith.constant dense<0.000000e+00> : vector<2x66xf32>
    %130 = tpu.matmul %114, %129, %cst_106 {dimension_numbers = #tpu.dot_dimension_numbers<[1], [0], [0], [1], [0, 0, 1, 1], [], []>} : vector<2x2xf32>, vector<2x66xf32>, vector<2x66xf32> -> vector<2x66xf32>
    %131 = arith.addf %128, %130 : vector<2x66xf32>
    %132 = vector.extract_strided_slice %126 {offsets = [0, 2], sizes = [2, 66], strides = [1, 1]} : vector<2x69xf32> to vector<2x66xf32>
    %cst_107 = arith.constant dense<0.000000e+00> : vector<2x66xf32>
    %133 = tpu.matmul %116, %132, %cst_107 {dimension_numbers = #tpu.dot_dimension_numbers<[1], [0], [0], [1], [0, 0, 1, 1], [], []>} : vector<2x2xf32>, vector<2x66xf32>, vector<2x66xf32> -> vector<2x66xf32>
    %134 = arith.addf %131, %133 : vector<2x66xf32>
    %135 = vector.extract_strided_slice %126 {offsets = [0, 3], sizes = [2, 66], strides = [1, 1]} : vector<2x69xf32> to vector<2x66xf32>
    %cst_108 = arith.constant dense<0.000000e+00> : vector<2x66xf32>
    %136 = tpu.matmul %118, %135, %cst_108 {dimension_numbers = #tpu.dot_dimension_numbers<[1], [0], [0], [1], [0, 0, 1, 1], [], []>} : vector<2x2xf32>, vector<2x66xf32>, vector<2x66xf32> -> vector<2x66xf32>
    %137 = arith.addf %134, %136 : vector<2x66xf32>
    %138 = vector.broadcast %4 : vector<2x1xf32> to vector<2x66xf32>
    %139 = arith.addf %137, %138 : vector<2x66xf32>
    %cst_109 = arith.constant dense<0.000000e+00> : vector<2x69xf32>
    %140 = tpu.matmul %102, %125, %cst_109 {dimension_numbers = #tpu.dot_dimension_numbers<[1], [0], [0], [1], [0, 0, 1, 1], [], []>} : vector<2x63xf32>, vector<63x69xf32>, vector<2x69xf32> -> vector<2x69xf32>
    %141 = vector.extract_strided_slice %140 {offsets = [0, 0], sizes = [2, 66], strides = [1, 1]} : vector<2x69xf32> to vector<2x66xf32>
    %cst_110 = arith.constant dense<0.000000e+00> : vector<2x66xf32>
    %142 = tpu.matmul %112, %141, %cst_110 {dimension_numbers = #tpu.dot_dimension_numbers<[1], [0], [0], [1], [0, 0, 1, 1], [], []>} : vector<2x2xf32>, vector<2x66xf32>, vector<2x66xf32> -> vector<2x66xf32>
    %143 = vector.extract_strided_slice %140 {offsets = [0, 1], sizes = [2, 66], strides = [1, 1]} : vector<2x69xf32> to vector<2x66xf32>
    %cst_111 = arith.constant dense<0.000000e+00> : vector<2x66xf32>
    %144 = tpu.matmul %114, %143, %cst_111 {dimension_numbers = #tpu.dot_dimension_numbers<[1], [0], [0], [1], [0, 0, 1, 1], [], []>} : vector<2x2xf32>, vector<2x66xf32>, vector<2x66xf32> -> vector<2x66xf32>
    %145 = arith.addf %142, %144 : vector<2x66xf32>
    %146 = vector.extract_strided_slice %140 {offsets = [0, 2], sizes = [2, 66], strides = [1, 1]} : vector<2x69xf32> to vector<2x66xf32>
    %cst_112 = arith.constant dense<0.000000e+00> : vector<2x66xf32>
    %147 = tpu.matmul %116, %146, %cst_112 {dimension_numbers = #tpu.dot_dimension_numbers<[1], [0], [0], [1], [0, 0, 1, 1], [], []>} : vector<2x2xf32>, vector<2x66xf32>, vector<2x66xf32> -> vector<2x66xf32>
    %148 = arith.addf %145, %147 : vector<2x66xf32>
    %149 = vector.extract_strided_slice %140 {offsets = [0, 3], sizes = [2, 66], strides = [1, 1]} : vector<2x69xf32> to vector<2x66xf32>
    %cst_113 = arith.constant dense<0.000000e+00> : vector<2x66xf32>
    %150 = tpu.matmul %118, %149, %cst_113 {dimension_numbers = #tpu.dot_dimension_numbers<[1], [0], [0], [1], [0, 0, 1, 1], [], []>} : vector<2x2xf32>, vector<2x66xf32>, vector<2x66xf32> -> vector<2x66xf32>
    %151 = arith.addf %148, %150 : vector<2x66xf32>
    %152 = vector.broadcast %4 : vector<2x1xf32> to vector<2x66xf32>
    %153 = arith.addf %151, %152 : vector<2x66xf32>
    %cst_114 = arith.constant dense<0.000000e+00> : vector<2xf32>
    %154 = vector.multi_reduction <add>, %139, %cst_114 [1] : vector<2x66xf32> to vector<2xf32>
    %155 = vector.shape_cast %154 : vector<2xf32> to vector<2x1xf32>
    %156 = arith.mulf %139, %139 : vector<2x66xf32>
    %cst_115 = arith.constant dense<0.000000e+00> : vector<2xf32>
    %157 = vector.multi_reduction <add>, %156, %cst_115 [1] : vector<2x66xf32> to vector<2xf32>
    %158 = vector.shape_cast %157 : vector<2xf32> to vector<2x1xf32>
    %cst_116 = arith.constant dense<0.000000e+00> : vector<2xf32>
    %159 = vector.multi_reduction <add>, %153, %cst_116 [1] : vector<2x66xf32> to vector<2xf32>
    %160 = vector.shape_cast %159 : vector<2xf32> to vector<2x1xf32>
    %161 = arith.addf %155, %160 : vector<2x1xf32>
    %162 = arith.mulf %153, %153 : vector<2x66xf32>
    %cst_117 = arith.constant dense<0.000000e+00> : vector<2xf32>
    %163 = vector.multi_reduction <add>, %162, %cst_117 [1] : vector<2x66xf32> to vector<2xf32>
    %164 = vector.shape_cast %163 : vector<2xf32> to vector<2x1xf32>
    %165 = arith.addf %158, %164 : vector<2x1xf32>
    %cst_118 = arith.constant 1.320000e+02 : f32
    %166 = vector.broadcast %cst_118 : f32 to vector<2x1xf32>
    %167 = arith.divf %161, %166 : vector<2x1xf32>
    %cst_119 = arith.constant 1.320000e+02 : f32
    %168 = vector.broadcast %cst_119 : f32 to vector<2x1xf32>
    %169 = arith.divf %165, %168 : vector<2x1xf32>
    %170 = arith.mulf %167, %167 : vector<2x1xf32>
    %171 = arith.subf %169, %170 : vector<2x1xf32>
    %cst_120 = arith.constant 0.000000e+00 : f32
    %172 = vector.broadcast %cst_120 : f32 to vector<2x1xf32>
    %173 = arith.maximumf %171, %172 : vector<2x1xf32>
    %cst_121 = arith.constant 9.99999974E-6 : f32
    %174 = vector.broadcast %cst_121 : f32 to vector<2x1xf32>
    %175 = arith.addf %173, %174 : vector<2x1xf32>
    %176 = math.rsqrt %175 : vector<2x1xf32>
    %177 = arith.mulf %5, %176 : vector<2x1xf32>
    %178 = arith.mulf %167, %177 : vector<2x1xf32>
    %179 = arith.subf %6, %178 : vector<2x1xf32>
    %180 = vector.broadcast %177 : vector<2x1xf32> to vector<2x66xf32>
    %181 = arith.mulf %139, %180 : vector<2x66xf32>
    %182 = vector.broadcast %179 : vector<2x1xf32> to vector<2x66xf32>
    %183 = arith.addf %181, %182 : vector<2x66xf32>
    %cst_122 = arith.constant 0.000000e+00 : f32
    %184 = vector.broadcast %cst_122 : f32 to vector<2x66xf32>
    %185 = arith.cmpf ogt, %183, %184 : vector<2x66xf32>
    %cst_123 = arith.constant 0.000000e+00 : f32
    %186 = vector.broadcast %cst_123 : f32 to vector<2x66xf32>
    %187 = arith.minimumf %183, %186 : vector<2x66xf32>
    %188 = math.exp %187 : vector<2x66xf32>
    %cst_124 = arith.constant 1.000000e+00 : f32
    %189 = vector.broadcast %cst_124 : f32 to vector<2x66xf32>
    %190 = arith.subf %188, %189 : vector<2x66xf32>
    %191 = arith.select %185, %183, %190 : vector<2x66xi1>, vector<2x66xf32>
    %192 = vector.broadcast %177 : vector<2x1xf32> to vector<2x66xf32>
    %193 = arith.mulf %153, %192 : vector<2x66xf32>
    %194 = vector.broadcast %179 : vector<2x1xf32> to vector<2x66xf32>
    %195 = arith.addf %193, %194 : vector<2x66xf32>
    %cst_125 = arith.constant 0.000000e+00 : f32
    %196 = vector.broadcast %cst_125 : f32 to vector<2x66xf32>
    %197 = arith.cmpf ogt, %195, %196 : vector<2x66xf32>
    %cst_126 = arith.constant 0.000000e+00 : f32
    %198 = vector.broadcast %cst_126 : f32 to vector<2x66xf32>
    %199 = arith.minimumf %195, %198 : vector<2x66xf32>
    %200 = math.exp %199 : vector<2x66xf32>
    %cst_127 = arith.constant 1.000000e+00 : f32
    %201 = vector.broadcast %cst_127 : f32 to vector<2x66xf32>
    %202 = arith.subf %200, %201 : vector<2x66xf32>
    %203 = arith.select %197, %195, %202 : vector<2x66xi1>, vector<2x66xf32>
    %c0_128 = arith.constant 0 : index
    %c0_129 = arith.constant 0 : index
    %c0_130 = arith.constant 0 : index
    %204 = vector.load %arg11[%c0_128, %c0_129, %c0_130] : memref<4x2x2xf32, #tpu.memory_space<vmem>>, vector<1x2x2xf32>
    %205 = vector.shape_cast %204 : vector<1x2x2xf32> to vector<2x2xf32>
    %c1_131 = arith.constant 1 : index
    %c0_132 = arith.constant 0 : index
    %c0_133 = arith.constant 0 : index
    %206 = vector.load %arg11[%c1_131, %c0_132, %c0_133] : memref<4x2x2xf32, #tpu.memory_space<vmem>>, vector<1x2x2xf32>
    %207 = vector.shape_cast %206 : vector<1x2x2xf32> to vector<2x2xf32>
    %c2_134 = arith.constant 2 : index
    %c0_135 = arith.constant 0 : index
    %c0_136 = arith.constant 0 : index
    %208 = vector.load %arg11[%c2_134, %c0_135, %c0_136] : memref<4x2x2xf32, #tpu.memory_space<vmem>>, vector<1x2x2xf32>
    %209 = vector.shape_cast %208 : vector<1x2x2xf32> to vector<2x2xf32>
    %c3_137 = arith.constant 3 : index
    %c0_138 = arith.constant 0 : index
    %c0_139 = arith.constant 0 : index
    %210 = vector.load %arg11[%c3_137, %c0_138, %c0_139] : memref<4x2x2xf32, #tpu.memory_space<vmem>>, vector<1x2x2xf32>
    %211 = vector.shape_cast %210 : vector<1x2x2xf32> to vector<2x2xf32>
    %212 = vector.extract_strided_slice %191 {offsets = [0, 0], sizes = [2, 63], strides = [1, 1]} : vector<2x66xf32> to vector<2x63xf32>
    %cst_140 = arith.constant dense<0.000000e+00> : vector<2x63xf32>
    %213 = tpu.matmul %205, %212, %cst_140 {dimension_numbers = #tpu.dot_dimension_numbers<[1], [0], [0], [1], [0, 0, 1, 1], [], []>} : vector<2x2xf32>, vector<2x63xf32>, vector<2x63xf32> -> vector<2x63xf32>
    %214 = vector.extract_strided_slice %191 {offsets = [0, 1], sizes = [2, 63], strides = [1, 1]} : vector<2x66xf32> to vector<2x63xf32>
    %cst_141 = arith.constant dense<0.000000e+00> : vector<2x63xf32>
    %215 = tpu.matmul %207, %214, %cst_141 {dimension_numbers = #tpu.dot_dimension_numbers<[1], [0], [0], [1], [0, 0, 1, 1], [], []>} : vector<2x2xf32>, vector<2x63xf32>, vector<2x63xf32> -> vector<2x63xf32>
    %216 = arith.addf %213, %215 : vector<2x63xf32>
    %217 = vector.extract_strided_slice %191 {offsets = [0, 2], sizes = [2, 63], strides = [1, 1]} : vector<2x66xf32> to vector<2x63xf32>
    %cst_142 = arith.constant dense<0.000000e+00> : vector<2x63xf32>
    %218 = tpu.matmul %209, %217, %cst_142 {dimension_numbers = #tpu.dot_dimension_numbers<[1], [0], [0], [1], [0, 0, 1, 1], [], []>} : vector<2x2xf32>, vector<2x63xf32>, vector<2x63xf32> -> vector<2x63xf32>
    %219 = arith.addf %216, %218 : vector<2x63xf32>
    %220 = vector.extract_strided_slice %191 {offsets = [0, 3], sizes = [2, 63], strides = [1, 1]} : vector<2x66xf32> to vector<2x63xf32>
    %cst_143 = arith.constant dense<0.000000e+00> : vector<2x63xf32>
    %221 = tpu.matmul %211, %220, %cst_143 {dimension_numbers = #tpu.dot_dimension_numbers<[1], [0], [0], [1], [0, 0, 1, 1], [], []>} : vector<2x2xf32>, vector<2x63xf32>, vector<2x63xf32> -> vector<2x63xf32>
    %222 = arith.addf %219, %221 : vector<2x63xf32>
    %223 = vector.broadcast %7 : vector<2x1xf32> to vector<2x63xf32>
    %224 = arith.addf %222, %223 : vector<2x63xf32>
    %225 = vector.extract_strided_slice %203 {offsets = [0, 0], sizes = [2, 63], strides = [1, 1]} : vector<2x66xf32> to vector<2x63xf32>
    %cst_144 = arith.constant dense<0.000000e+00> : vector<2x63xf32>
    %226 = tpu.matmul %205, %225, %cst_144 {dimension_numbers = #tpu.dot_dimension_numbers<[1], [0], [0], [1], [0, 0, 1, 1], [], []>} : vector<2x2xf32>, vector<2x63xf32>, vector<2x63xf32> -> vector<2x63xf32>
    %227 = vector.extract_strided_slice %203 {offsets = [0, 1], sizes = [2, 63], strides = [1, 1]} : vector<2x66xf32> to vector<2x63xf32>
    %cst_145 = arith.constant dense<0.000000e+00> : vector<2x63xf32>
    %228 = tpu.matmul %207, %227, %cst_145 {dimension_numbers = #tpu.dot_dimension_numbers<[1], [0], [0], [1], [0, 0, 1, 1], [], []>} : vector<2x2xf32>, vector<2x63xf32>, vector<2x63xf32> -> vector<2x63xf32>
    %229 = arith.addf %226, %228 : vector<2x63xf32>
    %230 = vector.extract_strided_slice %203 {offsets = [0, 2], sizes = [2, 63], strides = [1, 1]} : vector<2x66xf32> to vector<2x63xf32>
    %cst_146 = arith.constant dense<0.000000e+00> : vector<2x63xf32>
    %231 = tpu.matmul %209, %230, %cst_146 {dimension_numbers = #tpu.dot_dimension_numbers<[1], [0], [0], [1], [0, 0, 1, 1], [], []>} : vector<2x2xf32>, vector<2x63xf32>, vector<2x63xf32> -> vector<2x63xf32>
    %232 = arith.addf %229, %231 : vector<2x63xf32>
    %233 = vector.extract_strided_slice %203 {offsets = [0, 3], sizes = [2, 63], strides = [1, 1]} : vector<2x66xf32> to vector<2x63xf32>
    %cst_147 = arith.constant dense<0.000000e+00> : vector<2x63xf32>
    %234 = tpu.matmul %211, %233, %cst_147 {dimension_numbers = #tpu.dot_dimension_numbers<[1], [0], [0], [1], [0, 0, 1, 1], [], []>} : vector<2x2xf32>, vector<2x63xf32>, vector<2x63xf32> -> vector<2x63xf32>
    %235 = arith.addf %232, %234 : vector<2x63xf32>
    %236 = vector.broadcast %7 : vector<2x1xf32> to vector<2x63xf32>
    %237 = arith.addf %235, %236 : vector<2x63xf32>
    %238 = arith.addf %224, %107 : vector<2x63xf32>
    %239 = arith.addf %237, %110 : vector<2x63xf32>
    %240 = tpu.iota {dimensions = array<i32: 0>} : vector<57x15xi32>
    %241 = tpu.iota {dimensions = array<i32: 1>} : vector<57x15xi32>
    %c4_i32 = arith.constant 4 : i32
    %242 = vector.broadcast %c4_i32 : i32 to vector<57x15xi32>
    %243 = arith.muli %242, %241 : vector<57x15xi32>
    %244 = arith.cmpi eq, %240, %243 : vector<57x15xi32>
    %245 = arith.extui %244 : vector<57x15xi1> to vector<57x15xi32>
    %246 = arith.sitofp %245 : vector<57x15xi32> to vector<57x15xf32>
    %247 = vector.extract_strided_slice %238 {offsets = [0, 0], sizes = [2, 57], strides = [1, 1]} : vector<2x63xf32> to vector<2x57xf32>
    %248 = vector.extract_strided_slice %238 {offsets = [0, 1], sizes = [2, 57], strides = [1, 1]} : vector<2x63xf32> to vector<2x57xf32>
    %249 = arith.maximumf %247, %248 : vector<2x57xf32>
    %250 = vector.extract_strided_slice %238 {offsets = [0, 2], sizes = [2, 57], strides = [1, 1]} : vector<2x63xf32> to vector<2x57xf32>
    %251 = vector.extract_strided_slice %238 {offsets = [0, 3], sizes = [2, 57], strides = [1, 1]} : vector<2x63xf32> to vector<2x57xf32>
    %252 = arith.maximumf %250, %251 : vector<2x57xf32>
    %253 = arith.maximumf %249, %252 : vector<2x57xf32>
    %cst_148 = arith.constant dense<0.000000e+00> : vector<2x15xf32>
    %254 = tpu.matmul %253, %246, %cst_148 {dimension_numbers = #tpu.dot_dimension_numbers<[1], [0], [0], [1], [0, 0, 1, 1], [], []>} : vector<2x57xf32>, vector<57x15xf32>, vector<2x15xf32> -> vector<2x15xf32>
    %255 = vector.extract_strided_slice %239 {offsets = [0, 0], sizes = [2, 57], strides = [1, 1]} : vector<2x63xf32> to vector<2x57xf32>
    %256 = vector.extract_strided_slice %239 {offsets = [0, 1], sizes = [2, 57], strides = [1, 1]} : vector<2x63xf32> to vector<2x57xf32>
    %257 = arith.maximumf %255, %256 : vector<2x57xf32>
    %258 = vector.extract_strided_slice %239 {offsets = [0, 2], sizes = [2, 57], strides = [1, 1]} : vector<2x63xf32> to vector<2x57xf32>
    %259 = vector.extract_strided_slice %239 {offsets = [0, 3], sizes = [2, 57], strides = [1, 1]} : vector<2x63xf32> to vector<2x57xf32>
    %260 = arith.maximumf %258, %259 : vector<2x57xf32>
    %261 = arith.maximumf %257, %260 : vector<2x57xf32>
    %cst_149 = arith.constant dense<0.000000e+00> : vector<2x15xf32>
    %262 = tpu.matmul %261, %246, %cst_149 {dimension_numbers = #tpu.dot_dimension_numbers<[1], [0], [0], [1], [0, 0, 1, 1], [], []>} : vector<2x57xf32>, vector<57x15xf32>, vector<2x15xf32> -> vector<2x15xf32>
    %cst_150 = arith.constant dense<0.000000e+00> : vector<2xf32>
    %263 = vector.multi_reduction <add>, %254, %cst_150 [1] : vector<2x15xf32> to vector<2xf32>
    %264 = vector.shape_cast %263 : vector<2xf32> to vector<2x1xf32>
    %265 = arith.mulf %254, %254 : vector<2x15xf32>
    %cst_151 = arith.constant dense<0.000000e+00> : vector<2xf32>
    %266 = vector.multi_reduction <add>, %265, %cst_151 [1] : vector<2x15xf32> to vector<2xf32>
    %267 = vector.shape_cast %266 : vector<2xf32> to vector<2x1xf32>
    %cst_152 = arith.constant dense<0.000000e+00> : vector<2xf32>
    %268 = vector.multi_reduction <add>, %262, %cst_152 [1] : vector<2x15xf32> to vector<2xf32>
    %269 = vector.shape_cast %268 : vector<2xf32> to vector<2x1xf32>
    %270 = arith.addf %264, %269 : vector<2x1xf32>
    %271 = arith.mulf %262, %262 : vector<2x15xf32>
    %cst_153 = arith.constant dense<0.000000e+00> : vector<2xf32>
    %272 = vector.multi_reduction <add>, %271, %cst_153 [1] : vector<2x15xf32> to vector<2xf32>
    %273 = vector.shape_cast %272 : vector<2xf32> to vector<2x1xf32>
    %274 = arith.addf %267, %273 : vector<2x1xf32>
    %cst_154 = arith.constant 3.000000e+01 : f32
    %275 = vector.broadcast %cst_154 : f32 to vector<2x1xf32>
    %276 = arith.divf %270, %275 : vector<2x1xf32>
    %cst_155 = arith.constant 3.000000e+01 : f32
    %277 = vector.broadcast %cst_155 : f32 to vector<2x1xf32>
    %278 = arith.divf %274, %277 : vector<2x1xf32>
    %279 = arith.mulf %276, %276 : vector<2x1xf32>
    %280 = arith.subf %278, %279 : vector<2x1xf32>
    %cst_156 = arith.constant 0.000000e+00 : f32
    %281 = vector.broadcast %cst_156 : f32 to vector<2x1xf32>
    %282 = arith.maximumf %280, %281 : vector<2x1xf32>
    %cst_157 = arith.constant 9.99999974E-6 : f32
    %283 = vector.broadcast %cst_157 : f32 to vector<2x1xf32>
    %284 = arith.addf %282, %283 : vector<2x1xf32>
    %285 = math.rsqrt %284 : vector<2x1xf32>
    %286 = arith.mulf %8, %285 : vector<2x1xf32>
    %287 = arith.mulf %276, %286 : vector<2x1xf32>
    %288 = arith.subf %9, %287 : vector<2x1xf32>
    %289 = vector.broadcast %286 : vector<2x1xf32> to vector<2x15xf32>
    %290 = arith.mulf %254, %289 : vector<2x15xf32>
    %291 = vector.broadcast %288 : vector<2x1xf32> to vector<2x15xf32>
    %292 = arith.addf %290, %291 : vector<2x15xf32>
    %cst_158 = arith.constant 0.000000e+00 : f32
    %293 = vector.broadcast %cst_158 : f32 to vector<2x15xf32>
    %294 = arith.cmpf ogt, %292, %293 : vector<2x15xf32>
    %cst_159 = arith.constant 0.000000e+00 : f32
    %295 = vector.broadcast %cst_159 : f32 to vector<2x15xf32>
    %296 = arith.minimumf %292, %295 : vector<2x15xf32>
    %297 = math.exp %296 : vector<2x15xf32>
    %cst_160 = arith.constant 1.000000e+00 : f32
    %298 = vector.broadcast %cst_160 : f32 to vector<2x15xf32>
    %299 = arith.subf %297, %298 : vector<2x15xf32>
    %300 = arith.select %294, %292, %299 : vector<2x15xi1>, vector<2x15xf32>
    %301 = vector.broadcast %286 : vector<2x1xf32> to vector<2x15xf32>
    %302 = arith.mulf %262, %301 : vector<2x15xf32>
    %303 = vector.broadcast %288 : vector<2x1xf32> to vector<2x15xf32>
    %304 = arith.addf %302, %303 : vector<2x15xf32>
    %cst_161 = arith.constant 0.000000e+00 : f32
    %305 = vector.broadcast %cst_161 : f32 to vector<2x15xf32>
    %306 = arith.cmpf ogt, %304, %305 : vector<2x15xf32>
    %cst_162 = arith.constant 0.000000e+00 : f32
    %307 = vector.broadcast %cst_162 : f32 to vector<2x15xf32>
    %308 = arith.minimumf %304, %307 : vector<2x15xf32>
    %309 = math.exp %308 : vector<2x15xf32>
    %cst_163 = arith.constant 1.000000e+00 : f32
    %310 = vector.broadcast %cst_163 : f32 to vector<2x15xf32>
    %311 = arith.subf %309, %310 : vector<2x15xf32>
    %312 = arith.select %306, %304, %311 : vector<2x15xi1>, vector<2x15xf32>
    %c0_164 = arith.constant 0 : index
    %c0_165 = arith.constant 0 : index
    %c0_166 = arith.constant 0 : index
    %313 = vector.load %arg15[%c0_164, %c0_165, %c0_166] : memref<1x4x2xf32, #tpu.memory_space<vmem>>, vector<1x4x2xf32>
    %314 = vector.shape_cast %313 : vector<1x4x2xf32> to vector<4x2xf32>
    %cst_167 = arith.constant dense<0.000000e+00> : vector<4x15xf32>
    %315 = tpu.matmul %314, %300, %cst_167 {dimension_numbers = #tpu.dot_dimension_numbers<[1], [0], [0], [1], [0, 0, 1, 1], [], []>} : vector<4x2xf32>, vector<2x15xf32>, vector<4x15xf32> -> vector<4x15xf32>
    %316 = vector.broadcast %10 : vector<4x1xf32> to vector<4x15xf32>
    %317 = arith.addf %315, %316 : vector<4x15xf32>
    %cst_168 = arith.constant dense<0.000000e+00> : vector<4x15xf32>
    %318 = tpu.matmul %314, %312, %cst_168 {dimension_numbers = #tpu.dot_dimension_numbers<[1], [0], [0], [1], [0, 0, 1, 1], [], []>} : vector<4x2xf32>, vector<2x15xf32>, vector<4x15xf32> -> vector<4x15xf32>
    %319 = vector.broadcast %10 : vector<4x1xf32> to vector<4x15xf32>
    %320 = arith.addf %318, %319 : vector<4x15xf32>
    %c0_169 = arith.constant 0 : index
    %c0_170 = arith.constant 0 : index
    %c0_171 = arith.constant 0 : index
    %321 = vector.load %arg17[%c0_169, %c0_170, %c0_171] : memref<4x4x2xf32, #tpu.memory_space<vmem>>, vector<1x4x2xf32>
    %322 = vector.shape_cast %321 : vector<1x4x2xf32> to vector<4x2xf32>
    %c1_172 = arith.constant 1 : index
    %c0_173 = arith.constant 0 : index
    %c0_174 = arith.constant 0 : index
    %323 = vector.load %arg17[%c1_172, %c0_173, %c0_174] : memref<4x4x2xf32, #tpu.memory_space<vmem>>, vector<1x4x2xf32>
    %324 = vector.shape_cast %323 : vector<1x4x2xf32> to vector<4x2xf32>
    %c2_175 = arith.constant 2 : index
    %c0_176 = arith.constant 0 : index
    %c0_177 = arith.constant 0 : index
    %325 = vector.load %arg17[%c2_175, %c0_176, %c0_177] : memref<4x4x2xf32, #tpu.memory_space<vmem>>, vector<1x4x2xf32>
    %326 = vector.shape_cast %325 : vector<1x4x2xf32> to vector<4x2xf32>
    %c3_178 = arith.constant 3 : index
    %c0_179 = arith.constant 0 : index
    %c0_180 = arith.constant 0 : index
    %327 = vector.load %arg17[%c3_178, %c0_179, %c0_180] : memref<4x4x2xf32, #tpu.memory_space<vmem>>, vector<1x4x2xf32>
    %328 = vector.shape_cast %327 : vector<1x4x2xf32> to vector<4x2xf32>
    %329 = tpu.iota {dimensions = array<i32: 0>} : vector<15x21xi32>
    %330 = tpu.iota {dimensions = array<i32: 1>} : vector<15x21xi32>
    %c3_i32_181 = arith.constant 3 : i32
    %331 = vector.broadcast %c3_i32_181 : i32 to vector<15x21xi32>
    %332 = arith.addi %329, %331 : vector<15x21xi32>
    %333 = arith.cmpi eq, %330, %332 : vector<15x21xi32>
    %334 = arith.extui %333 : vector<15x21xi1> to vector<15x21xi32>
    %335 = arith.sitofp %334 : vector<15x21xi32> to vector<15x21xf32>
    %cst_182 = arith.constant dense<0.000000e+00> : vector<2x21xf32>
    %336 = tpu.matmul %300, %335, %cst_182 {dimension_numbers = #tpu.dot_dimension_numbers<[1], [0], [0], [1], [0, 0, 1, 1], [], []>} : vector<2x15xf32>, vector<15x21xf32>, vector<2x21xf32> -> vector<2x21xf32>
    %337 = vector.extract_strided_slice %336 {offsets = [0, 0], sizes = [2, 18], strides = [1, 1]} : vector<2x21xf32> to vector<2x18xf32>
    %cst_183 = arith.constant dense<0.000000e+00> : vector<4x18xf32>
    %338 = tpu.matmul %322, %337, %cst_183 {dimension_numbers = #tpu.dot_dimension_numbers<[1], [0], [0], [1], [0, 0, 1, 1], [], []>} : vector<4x2xf32>, vector<2x18xf32>, vector<4x18xf32> -> vector<4x18xf32>
    %339 = vector.extract_strided_slice %336 {offsets = [0, 1], sizes = [2, 18], strides = [1, 1]} : vector<2x21xf32> to vector<2x18xf32>
    %cst_184 = arith.constant dense<0.000000e+00> : vector<4x18xf32>
    %340 = tpu.matmul %324, %339, %cst_184 {dimension_numbers = #tpu.dot_dimension_numbers<[1], [0], [0], [1], [0, 0, 1, 1], [], []>} : vector<4x2xf32>, vector<2x18xf32>, vector<4x18xf32> -> vector<4x18xf32>
    %341 = arith.addf %338, %340 : vector<4x18xf32>
    %342 = vector.extract_strided_slice %336 {offsets = [0, 2], sizes = [2, 18], strides = [1, 1]} : vector<2x21xf32> to vector<2x18xf32>
    %cst_185 = arith.constant dense<0.000000e+00> : vector<4x18xf32>
    %343 = tpu.matmul %326, %342, %cst_185 {dimension_numbers = #tpu.dot_dimension_numbers<[1], [0], [0], [1], [0, 0, 1, 1], [], []>} : vector<4x2xf32>, vector<2x18xf32>, vector<4x18xf32> -> vector<4x18xf32>
    %344 = arith.addf %341, %343 : vector<4x18xf32>
    %345 = vector.extract_strided_slice %336 {offsets = [0, 3], sizes = [2, 18], strides = [1, 1]} : vector<2x21xf32> to vector<2x18xf32>
    %cst_186 = arith.constant dense<0.000000e+00> : vector<4x18xf32>
    %346 = tpu.matmul %328, %345, %cst_186 {dimension_numbers = #tpu.dot_dimension_numbers<[1], [0], [0], [1], [0, 0, 1, 1], [], []>} : vector<4x2xf32>, vector<2x18xf32>, vector<4x18xf32> -> vector<4x18xf32>
    %347 = arith.addf %344, %346 : vector<4x18xf32>
    %348 = vector.broadcast %11 : vector<4x1xf32> to vector<4x18xf32>
    %349 = arith.addf %347, %348 : vector<4x18xf32>
    %cst_187 = arith.constant dense<0.000000e+00> : vector<2x21xf32>
    %350 = tpu.matmul %312, %335, %cst_187 {dimension_numbers = #tpu.dot_dimension_numbers<[1], [0], [0], [1], [0, 0, 1, 1], [], []>} : vector<2x15xf32>, vector<15x21xf32>, vector<2x21xf32> -> vector<2x21xf32>
    %351 = vector.extract_strided_slice %350 {offsets = [0, 0], sizes = [2, 18], strides = [1, 1]} : vector<2x21xf32> to vector<2x18xf32>
    %cst_188 = arith.constant dense<0.000000e+00> : vector<4x18xf32>
    %352 = tpu.matmul %322, %351, %cst_188 {dimension_numbers = #tpu.dot_dimension_numbers<[1], [0], [0], [1], [0, 0, 1, 1], [], []>} : vector<4x2xf32>, vector<2x18xf32>, vector<4x18xf32> -> vector<4x18xf32>
    %353 = vector.extract_strided_slice %350 {offsets = [0, 1], sizes = [2, 18], strides = [1, 1]} : vector<2x21xf32> to vector<2x18xf32>
    %cst_189 = arith.constant dense<0.000000e+00> : vector<4x18xf32>
    %354 = tpu.matmul %324, %353, %cst_189 {dimension_numbers = #tpu.dot_dimension_numbers<[1], [0], [0], [1], [0, 0, 1, 1], [], []>} : vector<4x2xf32>, vector<2x18xf32>, vector<4x18xf32> -> vector<4x18xf32>
    %355 = arith.addf %352, %354 : vector<4x18xf32>
    %356 = vector.extract_strided_slice %350 {offsets = [0, 2], sizes = [2, 18], strides = [1, 1]} : vector<2x21xf32> to vector<2x18xf32>
    %cst_190 = arith.constant dense<0.000000e+00> : vector<4x18xf32>
    %357 = tpu.matmul %326, %356, %cst_190 {dimension_numbers = #tpu.dot_dimension_numbers<[1], [0], [0], [1], [0, 0, 1, 1], [], []>} : vector<4x2xf32>, vector<2x18xf32>, vector<4x18xf32> -> vector<4x18xf32>
    %358 = arith.addf %355, %357 : vector<4x18xf32>
    %359 = vector.extract_strided_slice %350 {offsets = [0, 3], sizes = [2, 18], strides = [1, 1]} : vector<2x21xf32> to vector<2x18xf32>
    %cst_191 = arith.constant dense<0.000000e+00> : vector<4x18xf32>
    %360 = tpu.matmul %328, %359, %cst_191 {dimension_numbers = #tpu.dot_dimension_numbers<[1], [0], [0], [1], [0, 0, 1, 1], [], []>} : vector<4x2xf32>, vector<2x18xf32>, vector<4x18xf32> -> vector<4x18xf32>
    %361 = arith.addf %358, %360 : vector<4x18xf32>
    %362 = vector.broadcast %11 : vector<4x1xf32> to vector<4x18xf32>
    %363 = arith.addf %361, %362 : vector<4x18xf32>
    %cst_192 = arith.constant dense<0.000000e+00> : vector<4xf32>
    %364 = vector.multi_reduction <add>, %349, %cst_192 [1] : vector<4x18xf32> to vector<4xf32>
    %365 = vector.shape_cast %364 : vector<4xf32> to vector<4x1xf32>
    %366 = arith.mulf %349, %349 : vector<4x18xf32>
    %cst_193 = arith.constant dense<0.000000e+00> : vector<4xf32>
    %367 = vector.multi_reduction <add>, %366, %cst_193 [1] : vector<4x18xf32> to vector<4xf32>
    %368 = vector.shape_cast %367 : vector<4xf32> to vector<4x1xf32>
    %cst_194 = arith.constant dense<0.000000e+00> : vector<4xf32>
    %369 = vector.multi_reduction <add>, %363, %cst_194 [1] : vector<4x18xf32> to vector<4xf32>
    %370 = vector.shape_cast %369 : vector<4xf32> to vector<4x1xf32>
    %371 = arith.addf %365, %370 : vector<4x1xf32>
    %372 = arith.mulf %363, %363 : vector<4x18xf32>
    %cst_195 = arith.constant dense<0.000000e+00> : vector<4xf32>
    %373 = vector.multi_reduction <add>, %372, %cst_195 [1] : vector<4x18xf32> to vector<4xf32>
    %374 = vector.shape_cast %373 : vector<4xf32> to vector<4x1xf32>
    %375 = arith.addf %368, %374 : vector<4x1xf32>
    %cst_196 = arith.constant 3.600000e+01 : f32
    %376 = vector.broadcast %cst_196 : f32 to vector<4x1xf32>
    %377 = arith.divf %371, %376 : vector<4x1xf32>
    %cst_197 = arith.constant 3.600000e+01 : f32
    %378 = vector.broadcast %cst_197 : f32 to vector<4x1xf32>
    %379 = arith.divf %375, %378 : vector<4x1xf32>
    %380 = arith.mulf %377, %377 : vector<4x1xf32>
    %381 = arith.subf %379, %380 : vector<4x1xf32>
    %cst_198 = arith.constant 0.000000e+00 : f32
    %382 = vector.broadcast %cst_198 : f32 to vector<4x1xf32>
    %383 = arith.maximumf %381, %382 : vector<4x1xf32>
    %cst_199 = arith.constant 9.99999974E-6 : f32
    %384 = vector.broadcast %cst_199 : f32 to vector<4x1xf32>
    %385 = arith.addf %383, %384 : vector<4x1xf32>
    %386 = math.rsqrt %385 : vector<4x1xf32>
    %387 = arith.mulf %12, %386 : vector<4x1xf32>
    %388 = arith.mulf %377, %387 : vector<4x1xf32>
    %389 = arith.subf %13, %388 : vector<4x1xf32>
    %390 = vector.broadcast %387 : vector<4x1xf32> to vector<4x18xf32>
    %391 = arith.mulf %349, %390 : vector<4x18xf32>
    %392 = vector.broadcast %389 : vector<4x1xf32> to vector<4x18xf32>
    %393 = arith.addf %391, %392 : vector<4x18xf32>
    %cst_200 = arith.constant 0.000000e+00 : f32
    %394 = vector.broadcast %cst_200 : f32 to vector<4x18xf32>
    %395 = arith.cmpf ogt, %393, %394 : vector<4x18xf32>
    %cst_201 = arith.constant 0.000000e+00 : f32
    %396 = vector.broadcast %cst_201 : f32 to vector<4x18xf32>
    %397 = arith.minimumf %393, %396 : vector<4x18xf32>
    %398 = math.exp %397 : vector<4x18xf32>
    %cst_202 = arith.constant 1.000000e+00 : f32
    %399 = vector.broadcast %cst_202 : f32 to vector<4x18xf32>
    %400 = arith.subf %398, %399 : vector<4x18xf32>
    %401 = arith.select %395, %393, %400 : vector<4x18xi1>, vector<4x18xf32>
    %402 = vector.broadcast %387 : vector<4x1xf32> to vector<4x18xf32>
    %403 = arith.mulf %363, %402 : vector<4x18xf32>
    %404 = vector.broadcast %389 : vector<4x1xf32> to vector<4x18xf32>
    %405 = arith.addf %403, %404 : vector<4x18xf32>
    %cst_203 = arith.constant 0.000000e+00 : f32
    %406 = vector.broadcast %cst_203 : f32 to vector<4x18xf32>
    %407 = arith.cmpf ogt, %405, %406 : vector<4x18xf32>
    %cst_204 = arith.constant 0.000000e+00 : f32
    %408 = vector.broadcast %cst_204 : f32 to vector<4x18xf32>
    %409 = arith.minimumf %405, %408 : vector<4x18xf32>
    %410 = math.exp %409 : vector<4x18xf32>
    %cst_205 = arith.constant 1.000000e+00 : f32
    %411 = vector.broadcast %cst_205 : f32 to vector<4x18xf32>
    %412 = arith.subf %410, %411 : vector<4x18xf32>
    %413 = arith.select %407, %405, %412 : vector<4x18xi1>, vector<4x18xf32>
    %c0_206 = arith.constant 0 : index
    %c0_207 = arith.constant 0 : index
    %c0_208 = arith.constant 0 : index
    %414 = vector.load %arg21[%c0_206, %c0_207, %c0_208] : memref<4x4x4xf32, #tpu.memory_space<vmem>>, vector<1x4x4xf32>
    %415 = vector.shape_cast %414 : vector<1x4x4xf32> to vector<4x4xf32>
    %c1_209 = arith.constant 1 : index
    %c0_210 = arith.constant 0 : index
    %c0_211 = arith.constant 0 : index
    %416 = vector.load %arg21[%c1_209, %c0_210, %c0_211] : memref<4x4x4xf32, #tpu.memory_space<vmem>>, vector<1x4x4xf32>
    %417 = vector.shape_cast %416 : vector<1x4x4xf32> to vector<4x4xf32>
    %c2_212 = arith.constant 2 : index
    %c0_213 = arith.constant 0 : index
    %c0_214 = arith.constant 0 : index
    %418 = vector.load %arg21[%c2_212, %c0_213, %c0_214] : memref<4x4x4xf32, #tpu.memory_space<vmem>>, vector<1x4x4xf32>
    %419 = vector.shape_cast %418 : vector<1x4x4xf32> to vector<4x4xf32>
    %c3_215 = arith.constant 3 : index
    %c0_216 = arith.constant 0 : index
    %c0_217 = arith.constant 0 : index
    %420 = vector.load %arg21[%c3_215, %c0_216, %c0_217] : memref<4x4x4xf32, #tpu.memory_space<vmem>>, vector<1x4x4xf32>
    %421 = vector.shape_cast %420 : vector<1x4x4xf32> to vector<4x4xf32>
    %422 = vector.extract_strided_slice %401 {offsets = [0, 0], sizes = [4, 15], strides = [1, 1]} : vector<4x18xf32> to vector<4x15xf32>
    %cst_218 = arith.constant dense<0.000000e+00> : vector<4x15xf32>
    %423 = tpu.matmul %415, %422, %cst_218 {dimension_numbers = #tpu.dot_dimension_numbers<[1], [0], [0], [1], [0, 0, 1, 1], [], []>} : vector<4x4xf32>, vector<4x15xf32>, vector<4x15xf32> -> vector<4x15xf32>
    %424 = vector.extract_strided_slice %401 {offsets = [0, 1], sizes = [4, 15], strides = [1, 1]} : vector<4x18xf32> to vector<4x15xf32>
    %cst_219 = arith.constant dense<0.000000e+00> : vector<4x15xf32>
    %425 = tpu.matmul %417, %424, %cst_219 {dimension_numbers = #tpu.dot_dimension_numbers<[1], [0], [0], [1], [0, 0, 1, 1], [], []>} : vector<4x4xf32>, vector<4x15xf32>, vector<4x15xf32> -> vector<4x15xf32>
    %426 = arith.addf %423, %425 : vector<4x15xf32>
    %427 = vector.extract_strided_slice %401 {offsets = [0, 2], sizes = [4, 15], strides = [1, 1]} : vector<4x18xf32> to vector<4x15xf32>
    %cst_220 = arith.constant dense<0.000000e+00> : vector<4x15xf32>
    %428 = tpu.matmul %419, %427, %cst_220 {dimension_numbers = #tpu.dot_dimension_numbers<[1], [0], [0], [1], [0, 0, 1, 1], [], []>} : vector<4x4xf32>, vector<4x15xf32>, vector<4x15xf32> -> vector<4x15xf32>
    %429 = arith.addf %426, %428 : vector<4x15xf32>
    %430 = vector.extract_strided_slice %401 {offsets = [0, 3], sizes = [4, 15], strides = [1, 1]} : vector<4x18xf32> to vector<4x15xf32>
    %cst_221 = arith.constant dense<0.000000e+00> : vector<4x15xf32>
    %431 = tpu.matmul %421, %430, %cst_221 {dimension_numbers = #tpu.dot_dimension_numbers<[1], [0], [0], [1], [0, 0, 1, 1], [], []>} : vector<4x4xf32>, vector<4x15xf32>, vector<4x15xf32> -> vector<4x15xf32>
    %432 = arith.addf %429, %431 : vector<4x15xf32>
    %433 = vector.broadcast %14 : vector<4x1xf32> to vector<4x15xf32>
    %434 = arith.addf %432, %433 : vector<4x15xf32>
    %435 = vector.extract_strided_slice %413 {offsets = [0, 0], sizes = [4, 15], strides = [1, 1]} : vector<4x18xf32> to vector<4x15xf32>
    %cst_222 = arith.constant dense<0.000000e+00> : vector<4x15xf32>
    %436 = tpu.matmul %415, %435, %cst_222 {dimension_numbers = #tpu.dot_dimension_numbers<[1], [0], [0], [1], [0, 0, 1, 1], [], []>} : vector<4x4xf32>, vector<4x15xf32>, vector<4x15xf32> -> vector<4x15xf32>
    %437 = vector.extract_strided_slice %413 {offsets = [0, 1], sizes = [4, 15], strides = [1, 1]} : vector<4x18xf32> to vector<4x15xf32>
    %cst_223 = arith.constant dense<0.000000e+00> : vector<4x15xf32>
    %438 = tpu.matmul %417, %437, %cst_223 {dimension_numbers = #tpu.dot_dimension_numbers<[1], [0], [0], [1], [0, 0, 1, 1], [], []>} : vector<4x4xf32>, vector<4x15xf32>, vector<4x15xf32> -> vector<4x15xf32>
    %439 = arith.addf %436, %438 : vector<4x15xf32>
    %440 = vector.extract_strided_slice %413 {offsets = [0, 2], sizes = [4, 15], strides = [1, 1]} : vector<4x18xf32> to vector<4x15xf32>
    %cst_224 = arith.constant dense<0.000000e+00> : vector<4x15xf32>
    %441 = tpu.matmul %419, %440, %cst_224 {dimension_numbers = #tpu.dot_dimension_numbers<[1], [0], [0], [1], [0, 0, 1, 1], [], []>} : vector<4x4xf32>, vector<4x15xf32>, vector<4x15xf32> -> vector<4x15xf32>
    %442 = arith.addf %439, %441 : vector<4x15xf32>
    %443 = vector.extract_strided_slice %413 {offsets = [0, 3], sizes = [4, 15], strides = [1, 1]} : vector<4x18xf32> to vector<4x15xf32>
    %cst_225 = arith.constant dense<0.000000e+00> : vector<4x15xf32>
    %444 = tpu.matmul %421, %443, %cst_225 {dimension_numbers = #tpu.dot_dimension_numbers<[1], [0], [0], [1], [0, 0, 1, 1], [], []>} : vector<4x4xf32>, vector<4x15xf32>, vector<4x15xf32> -> vector<4x15xf32>
    %445 = arith.addf %442, %444 : vector<4x15xf32>
    %446 = vector.broadcast %14 : vector<4x1xf32> to vector<4x15xf32>
    %447 = arith.addf %445, %446 : vector<4x15xf32>
    %448 = arith.addf %434, %317 : vector<4x15xf32>
    %449 = arith.addf %447, %320 : vector<4x15xf32>
    %450 = tpu.iota {dimensions = array<i32: 0>} : vector<9x3xi32>
    %451 = tpu.iota {dimensions = array<i32: 1>} : vector<9x3xi32>
    %c4_i32_226 = arith.constant 4 : i32
    %452 = vector.broadcast %c4_i32_226 : i32 to vector<9x3xi32>
    %453 = arith.muli %452, %451 : vector<9x3xi32>
    %454 = arith.cmpi eq, %450, %453 : vector<9x3xi32>
    %455 = arith.extui %454 : vector<9x3xi1> to vector<9x3xi32>
    %456 = arith.sitofp %455 : vector<9x3xi32> to vector<9x3xf32>
    %457 = vector.extract_strided_slice %448 {offsets = [0, 0], sizes = [4, 9], strides = [1, 1]} : vector<4x15xf32> to vector<4x9xf32>
    %458 = vector.extract_strided_slice %448 {offsets = [0, 1], sizes = [4, 9], strides = [1, 1]} : vector<4x15xf32> to vector<4x9xf32>
    %459 = arith.maximumf %457, %458 : vector<4x9xf32>
    %460 = vector.extract_strided_slice %448 {offsets = [0, 2], sizes = [4, 9], strides = [1, 1]} : vector<4x15xf32> to vector<4x9xf32>
    %461 = vector.extract_strided_slice %448 {offsets = [0, 3], sizes = [4, 9], strides = [1, 1]} : vector<4x15xf32> to vector<4x9xf32>
    %462 = arith.maximumf %460, %461 : vector<4x9xf32>
    %463 = arith.maximumf %459, %462 : vector<4x9xf32>
    %cst_227 = arith.constant dense<0.000000e+00> : vector<4x3xf32>
    %464 = tpu.matmul %463, %456, %cst_227 {dimension_numbers = #tpu.dot_dimension_numbers<[1], [0], [0], [1], [0, 0, 1, 1], [], []>} : vector<4x9xf32>, vector<9x3xf32>, vector<4x3xf32> -> vector<4x3xf32>
    %465 = vector.extract_strided_slice %449 {offsets = [0, 0], sizes = [4, 9], strides = [1, 1]} : vector<4x15xf32> to vector<4x9xf32>
    %466 = vector.extract_strided_slice %449 {offsets = [0, 1], sizes = [4, 9], strides = [1, 1]} : vector<4x15xf32> to vector<4x9xf32>
    %467 = arith.maximumf %465, %466 : vector<4x9xf32>
    %468 = vector.extract_strided_slice %449 {offsets = [0, 2], sizes = [4, 9], strides = [1, 1]} : vector<4x15xf32> to vector<4x9xf32>
    %469 = vector.extract_strided_slice %449 {offsets = [0, 3], sizes = [4, 9], strides = [1, 1]} : vector<4x15xf32> to vector<4x9xf32>
    %470 = arith.maximumf %468, %469 : vector<4x9xf32>
    %471 = arith.maximumf %467, %470 : vector<4x9xf32>
    %cst_228 = arith.constant dense<0.000000e+00> : vector<4x3xf32>
    %472 = tpu.matmul %471, %456, %cst_228 {dimension_numbers = #tpu.dot_dimension_numbers<[1], [0], [0], [1], [0, 0, 1, 1], [], []>} : vector<4x9xf32>, vector<9x3xf32>, vector<4x3xf32> -> vector<4x3xf32>
    %cst_229 = arith.constant dense<0.000000e+00> : vector<4xf32>
    %473 = vector.multi_reduction <add>, %464, %cst_229 [1] : vector<4x3xf32> to vector<4xf32>
    %474 = vector.shape_cast %473 : vector<4xf32> to vector<4x1xf32>
    %475 = arith.mulf %464, %464 : vector<4x3xf32>
    %cst_230 = arith.constant dense<0.000000e+00> : vector<4xf32>
    %476 = vector.multi_reduction <add>, %475, %cst_230 [1] : vector<4x3xf32> to vector<4xf32>
    %477 = vector.shape_cast %476 : vector<4xf32> to vector<4x1xf32>
    %cst_231 = arith.constant dense<0.000000e+00> : vector<4xf32>
    %478 = vector.multi_reduction <add>, %472, %cst_231 [1] : vector<4x3xf32> to vector<4xf32>
    %479 = vector.shape_cast %478 : vector<4xf32> to vector<4x1xf32>
    %480 = arith.addf %474, %479 : vector<4x1xf32>
    %481 = arith.mulf %472, %472 : vector<4x3xf32>
    %cst_232 = arith.constant dense<0.000000e+00> : vector<4xf32>
    %482 = vector.multi_reduction <add>, %481, %cst_232 [1] : vector<4x3xf32> to vector<4xf32>
    %483 = vector.shape_cast %482 : vector<4xf32> to vector<4x1xf32>
    %484 = arith.addf %477, %483 : vector<4x1xf32>
    %cst_233 = arith.constant 6.000000e+00 : f32
    %485 = vector.broadcast %cst_233 : f32 to vector<4x1xf32>
    %486 = arith.divf %480, %485 : vector<4x1xf32>
    %cst_234 = arith.constant 6.000000e+00 : f32
    %487 = vector.broadcast %cst_234 : f32 to vector<4x1xf32>
    %488 = arith.divf %484, %487 : vector<4x1xf32>
    %489 = arith.mulf %486, %486 : vector<4x1xf32>
    %490 = arith.subf %488, %489 : vector<4x1xf32>
    %cst_235 = arith.constant 0.000000e+00 : f32
    %491 = vector.broadcast %cst_235 : f32 to vector<4x1xf32>
    %492 = arith.maximumf %490, %491 : vector<4x1xf32>
    %cst_236 = arith.constant 9.99999974E-6 : f32
    %493 = vector.broadcast %cst_236 : f32 to vector<4x1xf32>
    %494 = arith.addf %492, %493 : vector<4x1xf32>
    %495 = math.rsqrt %494 : vector<4x1xf32>
    %496 = arith.mulf %15, %495 : vector<4x1xf32>
    %497 = arith.mulf %486, %496 : vector<4x1xf32>
    %498 = arith.subf %16, %497 : vector<4x1xf32>
    %499 = vector.broadcast %496 : vector<4x1xf32> to vector<4x3xf32>
    %500 = arith.mulf %464, %499 : vector<4x3xf32>
    %501 = vector.broadcast %498 : vector<4x1xf32> to vector<4x3xf32>
    %502 = arith.addf %500, %501 : vector<4x3xf32>
    %cst_237 = arith.constant 0.000000e+00 : f32
    %503 = vector.broadcast %cst_237 : f32 to vector<4x3xf32>
    %504 = arith.cmpf ogt, %502, %503 : vector<4x3xf32>
    %cst_238 = arith.constant 0.000000e+00 : f32
    %505 = vector.broadcast %cst_238 : f32 to vector<4x3xf32>
    %506 = arith.minimumf %502, %505 : vector<4x3xf32>
    %507 = math.exp %506 : vector<4x3xf32>
    %cst_239 = arith.constant 1.000000e+00 : f32
    %508 = vector.broadcast %cst_239 : f32 to vector<4x3xf32>
    %509 = arith.subf %507, %508 : vector<4x3xf32>
    %510 = arith.select %504, %502, %509 : vector<4x3xi1>, vector<4x3xf32>
    %511 = vector.broadcast %496 : vector<4x1xf32> to vector<4x3xf32>
    %512 = arith.mulf %472, %511 : vector<4x3xf32>
    %513 = vector.broadcast %498 : vector<4x1xf32> to vector<4x3xf32>
    %514 = arith.addf %512, %513 : vector<4x3xf32>
    %cst_240 = arith.constant 0.000000e+00 : f32
    %515 = vector.broadcast %cst_240 : f32 to vector<4x3xf32>
    %516 = arith.cmpf ogt, %514, %515 : vector<4x3xf32>
    %cst_241 = arith.constant 0.000000e+00 : f32
    %517 = vector.broadcast %cst_241 : f32 to vector<4x3xf32>
    %518 = arith.minimumf %514, %517 : vector<4x3xf32>
    %519 = math.exp %518 : vector<4x3xf32>
    %cst_242 = arith.constant 1.000000e+00 : f32
    %520 = vector.broadcast %cst_242 : f32 to vector<4x3xf32>
    %521 = arith.subf %519, %520 : vector<4x3xf32>
    %522 = arith.select %516, %514, %521 : vector<4x3xi1>, vector<4x3xf32>
    %c0_243 = arith.constant 0 : index
    %c0_244 = arith.constant 0 : index
    %c0_245 = arith.constant 0 : index
    %523 = vector.load %arg25[%c0_243, %c0_244, %c0_245] : memref<1x8x4xf32, #tpu.memory_space<vmem>>, vector<1x8x4xf32>
    %524 = vector.shape_cast %523 : vector<1x8x4xf32> to vector<8x4xf32>
    %cst_246 = arith.constant dense<0.000000e+00> : vector<8x3xf32>
    %525 = tpu.matmul %524, %510, %cst_246 {dimension_numbers = #tpu.dot_dimension_numbers<[1], [0], [0], [1], [0, 0, 1, 1], [], []>} : vector<8x4xf32>, vector<4x3xf32>, vector<8x3xf32> -> vector<8x3xf32>
    %526 = vector.broadcast %17 : vector<8x1xf32> to vector<8x3xf32>
    %527 = arith.addf %525, %526 : vector<8x3xf32>
    %cst_247 = arith.constant dense<0.000000e+00> : vector<8x3xf32>
    %528 = tpu.matmul %524, %522, %cst_247 {dimension_numbers = #tpu.dot_dimension_numbers<[1], [0], [0], [1], [0, 0, 1, 1], [], []>} : vector<8x4xf32>, vector<4x3xf32>, vector<8x3xf32> -> vector<8x3xf32>
    %529 = vector.broadcast %17 : vector<8x1xf32> to vector<8x3xf32>
    %530 = arith.addf %528, %529 : vector<8x3xf32>
    %c0_248 = arith.constant 0 : index
    %c0_249 = arith.constant 0 : index
    %c0_250 = arith.constant 0 : index
    %531 = vector.load %arg27[%c0_248, %c0_249, %c0_250] : memref<2x8x4xf32, #tpu.memory_space<vmem>>, vector<1x8x4xf32>
    %532 = vector.shape_cast %531 : vector<1x8x4xf32> to vector<8x4xf32>
    %c1_251 = arith.constant 1 : index
    %c0_252 = arith.constant 0 : index
    %c0_253 = arith.constant 0 : index
    %533 = vector.load %arg27[%c1_251, %c0_252, %c0_253] : memref<2x8x4xf32, #tpu.memory_space<vmem>>, vector<1x8x4xf32>
    %534 = vector.shape_cast %533 : vector<1x8x4xf32> to vector<8x4xf32>
    %535 = tpu.iota {dimensions = array<i32: 0>} : vector<3x5xi32>
    %536 = tpu.iota {dimensions = array<i32: 1>} : vector<3x5xi32>
    %c1_i32 = arith.constant 1 : i32
    %537 = vector.broadcast %c1_i32 : i32 to vector<3x5xi32>
    %538 = arith.addi %535, %537 : vector<3x5xi32>
    %539 = arith.cmpi eq, %536, %538 : vector<3x5xi32>
    %540 = arith.extui %539 : vector<3x5xi1> to vector<3x5xi32>
    %541 = arith.sitofp %540 : vector<3x5xi32> to vector<3x5xf32>
    %cst_254 = arith.constant dense<0.000000e+00> : vector<4x5xf32>
    %542 = tpu.matmul %510, %541, %cst_254 {dimension_numbers = #tpu.dot_dimension_numbers<[1], [0], [0], [1], [0, 0, 1, 1], [], []>} : vector<4x3xf32>, vector<3x5xf32>, vector<4x5xf32> -> vector<4x5xf32>
    %543 = vector.extract_strided_slice %542 {offsets = [0, 0], sizes = [4, 4], strides = [1, 1]} : vector<4x5xf32> to vector<4x4xf32>
    %cst_255 = arith.constant dense<0.000000e+00> : vector<8x4xf32>
    %544 = tpu.matmul %532, %543, %cst_255 {dimension_numbers = #tpu.dot_dimension_numbers<[1], [0], [0], [1], [0, 0, 1, 1], [], []>} : vector<8x4xf32>, vector<4x4xf32>, vector<8x4xf32> -> vector<8x4xf32>
    %545 = vector.extract_strided_slice %542 {offsets = [0, 1], sizes = [4, 4], strides = [1, 1]} : vector<4x5xf32> to vector<4x4xf32>
    %cst_256 = arith.constant dense<0.000000e+00> : vector<8x4xf32>
    %546 = tpu.matmul %534, %545, %cst_256 {dimension_numbers = #tpu.dot_dimension_numbers<[1], [0], [0], [1], [0, 0, 1, 1], [], []>} : vector<8x4xf32>, vector<4x4xf32>, vector<8x4xf32> -> vector<8x4xf32>
    %547 = arith.addf %544, %546 : vector<8x4xf32>
    %548 = vector.broadcast %18 : vector<8x1xf32> to vector<8x4xf32>
    %549 = arith.addf %547, %548 : vector<8x4xf32>
    %cst_257 = arith.constant dense<0.000000e+00> : vector<4x5xf32>
    %550 = tpu.matmul %522, %541, %cst_257 {dimension_numbers = #tpu.dot_dimension_numbers<[1], [0], [0], [1], [0, 0, 1, 1], [], []>} : vector<4x3xf32>, vector<3x5xf32>, vector<4x5xf32> -> vector<4x5xf32>
    %551 = vector.extract_strided_slice %550 {offsets = [0, 0], sizes = [4, 4], strides = [1, 1]} : vector<4x5xf32> to vector<4x4xf32>
    %cst_258 = arith.constant dense<0.000000e+00> : vector<8x4xf32>
    %552 = tpu.matmul %532, %551, %cst_258 {dimension_numbers = #tpu.dot_dimension_numbers<[1], [0], [0], [1], [0, 0, 1, 1], [], []>} : vector<8x4xf32>, vector<4x4xf32>, vector<8x4xf32> -> vector<8x4xf32>
    %553 = vector.extract_strided_slice %550 {offsets = [0, 1], sizes = [4, 4], strides = [1, 1]} : vector<4x5xf32> to vector<4x4xf32>
    %cst_259 = arith.constant dense<0.000000e+00> : vector<8x4xf32>
    %554 = tpu.matmul %534, %553, %cst_259 {dimension_numbers = #tpu.dot_dimension_numbers<[1], [0], [0], [1], [0, 0, 1, 1], [], []>} : vector<8x4xf32>, vector<4x4xf32>, vector<8x4xf32> -> vector<8x4xf32>
    %555 = arith.addf %552, %554 : vector<8x4xf32>
    %556 = vector.broadcast %18 : vector<8x1xf32> to vector<8x4xf32>
    %557 = arith.addf %555, %556 : vector<8x4xf32>
    %cst_260 = arith.constant dense<0.000000e+00> : vector<8xf32>
    %558 = vector.multi_reduction <add>, %549, %cst_260 [1] : vector<8x4xf32> to vector<8xf32>
    %559 = vector.shape_cast %558 : vector<8xf32> to vector<8x1xf32>
    %560 = arith.mulf %549, %549 : vector<8x4xf32>
    %cst_261 = arith.constant dense<0.000000e+00> : vector<8xf32>
    %561 = vector.multi_reduction <add>, %560, %cst_261 [1] : vector<8x4xf32> to vector<8xf32>
    %562 = vector.shape_cast %561 : vector<8xf32> to vector<8x1xf32>
    %cst_262 = arith.constant dense<0.000000e+00> : vector<8xf32>
    %563 = vector.multi_reduction <add>, %557, %cst_262 [1] : vector<8x4xf32> to vector<8xf32>
    %564 = vector.shape_cast %563 : vector<8xf32> to vector<8x1xf32>
    %565 = arith.addf %559, %564 : vector<8x1xf32>
    %566 = arith.mulf %557, %557 : vector<8x4xf32>
    %cst_263 = arith.constant dense<0.000000e+00> : vector<8xf32>
    %567 = vector.multi_reduction <add>, %566, %cst_263 [1] : vector<8x4xf32> to vector<8xf32>
    %568 = vector.shape_cast %567 : vector<8xf32> to vector<8x1xf32>
    %569 = arith.addf %562, %568 : vector<8x1xf32>
    %cst_264 = arith.constant 8.000000e+00 : f32
    %570 = vector.broadcast %cst_264 : f32 to vector<8x1xf32>
    %571 = arith.divf %565, %570 : vector<8x1xf32>
    %cst_265 = arith.constant 8.000000e+00 : f32
    %572 = vector.broadcast %cst_265 : f32 to vector<8x1xf32>
    %573 = arith.divf %569, %572 : vector<8x1xf32>
    %574 = arith.mulf %571, %571 : vector<8x1xf32>
    %575 = arith.subf %573, %574 : vector<8x1xf32>
    %cst_266 = arith.constant 0.000000e+00 : f32
    %576 = vector.broadcast %cst_266 : f32 to vector<8x1xf32>
    %577 = arith.maximumf %575, %576 : vector<8x1xf32>
    %cst_267 = arith.constant 9.99999974E-6 : f32
    %578 = vector.broadcast %cst_267 : f32 to vector<8x1xf32>
    %579 = arith.addf %577, %578 : vector<8x1xf32>
    %580 = math.rsqrt %579 : vector<8x1xf32>
    %581 = arith.mulf %19, %580 : vector<8x1xf32>
    %582 = arith.mulf %571, %581 : vector<8x1xf32>
    %583 = arith.subf %20, %582 : vector<8x1xf32>
    %584 = vector.broadcast %581 : vector<8x1xf32> to vector<8x4xf32>
    %585 = arith.mulf %549, %584 : vector<8x4xf32>
    %586 = vector.broadcast %583 : vector<8x1xf32> to vector<8x4xf32>
    %587 = arith.addf %585, %586 : vector<8x4xf32>
    %cst_268 = arith.constant 0.000000e+00 : f32
    %588 = vector.broadcast %cst_268 : f32 to vector<8x4xf32>
    %589 = arith.cmpf ogt, %587, %588 : vector<8x4xf32>
    %cst_269 = arith.constant 0.000000e+00 : f32
    %590 = vector.broadcast %cst_269 : f32 to vector<8x4xf32>
    %591 = arith.minimumf %587, %590 : vector<8x4xf32>
    %592 = math.exp %591 : vector<8x4xf32>
    %cst_270 = arith.constant 1.000000e+00 : f32
    %593 = vector.broadcast %cst_270 : f32 to vector<8x4xf32>
    %594 = arith.subf %592, %593 : vector<8x4xf32>
    %595 = arith.select %589, %587, %594 : vector<8x4xi1>, vector<8x4xf32>
    %596 = vector.broadcast %581 : vector<8x1xf32> to vector<8x4xf32>
    %597 = arith.mulf %557, %596 : vector<8x4xf32>
    %598 = vector.broadcast %583 : vector<8x1xf32> to vector<8x4xf32>
    %599 = arith.addf %597, %598 : vector<8x4xf32>
    %cst_271 = arith.constant 0.000000e+00 : f32
    %600 = vector.broadcast %cst_271 : f32 to vector<8x4xf32>
    %601 = arith.cmpf ogt, %599, %600 : vector<8x4xf32>
    %cst_272 = arith.constant 0.000000e+00 : f32
    %602 = vector.broadcast %cst_272 : f32 to vector<8x4xf32>
    %603 = arith.minimumf %599, %602 : vector<8x4xf32>
    %604 = math.exp %603 : vector<8x4xf32>
    %cst_273 = arith.constant 1.000000e+00 : f32
    %605 = vector.broadcast %cst_273 : f32 to vector<8x4xf32>
    %606 = arith.subf %604, %605 : vector<8x4xf32>
    %607 = arith.select %601, %599, %606 : vector<8x4xi1>, vector<8x4xf32>
    %c0_274 = arith.constant 0 : index
    %c0_275 = arith.constant 0 : index
    %c0_276 = arith.constant 0 : index
    %608 = vector.load %arg31[%c0_274, %c0_275, %c0_276] : memref<2x8x8xf32, #tpu.memory_space<vmem>>, vector<1x8x8xf32>
    %609 = vector.shape_cast %608 : vector<1x8x8xf32> to vector<8x8xf32>
    %c1_277 = arith.constant 1 : index
    %c0_278 = arith.constant 0 : index
    %c0_279 = arith.constant 0 : index
    %610 = vector.load %arg31[%c1_277, %c0_278, %c0_279] : memref<2x8x8xf32, #tpu.memory_space<vmem>>, vector<1x8x8xf32>
    %611 = vector.shape_cast %610 : vector<1x8x8xf32> to vector<8x8xf32>
    %612 = vector.extract_strided_slice %595 {offsets = [0, 0], sizes = [8, 3], strides = [1, 1]} : vector<8x4xf32> to vector<8x3xf32>
    %cst_280 = arith.constant dense<0.000000e+00> : vector<8x3xf32>
    %613 = tpu.matmul %609, %612, %cst_280 {dimension_numbers = #tpu.dot_dimension_numbers<[1], [0], [0], [1], [0, 0, 1, 1], [], []>} : vector<8x8xf32>, vector<8x3xf32>, vector<8x3xf32> -> vector<8x3xf32>
    %614 = vector.extract_strided_slice %595 {offsets = [0, 1], sizes = [8, 3], strides = [1, 1]} : vector<8x4xf32> to vector<8x3xf32>
    %cst_281 = arith.constant dense<0.000000e+00> : vector<8x3xf32>
    %615 = tpu.matmul %611, %614, %cst_281 {dimension_numbers = #tpu.dot_dimension_numbers<[1], [0], [0], [1], [0, 0, 1, 1], [], []>} : vector<8x8xf32>, vector<8x3xf32>, vector<8x3xf32> -> vector<8x3xf32>
    %616 = arith.addf %613, %615 : vector<8x3xf32>
    %617 = vector.broadcast %21 : vector<8x1xf32> to vector<8x3xf32>
    %618 = arith.addf %616, %617 : vector<8x3xf32>
    %619 = vector.extract_strided_slice %607 {offsets = [0, 0], sizes = [8, 3], strides = [1, 1]} : vector<8x4xf32> to vector<8x3xf32>
    %cst_282 = arith.constant dense<0.000000e+00> : vector<8x3xf32>
    %620 = tpu.matmul %609, %619, %cst_282 {dimension_numbers = #tpu.dot_dimension_numbers<[1], [0], [0], [1], [0, 0, 1, 1], [], []>} : vector<8x8xf32>, vector<8x3xf32>, vector<8x3xf32> -> vector<8x3xf32>
    %621 = vector.extract_strided_slice %607 {offsets = [0, 1], sizes = [8, 3], strides = [1, 1]} : vector<8x4xf32> to vector<8x3xf32>
    %cst_283 = arith.constant dense<0.000000e+00> : vector<8x3xf32>
    %622 = tpu.matmul %611, %621, %cst_283 {dimension_numbers = #tpu.dot_dimension_numbers<[1], [0], [0], [1], [0, 0, 1, 1], [], []>} : vector<8x8xf32>, vector<8x3xf32>, vector<8x3xf32> -> vector<8x3xf32>
    %623 = arith.addf %620, %622 : vector<8x3xf32>
    %624 = vector.broadcast %21 : vector<8x1xf32> to vector<8x3xf32>
    %625 = arith.addf %623, %624 : vector<8x3xf32>
    %626 = arith.addf %618, %527 : vector<8x3xf32>
    %627 = arith.addf %625, %530 : vector<8x3xf32>
    %cst_284 = arith.constant 0.000000e+00 : f32
    %628 = vector.broadcast %cst_284 : f32 to vector<8x3xf32>
    %629 = arith.cmpf ogt, %626, %628 : vector<8x3xf32>
    %cst_285 = arith.constant 0.000000e+00 : f32
    %630 = vector.broadcast %cst_285 : f32 to vector<8x3xf32>
    %631 = arith.minimumf %626, %630 : vector<8x3xf32>
    %632 = math.exp %631 : vector<8x3xf32>
    %cst_286 = arith.constant 1.000000e+00 : f32
    %633 = vector.broadcast %cst_286 : f32 to vector<8x3xf32>
    %634 = arith.subf %632, %633 : vector<8x3xf32>
    %635 = arith.select %629, %626, %634 : vector<8x3xi1>, vector<8x3xf32>
    %cst_287 = arith.constant 0.000000e+00 : f32
    %636 = vector.broadcast %cst_287 : f32 to vector<8x3xf32>
    %637 = arith.cmpf ogt, %627, %636 : vector<8x3xf32>
    %cst_288 = arith.constant 0.000000e+00 : f32
    %638 = vector.broadcast %cst_288 : f32 to vector<8x3xf32>
    %639 = arith.minimumf %627, %638 : vector<8x3xf32>
    %640 = math.exp %639 : vector<8x3xf32>
    %cst_289 = arith.constant 1.000000e+00 : f32
    %641 = vector.broadcast %cst_289 : f32 to vector<8x3xf32>
    %642 = arith.subf %640, %641 : vector<8x3xf32>
    %643 = arith.select %637, %627, %642 : vector<8x3xi1>, vector<8x3xf32>
    %644 = vector.extract_strided_slice %635 {offsets = [0, 0], sizes = [1, 3], strides = [1, 1]} : vector<8x3xf32> to vector<1x3xf32>
    %c0_290 = arith.constant 0 : index
    %c0_291 = arith.constant 0 : index
    %c0_292 = arith.constant 0 : index
    %645 = vector.load %arg33[%c0_290, %c0_291, %c0_292] : memref<8x3x100xf32, #tpu.memory_space<vmem>>, vector<1x3x100xf32>
    %646 = vector.shape_cast %645 : vector<1x3x100xf32> to vector<3x100xf32>
    %cst_293 = arith.constant dense<0.000000e+00> : vector<1x100xf32>
    %647 = tpu.matmul %644, %646, %cst_293 {dimension_numbers = #tpu.dot_dimension_numbers<[1], [0], [0], [1], [0, 0, 1, 1], [], []>} : vector<1x3xf32>, vector<3x100xf32>, vector<1x100xf32> -> vector<1x100xf32>
    %648 = arith.addf %22, %647 : vector<1x100xf32>
    %649 = vector.extract_strided_slice %635 {offsets = [1, 0], sizes = [1, 3], strides = [1, 1]} : vector<8x3xf32> to vector<1x3xf32>
    %c1_294 = arith.constant 1 : index
    %c0_295 = arith.constant 0 : index
    %c0_296 = arith.constant 0 : index
    %650 = vector.load %arg33[%c1_294, %c0_295, %c0_296] : memref<8x3x100xf32, #tpu.memory_space<vmem>>, vector<1x3x100xf32>
    %651 = vector.shape_cast %650 : vector<1x3x100xf32> to vector<3x100xf32>
    %cst_297 = arith.constant dense<0.000000e+00> : vector<1x100xf32>
    %652 = tpu.matmul %649, %651, %cst_297 {dimension_numbers = #tpu.dot_dimension_numbers<[1], [0], [0], [1], [0, 0, 1, 1], [], []>} : vector<1x3xf32>, vector<3x100xf32>, vector<1x100xf32> -> vector<1x100xf32>
    %653 = arith.addf %648, %652 : vector<1x100xf32>
    %654 = vector.extract_strided_slice %635 {offsets = [2, 0], sizes = [1, 3], strides = [1, 1]} : vector<8x3xf32> to vector<1x3xf32>
    %c2_298 = arith.constant 2 : index
    %c0_299 = arith.constant 0 : index
    %c0_300 = arith.constant 0 : index
    %655 = vector.load %arg33[%c2_298, %c0_299, %c0_300] : memref<8x3x100xf32, #tpu.memory_space<vmem>>, vector<1x3x100xf32>
    %656 = vector.shape_cast %655 : vector<1x3x100xf32> to vector<3x100xf32>
    %cst_301 = arith.constant dense<0.000000e+00> : vector<1x100xf32>
    %657 = tpu.matmul %654, %656, %cst_301 {dimension_numbers = #tpu.dot_dimension_numbers<[1], [0], [0], [1], [0, 0, 1, 1], [], []>} : vector<1x3xf32>, vector<3x100xf32>, vector<1x100xf32> -> vector<1x100xf32>
    %658 = arith.addf %653, %657 : vector<1x100xf32>
    %659 = vector.extract_strided_slice %635 {offsets = [3, 0], sizes = [1, 3], strides = [1, 1]} : vector<8x3xf32> to vector<1x3xf32>
    %c3_302 = arith.constant 3 : index
    %c0_303 = arith.constant 0 : index
    %c0_304 = arith.constant 0 : index
    %660 = vector.load %arg33[%c3_302, %c0_303, %c0_304] : memref<8x3x100xf32, #tpu.memory_space<vmem>>, vector<1x3x100xf32>
    %661 = vector.shape_cast %660 : vector<1x3x100xf32> to vector<3x100xf32>
    %cst_305 = arith.constant dense<0.000000e+00> : vector<1x100xf32>
    %662 = tpu.matmul %659, %661, %cst_305 {dimension_numbers = #tpu.dot_dimension_numbers<[1], [0], [0], [1], [0, 0, 1, 1], [], []>} : vector<1x3xf32>, vector<3x100xf32>, vector<1x100xf32> -> vector<1x100xf32>
    %663 = arith.addf %658, %662 : vector<1x100xf32>
    %664 = vector.extract_strided_slice %635 {offsets = [4, 0], sizes = [1, 3], strides = [1, 1]} : vector<8x3xf32> to vector<1x3xf32>
    %c4 = arith.constant 4 : index
    %c0_306 = arith.constant 0 : index
    %c0_307 = arith.constant 0 : index
    %665 = vector.load %arg33[%c4, %c0_306, %c0_307] : memref<8x3x100xf32, #tpu.memory_space<vmem>>, vector<1x3x100xf32>
    %666 = vector.shape_cast %665 : vector<1x3x100xf32> to vector<3x100xf32>
    %cst_308 = arith.constant dense<0.000000e+00> : vector<1x100xf32>
    %667 = tpu.matmul %664, %666, %cst_308 {dimension_numbers = #tpu.dot_dimension_numbers<[1], [0], [0], [1], [0, 0, 1, 1], [], []>} : vector<1x3xf32>, vector<3x100xf32>, vector<1x100xf32> -> vector<1x100xf32>
    %668 = arith.addf %663, %667 : vector<1x100xf32>
    %669 = vector.extract_strided_slice %635 {offsets = [5, 0], sizes = [1, 3], strides = [1, 1]} : vector<8x3xf32> to vector<1x3xf32>
    %c5 = arith.constant 5 : index
    %c0_309 = arith.constant 0 : index
    %c0_310 = arith.constant 0 : index
    %670 = vector.load %arg33[%c5, %c0_309, %c0_310] : memref<8x3x100xf32, #tpu.memory_space<vmem>>, vector<1x3x100xf32>
    %671 = vector.shape_cast %670 : vector<1x3x100xf32> to vector<3x100xf32>
    %cst_311 = arith.constant dense<0.000000e+00> : vector<1x100xf32>
    %672 = tpu.matmul %669, %671, %cst_311 {dimension_numbers = #tpu.dot_dimension_numbers<[1], [0], [0], [1], [0, 0, 1, 1], [], []>} : vector<1x3xf32>, vector<3x100xf32>, vector<1x100xf32> -> vector<1x100xf32>
    %673 = arith.addf %668, %672 : vector<1x100xf32>
    %674 = vector.extract_strided_slice %635 {offsets = [6, 0], sizes = [1, 3], strides = [1, 1]} : vector<8x3xf32> to vector<1x3xf32>
    %c6 = arith.constant 6 : index
    %c0_312 = arith.constant 0 : index
    %c0_313 = arith.constant 0 : index
    %675 = vector.load %arg33[%c6, %c0_312, %c0_313] : memref<8x3x100xf32, #tpu.memory_space<vmem>>, vector<1x3x100xf32>
    %676 = vector.shape_cast %675 : vector<1x3x100xf32> to vector<3x100xf32>
    %cst_314 = arith.constant dense<0.000000e+00> : vector<1x100xf32>
    %677 = tpu.matmul %674, %676, %cst_314 {dimension_numbers = #tpu.dot_dimension_numbers<[1], [0], [0], [1], [0, 0, 1, 1], [], []>} : vector<1x3xf32>, vector<3x100xf32>, vector<1x100xf32> -> vector<1x100xf32>
    %678 = arith.addf %673, %677 : vector<1x100xf32>
    %679 = vector.extract_strided_slice %635 {offsets = [7, 0], sizes = [1, 3], strides = [1, 1]} : vector<8x3xf32> to vector<1x3xf32>
    %c7 = arith.constant 7 : index
    %c0_315 = arith.constant 0 : index
    %c0_316 = arith.constant 0 : index
    %680 = vector.load %arg33[%c7, %c0_315, %c0_316] : memref<8x3x100xf32, #tpu.memory_space<vmem>>, vector<1x3x100xf32>
    %681 = vector.shape_cast %680 : vector<1x3x100xf32> to vector<3x100xf32>
    %cst_317 = arith.constant dense<0.000000e+00> : vector<1x100xf32>
    %682 = tpu.matmul %679, %681, %cst_317 {dimension_numbers = #tpu.dot_dimension_numbers<[1], [0], [0], [1], [0, 0, 1, 1], [], []>} : vector<1x3xf32>, vector<3x100xf32>, vector<1x100xf32> -> vector<1x100xf32>
    %683 = arith.addf %678, %682 : vector<1x100xf32>
    %cst_318 = arith.constant dense<0.000000e+00> : vector<1x50xf32>
    %684 = tpu.matmul %683, %23, %cst_318 {dimension_numbers = #tpu.dot_dimension_numbers<[1], [0], [0], [1], [0, 0, 1, 1], [], []>} : vector<1x100xf32>, vector<100x50xf32>, vector<1x50xf32> -> vector<1x50xf32>
    %685 = arith.addf %684, %24 : vector<1x50xf32>
    %cst_319 = arith.constant 0.000000e+00 : f32
    %686 = vector.broadcast %cst_319 : f32 to vector<1x50xf32>
    %687 = arith.maximumf %685, %686 : vector<1x50xf32>
    %cst_320 = arith.constant dense<0.000000e+00> : vector<1x50xf32>
    %688 = tpu.matmul %687, %25, %cst_320 {dimension_numbers = #tpu.dot_dimension_numbers<[1], [0], [0], [1], [0, 0, 1, 1], [], []>} : vector<1x50xf32>, vector<50x50xf32>, vector<1x50xf32> -> vector<1x50xf32>
    %689 = arith.addf %688, %26 : vector<1x50xf32>
    %cst_321 = arith.constant 0.000000e+00 : f32
    %690 = vector.broadcast %cst_321 : f32 to vector<1x50xf32>
    %691 = arith.maximumf %689, %690 : vector<1x50xf32>
    %cst_322 = arith.constant dense<0.000000e+00> : vector<1x50xf32>
    %692 = tpu.matmul %691, %27, %cst_322 {dimension_numbers = #tpu.dot_dimension_numbers<[1], [0], [0], [1], [0, 0, 1, 1], [], []>} : vector<1x50xf32>, vector<50x50xf32>, vector<1x50xf32> -> vector<1x50xf32>
    %693 = arith.addf %692, %28 : vector<1x50xf32>
    %cst_323 = arith.constant 0.000000e+00 : f32
    %694 = vector.broadcast %cst_323 : f32 to vector<1x50xf32>
    %695 = arith.maximumf %693, %694 : vector<1x50xf32>
    %cst_324 = arith.constant dense<0.000000e+00> : vector<1x20xf32>
    %696 = tpu.matmul %695, %29, %cst_324 {dimension_numbers = #tpu.dot_dimension_numbers<[1], [0], [0], [1], [0, 0, 1, 1], [], []>} : vector<1x50xf32>, vector<50x20xf32>, vector<1x20xf32> -> vector<1x20xf32>
    %697 = arith.addf %696, %30 : vector<1x20xf32>
    %c0_325 = arith.constant 0 : index
    %c0_326 = arith.constant 0 : index
    %698 = vector.load %arg43[%c0_325, %c0_326] : memref<2x20xf32, #tpu.memory_space<vmem>>, vector<1x20xf32>
    tpu.vector_store %arg43[%c0_325, %c0_326], %697 {strides = array<i32>} : memref<2x20xf32, #tpu.memory_space<vmem>>, vector<1x20xf32>,
    %699 = vector.extract_strided_slice %643 {offsets = [0, 0], sizes = [1, 3], strides = [1, 1]} : vector<8x3xf32> to vector<1x3xf32>
    %c0_327 = arith.constant 0 : index
    %c0_328 = arith.constant 0 : index
    %c0_329 = arith.constant 0 : index
    %700 = vector.load %arg33[%c0_327, %c0_328, %c0_329] : memref<8x3x100xf32, #tpu.memory_space<vmem>>, vector<1x3x100xf32>
    %701 = vector.shape_cast %700 : vector<1x3x100xf32> to vector<3x100xf32>
    %cst_330 = arith.constant dense<0.000000e+00> : vector<1x100xf32>
    %702 = tpu.matmul %699, %701, %cst_330 {dimension_numbers = #tpu.dot_dimension_numbers<[1], [0], [0], [1], [0, 0, 1, 1], [], []>} : vector<1x3xf32>, vector<3x100xf32>, vector<1x100xf32> -> vector<1x100xf32>
    %703 = arith.addf %22, %702 : vector<1x100xf32>
    %704 = vector.extract_strided_slice %643 {offsets = [1, 0], sizes = [1, 3], strides = [1, 1]} : vector<8x3xf32> to vector<1x3xf32>
    %c1_331 = arith.constant 1 : index
    %c0_332 = arith.constant 0 : index
    %c0_333 = arith.constant 0 : index
    %705 = vector.load %arg33[%c1_331, %c0_332, %c0_333] : memref<8x3x100xf32, #tpu.memory_space<vmem>>, vector<1x3x100xf32>
    %706 = vector.shape_cast %705 : vector<1x3x100xf32> to vector<3x100xf32>
    %cst_334 = arith.constant dense<0.000000e+00> : vector<1x100xf32>
    %707 = tpu.matmul %704, %706, %cst_334 {dimension_numbers = #tpu.dot_dimension_numbers<[1], [0], [0], [1], [0, 0, 1, 1], [], []>} : vector<1x3xf32>, vector<3x100xf32>, vector<1x100xf32> -> vector<1x100xf32>
    %708 = arith.addf %703, %707 : vector<1x100xf32>
    %709 = vector.extract_strided_slice %643 {offsets = [2, 0], sizes = [1, 3], strides = [1, 1]} : vector<8x3xf32> to vector<1x3xf32>
    %c2_335 = arith.constant 2 : index
    %c0_336 = arith.constant 0 : index
    %c0_337 = arith.constant 0 : index
    %710 = vector.load %arg33[%c2_335, %c0_336, %c0_337] : memref<8x3x100xf32, #tpu.memory_space<vmem>>, vector<1x3x100xf32>
    %711 = vector.shape_cast %710 : vector<1x3x100xf32> to vector<3x100xf32>
    %cst_338 = arith.constant dense<0.000000e+00> : vector<1x100xf32>
    %712 = tpu.matmul %709, %711, %cst_338 {dimension_numbers = #tpu.dot_dimension_numbers<[1], [0], [0], [1], [0, 0, 1, 1], [], []>} : vector<1x3xf32>, vector<3x100xf32>, vector<1x100xf32> -> vector<1x100xf32>
    %713 = arith.addf %708, %712 : vector<1x100xf32>
    %714 = vector.extract_strided_slice %643 {offsets = [3, 0], sizes = [1, 3], strides = [1, 1]} : vector<8x3xf32> to vector<1x3xf32>
    %c3_339 = arith.constant 3 : index
    %c0_340 = arith.constant 0 : index
    %c0_341 = arith.constant 0 : index
    %715 = vector.load %arg33[%c3_339, %c0_340, %c0_341] : memref<8x3x100xf32, #tpu.memory_space<vmem>>, vector<1x3x100xf32>
    %716 = vector.shape_cast %715 : vector<1x3x100xf32> to vector<3x100xf32>
    %cst_342 = arith.constant dense<0.000000e+00> : vector<1x100xf32>
    %717 = tpu.matmul %714, %716, %cst_342 {dimension_numbers = #tpu.dot_dimension_numbers<[1], [0], [0], [1], [0, 0, 1, 1], [], []>} : vector<1x3xf32>, vector<3x100xf32>, vector<1x100xf32> -> vector<1x100xf32>
    %718 = arith.addf %713, %717 : vector<1x100xf32>
    %719 = vector.extract_strided_slice %643 {offsets = [4, 0], sizes = [1, 3], strides = [1, 1]} : vector<8x3xf32> to vector<1x3xf32>
    %c4_343 = arith.constant 4 : index
    %c0_344 = arith.constant 0 : index
    %c0_345 = arith.constant 0 : index
    %720 = vector.load %arg33[%c4_343, %c0_344, %c0_345] : memref<8x3x100xf32, #tpu.memory_space<vmem>>, vector<1x3x100xf32>
    %721 = vector.shape_cast %720 : vector<1x3x100xf32> to vector<3x100xf32>
    %cst_346 = arith.constant dense<0.000000e+00> : vector<1x100xf32>
    %722 = tpu.matmul %719, %721, %cst_346 {dimension_numbers = #tpu.dot_dimension_numbers<[1], [0], [0], [1], [0, 0, 1, 1], [], []>} : vector<1x3xf32>, vector<3x100xf32>, vector<1x100xf32> -> vector<1x100xf32>
    %723 = arith.addf %718, %722 : vector<1x100xf32>
    %724 = vector.extract_strided_slice %643 {offsets = [5, 0], sizes = [1, 3], strides = [1, 1]} : vector<8x3xf32> to vector<1x3xf32>
    %c5_347 = arith.constant 5 : index
    %c0_348 = arith.constant 0 : index
    %c0_349 = arith.constant 0 : index
    %725 = vector.load %arg33[%c5_347, %c0_348, %c0_349] : memref<8x3x100xf32, #tpu.memory_space<vmem>>, vector<1x3x100xf32>
    %726 = vector.shape_cast %725 : vector<1x3x100xf32> to vector<3x100xf32>
    %cst_350 = arith.constant dense<0.000000e+00> : vector<1x100xf32>
    %727 = tpu.matmul %724, %726, %cst_350 {dimension_numbers = #tpu.dot_dimension_numbers<[1], [0], [0], [1], [0, 0, 1, 1], [], []>} : vector<1x3xf32>, vector<3x100xf32>, vector<1x100xf32> -> vector<1x100xf32>
    %728 = arith.addf %723, %727 : vector<1x100xf32>
    %729 = vector.extract_strided_slice %643 {offsets = [6, 0], sizes = [1, 3], strides = [1, 1]} : vector<8x3xf32> to vector<1x3xf32>
    %c6_351 = arith.constant 6 : index
    %c0_352 = arith.constant 0 : index
    %c0_353 = arith.constant 0 : index
    %730 = vector.load %arg33[%c6_351, %c0_352, %c0_353] : memref<8x3x100xf32, #tpu.memory_space<vmem>>, vector<1x3x100xf32>
    %731 = vector.shape_cast %730 : vector<1x3x100xf32> to vector<3x100xf32>
    %cst_354 = arith.constant dense<0.000000e+00> : vector<1x100xf32>
    %732 = tpu.matmul %729, %731, %cst_354 {dimension_numbers = #tpu.dot_dimension_numbers<[1], [0], [0], [1], [0, 0, 1, 1], [], []>} : vector<1x3xf32>, vector<3x100xf32>, vector<1x100xf32> -> vector<1x100xf32>
    %733 = arith.addf %728, %732 : vector<1x100xf32>
    %734 = vector.extract_strided_slice %643 {offsets = [7, 0], sizes = [1, 3], strides = [1, 1]} : vector<8x3xf32> to vector<1x3xf32>
    %c7_355 = arith.constant 7 : index
    %c0_356 = arith.constant 0 : index
    %c0_357 = arith.constant 0 : index
    %735 = vector.load %arg33[%c7_355, %c0_356, %c0_357] : memref<8x3x100xf32, #tpu.memory_space<vmem>>, vector<1x3x100xf32>
    %736 = vector.shape_cast %735 : vector<1x3x100xf32> to vector<3x100xf32>
    %cst_358 = arith.constant dense<0.000000e+00> : vector<1x100xf32>
    %737 = tpu.matmul %734, %736, %cst_358 {dimension_numbers = #tpu.dot_dimension_numbers<[1], [0], [0], [1], [0, 0, 1, 1], [], []>} : vector<1x3xf32>, vector<3x100xf32>, vector<1x100xf32> -> vector<1x100xf32>
    %738 = arith.addf %733, %737 : vector<1x100xf32>
    %cst_359 = arith.constant dense<0.000000e+00> : vector<1x50xf32>
    %739 = tpu.matmul %738, %23, %cst_359 {dimension_numbers = #tpu.dot_dimension_numbers<[1], [0], [0], [1], [0, 0, 1, 1], [], []>} : vector<1x100xf32>, vector<100x50xf32>, vector<1x50xf32> -> vector<1x50xf32>
    %740 = arith.addf %739, %24 : vector<1x50xf32>
    %cst_360 = arith.constant 0.000000e+00 : f32
    %741 = vector.broadcast %cst_360 : f32 to vector<1x50xf32>
    %742 = arith.maximumf %740, %741 : vector<1x50xf32>
    %cst_361 = arith.constant dense<0.000000e+00> : vector<1x50xf32>
    %743 = tpu.matmul %742, %25, %cst_361 {dimension_numbers = #tpu.dot_dimension_numbers<[1], [0], [0], [1], [0, 0, 1, 1], [], []>} : vector<1x50xf32>, vector<50x50xf32>, vector<1x50xf32> -> vector<1x50xf32>
    %744 = arith.addf %743, %26 : vector<1x50xf32>
    %cst_362 = arith.constant 0.000000e+00 : f32
    %745 = vector.broadcast %cst_362 : f32 to vector<1x50xf32>
    %746 = arith.maximumf %744, %745 : vector<1x50xf32>
    %cst_363 = arith.constant dense<0.000000e+00> : vector<1x50xf32>
    %747 = tpu.matmul %746, %27, %cst_363 {dimension_numbers = #tpu.dot_dimension_numbers<[1], [0], [0], [1], [0, 0, 1, 1], [], []>} : vector<1x50xf32>, vector<50x50xf32>, vector<1x50xf32> -> vector<1x50xf32>
    %748 = arith.addf %747, %28 : vector<1x50xf32>
    %cst_364 = arith.constant 0.000000e+00 : f32
    %749 = vector.broadcast %cst_364 : f32 to vector<1x50xf32>
    %750 = arith.maximumf %748, %749 : vector<1x50xf32>
    %cst_365 = arith.constant dense<0.000000e+00> : vector<1x20xf32>
    %751 = tpu.matmul %750, %29, %cst_365 {dimension_numbers = #tpu.dot_dimension_numbers<[1], [0], [0], [1], [0, 0, 1, 1], [], []>} : vector<1x50xf32>, vector<50x20xf32>, vector<1x20xf32> -> vector<1x20xf32>
    %752 = arith.addf %751, %30 : vector<1x20xf32>
    %c1_366 = arith.constant 1 : index
    %c0_367 = arith.constant 0 : index
    %753 = vector.load %arg43[%c1_366, %c0_367] : memref<2x20xf32, #tpu.memory_space<vmem>>, vector<1x20xf32>
    tpu.vector_store %arg43[%c1_366, %c0_367], %752 {strides = array<i32>} : memref<2x20xf32, #tpu.memory_space<vmem>>, vector<1x20xf32>,
    return
  }
}

</mosaic_0001>

<bundles_post_ra>
// kernel: sacl_net_forward.1
= control target key start
LH: loop header
LB: loop body
LE: loop exit
PB: predicated region body
PF: predicated region fallthrough
CT: control target
= control target key end

     0   :  { %s9799_s6 = smov 1   ;;  %s9800_s10 = smov 2   ;;  %s11116_s0 = inlined_call_operand.smem [shape: u32[44], index: -1, kind: input, shape index: {}] }
   0x1   :  { %s9903_s5 = sld [smem:[%s11116_s0]]   ;;  %s9801_s14 = smov 3  }
   0x2   :  { %s9908_s9 = sld [smem:[%s11116_s0 + %s9799_s6]]   ;;  %s9802_s18 = smov 4  }
   0x3   :  { %s9913_s13 = sld [smem:[%s11116_s0 + %s9800_s10]]   ;;  %s9803_s22 = smov 5  }
   0x4   :  { %s9918_s17 = sld [smem:[%s11116_s0 + %s9801_s14]]   ;;  %s9804_s26 = smov 6  }
   0x5   :  { %s9923_s21 = sld [smem:[%s11116_s0 + %s9802_s18]]   ;;  %s9805_s30 = smov 7  }
   0x6   :  { %s9928_s25 = sld [smem:[%s11116_s0 + %s9803_s22]]   ;;  %s9806_s4 = smov 8  }
   0x7   :  { %11118 = sst [smem:[#allocation84_spill]] %s9903_s5  ;;  %s9807_s10 = smov 9  }
   0x8   :  { %s9933_s29 = sld [smem:[%s11116_s0 + %s9804_s26]]   ;;  %s9808_s15 = smov 10  }
   0x9   :  { %11119 = sst [smem:[#allocation85_spill]] %s9913_s13  ;;  %s9809_s20 = smov 11  }
   0xa   :  { %s9938_s3 = sld [smem:[%s11116_s0 + %s9805_s30]]   ;;  %s9810_s26 = smov 12  }
   0xb   :  { %11120 = sst [smem:[#allocation86_spill]] %s9923_s21  ;;  %s9811_s1 = smov 13  }
   0xc   :  { %s9943_s8 = sld [smem:[%s11116_s0 + %s9806_s4]]   ;;  %s9812_s7 = smov 14  }
   0xd   :  { %s9948_s14 = sld [smem:[%s11116_s0 + %s9807_s10]]   ;;  %s9814_s22 = smov 16  }
   0xe   :  { %11121 = sst [smem:[#allocation87_spill]] %s9933_s29  ;;  %s9815_s28 = smov 17  }
   0xf   :  { %s9953_s19 = sld [smem:[%s11116_s0 + %s9808_s15]]   ;;  %s9813_s15 = smov 15  }
  0x10   :  { %s9958_s24 = sld [smem:[%s11116_s0 + %s9809_s20]]  }
  0x11   :  { %s9963_s30 = sld [smem:[%s11116_s0 + %s9810_s26]]  }
  0x12   :  { %11122 = sst [smem:[#allocation88_spill]] %s9943_s8 }
  0x13   :  { %s9968_s6 = sld [smem:[%s11116_s0 + %s9811_s1]]  }
  0x14   :  { %s9973_s12 = sld [smem:[%s11116_s0 + %s9812_s7]]   ;;  %s9816_s7 = smov 18  }
  0x15   :  { %11123 = sst [smem:[#allocation89_spill]] %s9953_s19 }
  0x16   :  { %s9978_s20 = sld [smem:[%s11116_s0 + %s9813_s15]]   ;;  %s9817_s15 = smov 19  }
  0x17   :  { %11124 = sst [smem:[#allocation90_spill]] %s9963_s30 }
  0x18   :  { %s9983_s27 = sld [smem:[%s11116_s0 + %s9814_s22]]   ;;  %s9818_s22 = smov 20  }
  0x19   :  { %s9988_s4 = sld [smem:[%s11116_s0 + %s9815_s28]]   ;;  %s9819_s28 = smov 21  }
  0x1a   :  { %11125 = sst [smem:[#allocation91_spill]] %s9973_s12 }
  0x1b   :  { %s9993_s12 = sld [smem:[%s11116_s0 + %s9816_s7]]   ;;  %s9820_s7 = smov 22  }
  0x1c   :  { %s9998_s30 = sld [smem:[%s11116_s0 + %s9817_s15]]   ;;  %s9821_s15 = smov 23  }
  0x1d   :  { %s10008_s19 = sld [smem:[%s11116_s0 + %s9819_s28]]   ;;  %s9823_s28 = smov 25  }
  0x1e   :  { %11126 = sst [smem:[#allocation92_spill]] %s9983_s27 }
  0x1f   :  { %s10003_s27 = sld [smem:[%s11116_s0 + %s9818_s22]]   ;;  %s9822_s22 = smov 24  }
  0x20   :  { %s10018_s8 = sld [smem:[%s11116_s0 + %s9821_s15]]   ;;  %s9825_s15 = smov 27  }
  0x21   :  { %11127 = sst [smem:[#allocation93_spill]] %s9993_s12 }
  0x22   :  { %s10013_s12 = sld [smem:[%s11116_s0 + %s9820_s7]]   ;;  %s9824_s7 = smov 26  }
  0x23   :  { %s10028_s29 = sld [smem:[%s11116_s0 + %s9823_s28]]   ;;  %s9827_s28 = smov 29  }
  0x24   :  { %s10038_s21 = sld [smem:[%s11116_s0 + %s9825_s15]]   ;;  %s9829_s15 = smov 31  }
  0x25   :  { %11128 = sst [smem:[#allocation94_spill]] %s10003_s27 }
  0x26   :  { %s10023_s27 = sld [smem:[%s11116_s0 + %s9822_s22]]   ;;  %s9826_s22 = smov 28  }
  0x28   :  { %11129 = sst [smem:[#allocation95_spill]] %s10013_s12 }
  0x29   :  { %11131 = sst [smem:[#allocation97_spill]] %s10028_s29 }
  0x2a   :  { %s10033_s12 = sld [smem:[%s11116_s0 + %s9824_s7]]   ;;  %s9828_s7 = smov 30  }
  0x2b   :  { %11132 = sst [smem:[#allocation98_spill]] %s10038_s21 }
  0x2c   :  { %11130 = sst [smem:[#allocation96_spill]] %s10023_s27 }
  0x2d   :  { %s10043_s27 = sld [smem:[%s11116_s0 + %s9826_s22]]   ;;  %s9830_s22 = smov 32  }
  0x2e   :  { %s10048_s29 = sld [smem:[%s11116_s0 + %s9827_s28]]   ;;  %s9831_s28 = smov 33  }
  0x2f   :  { %s10053_s13 = sld [smem:[%s11116_s0 + %s9828_s7]]   ;;  %s9832_s7 = smov 34  }
  0x30   :  { %s10058_s21 = sld [smem:[%s11116_s0 + %s9829_s15]]   ;;  %s9833_s15 = smov 35  }
  0x31   :  { %s10063_s5 = sld [smem:[%s11116_s0 + %s9830_s22]]   ;;  %s9834_s22 = smov 36  }
  0x34   :  { %11133 = sst [smem:[#allocation99_spill]] %s10048_s29 }
  0x35   :  { %11134 = sst [smem:[#allocation100_spill]] %s10053_s13 }
  0x36   :  { %11135 = sst [smem:[#allocation101_spill]] %s10058_s21 }
  0x37   :  { %11136 = sst [smem:[#allocation102_spill]] %s10063_s5 }
  0x38   :  { %s10068_s29 = sld [smem:[%s11116_s0 + %s9831_s28]]   ;;  %s9835_s28 = smov 37  }
  0x39   :  { %s10073_s13 = sld [smem:[%s11116_s0 + %s9832_s7]]   ;;  %s9836_s7 = smov 38  }
  0x3a   :  { %s10078_s21 = sld [smem:[%s11116_s0 + %s9833_s15]]   ;;  %s9837_s15 = smov 39  }
  0x3b   :  { %s10083_s5 = sld [smem:[%s11116_s0 + %s9834_s22]]   ;;  %s9838_s22 = smov 40  }
  0x3e   :  { %11137 = sst [smem:[#allocation103_spill]] %s10068_s29 }
  0x3f   :  { %11138 = sst [smem:[#allocation104_spill]] %s10073_s13 }
  0x40   :  { %11139 = sst [smem:[#allocation105_spill]] %s10078_s21 }
  0x41   :  { %11140 = sst [smem:[#allocation106_spill]] %s10083_s5 }
  0x42   :  { %s10088_s29 = sld [smem:[%s11116_s0 + %s9835_s28]]   ;;  %s9839_s28 = smov 41  }
  0x43   :  { %s10093_s13 = sld [smem:[%s11116_s0 + %s9836_s7]]   ;;  %s9840_s7 = smov 42  }
  0x44   :  { %s10098_s21 = sld [smem:[%s11116_s0 + %s9837_s15]]   ;;  %s9841_s15 = smov 43  }
  0x45   :  { %s10103_s5 = sld [smem:[%s11116_s0 + %s9838_s22]]  }
  0x48   :  { %11141 = sst [smem:[#allocation107_spill]] %s10088_s29 }
  0x49   :  { %11142 = sst [smem:[#allocation108_spill]] %s10093_s13 }
  0x4a   :  { %11143 = sst [smem:[#allocation109_spill]] %s10098_s21 }
  0x4b   :  { %s10108_s29 = sld [smem:[%s11116_s0 + %s9839_s28]]  }
  0x4c   :  { %s10113_s13 = sld [smem:[%s11116_s0 + %s9840_s7]]  }
  0x4d   :  { %s10118_s21 = sld [smem:[%s11116_s0 + %s9841_s15]]  }
  0x4e   :  { %92 = vsyncpa [#allocation3], 0 }
  0x4f   :  { %93 = vsyncpa [#allocation6], 0 }
  0x50   :  { %94 = vsyncpa [#allocation9], 0 }
  0x51   :  { %95 = vsyncpa [#allocation12], 0 }
  0x52   :  { %96 = vsyncpa [#allocation15], 0 }
  0x53   :  { %97 = vsyncpa [#allocation18], 0 }
  0x54   :  { %98 = vsyncpa [#allocation21], 0 }
  0x55   :  { %99 = vsyncpa [#allocation24], 0 }
  0x56   :  { %100 = vsyncpa [#allocation27], 0 }
  0x57   :  { %101 = vsyncpa [#allocation30], 0 }
  0x58   :  { %102 = vsyncpa [#allocation33], 0 }
  0x59   :  { %103 = vsyncpa [#allocation36], 0 }
  0x5a   :  { %104 = vsyncpa [#allocation39], 0 }
  0x5b   :  { %105 = vsyncpa [#allocation42], 0 }
  0x5c   :  { %106 = vsyncpa [#allocation45], 0 }
  0x5d   :  { %107 = vsyncpa [#allocation48], 0 }
  0x5e   :  { %108 = vsyncpa [#allocation51], 0 }
  0x5f   :  { %109 = vsyncpa [#allocation54], 0 }
  0x60   :  { %110 = vsyncpa [#allocation57], 0 }
  0x61   :  { %111 = vsyncpa [#allocation60], 0 }
  0x62   :  { %112 = vsyncpa [#allocation4], 0  ;;  %s9842_s0 = smov [#allocation5]  }
  0x63   :  { %s130_s22 = sshll.u32 %s9842_s0, 4  ;;  %s131_s22 = int_to_ptr.vmem [resolvable:$true] %s130_s22 }
  0x64   :  { %s8965_s23 = scalar_lea.vmem %s131_s22, 64  ;;  %p8970_p1 = scmp.lt.s32.totalorder %s131_s22, %s131_s22 }
  0x65   :  { %p8966_p0 = scmp.ne.s32.totalorder %s131_s22, %s8965_s23  ;;  %p8971_p2 = scmp.lt.s32.totalorder %s8965_s23, %s8965_s23 }
  0x67   :  { %p8972_p3 = por %p8971_p2, %p8970_p1 }
  0x69   :  { %p8973_p4 = pnand %p8972_p3, %p8966_p0 }
  0x6b   :  { %8976 = shalt.err (!%p8973_p4)
}
  0x6c   :  { %s9843_s26 = smov 32   ;;  %s9844_s28 = smov 2  }
  0x6d   :  { %136 = dma.hbm_to_vmem [thread:$0]  %s9908_s9, 64, %s131_s22, [#allocation6], %s9843_s26, %s9843_s26, %s9844_s28  }
  0x6e   :  { %s9845_s1 = smov [#allocation8]   ;;  %s9846_s7 = smov [#allocation11]  }
  0x6f   :  { %s153_s2 = sshll.u32 %s9845_s1, 4  ;;  %s173_s10 = sshll.u32 %s9846_s7, 4  ;;  %s154_s2 = int_to_ptr.vmem [resolvable:$true] %s153_s2  ;;  %s174_s10 = int_to_ptr.vmem [resolvable:$true] %s173_s10 }
  0x70   :  { %s8985_s11 = scalar_lea.vmem %s154_s2, 32  ;;  %p8990_p6 = scmp.lt.s32.totalorder %s154_s2, %s154_s2 }
  0x71   :  { %p8986_p5 = scmp.ne.s32.totalorder %s154_s2, %s8985_s11  ;;  %p8991_p7 = scmp.lt.s32.totalorder %s8985_s11, %s8985_s11 }
  0x73   :  { %p8992_p8 = por %p8991_p7, %p8990_p6 }
  0x75   :  { %p8993_p9 = pnand %p8992_p8, %p8986_p5 }
  0x77   :  { %8996 = shalt.err (!%p8993_p9)
}
  0x78   :  { %156 = dma.hbm_to_vmem [thread:$0]  %s9918_s17, 32, %s154_s2, [#allocation9]  }
  0x79   :  { %s9005_s15 = scalar_lea.vmem %s174_s10, 32  ;;  %p9010_p11 = scmp.lt.s32.totalorder %s174_s10, %s174_s10 }
  0x7a   :  { %p9006_p10 = scmp.ne.s32.totalorder %s174_s10, %s9005_s15  ;;  %p9011_p12 = scmp.lt.s32.totalorder %s9005_s15, %s9005_s15 }
  0x7c   :  { %p9012_p13 = por %p9011_p12, %p9010_p11 }
  0x7e   :  { %p9013_p0 = pnand %p9012_p13, %p9006_p10 }
  0x80   :  { %9016 = shalt.err (!%p9013_p0)
}
  0x81   :  { %176 = dma.hbm_to_vmem [thread:$0]  %s9928_s25, 32, %s174_s10, [#allocation12]  }
  0x82   :  { %s9847_s9 = smov [#allocation14]   ;;  %s9848_s18 = smov [#allocation17]  }
  0x83   :  { %s192_s16 = sshll.u32 %s9847_s9, 4  ;;  %s215_s0 = sshll.u32 %s9848_s18, 4  ;;  %s193_s16 = int_to_ptr.vmem [resolvable:$true] %s192_s16  ;;  %s216_s0 = int_to_ptr.vmem [resolvable:$true] %s215_s0 }
  0x84   :  { %s9025_s22 = scalar_lea.vmem %s193_s16, 128  ;;  %p9030_p2 = scmp.lt.s32.totalorder %s193_s16, %s193_s16 }
  0x85   :  { %p9026_p1 = scmp.ne.s32.totalorder %s193_s16, %s9025_s22  ;;  %p9031_p3 = scmp.lt.s32.totalorder %s9025_s22, %s9025_s22 }
  0x87   :  { %p9032_p4 = por %p9031_p3, %p9030_p2 }
  0x89   :  { %p9033_p5 = pnand %p9032_p4, %p9026_p1 }
  0x8b   :  { %9036 = shalt.err (!%p9033_p5)
}
  0x8c   :  { %198 = dma.hbm_to_vmem [thread:$0]  %s9938_s3, 128, %s193_s16, [#allocation15], %s9843_s26, %s9843_s26, %s9844_s28  }
  0x8d   :  { %s9045_s17 = scalar_lea.vmem %s216_s0, 32  ;;  %p9050_p7 = scmp.lt.s32.totalorder %s216_s0, %s216_s0 }
  0x8e   :  { %p9046_p6 = scmp.ne.s32.totalorder %s216_s0, %s9045_s17  ;;  %p9051_p8 = scmp.lt.s32.totalorder %s9045_s17, %s9045_s17 }
  0x90   :  { %p9052_p9 = por %p9051_p8, %p9050_p7 }
  0x92   :  { %p9053_p10 = pnand %p9052_p9, %p9046_p6 }
  0x94   :  { %9056 = shalt.err (!%p9053_p10)
}
  0x95   :  { %218 = dma.hbm_to_vmem [thread:$0]  %s9948_s14, 32, %s216_s0, [#allocation18]  }
  0x96   :  { %s9849_s25 = smov [#allocation20]   ;;  %s9850_s1 = smov [#allocation23]  }
  0x97   :  { %s234_s23 = sshll.u32 %s9849_s25, 4  ;;  %s257_s2 = sshll.u32 %s9850_s1, 4  ;;  %s235_s23 = int_to_ptr.vmem [resolvable:$true] %s234_s23  ;;  %s258_s2 = int_to_ptr.vmem [resolvable:$true] %s257_s2 }
  0x98   :  { %s9065_s7 = scalar_lea.vmem %s235_s23, 128  ;;  %p9070_p12 = scmp.lt.s32.totalorder %s235_s23, %s235_s23 }
  0x99   :  { %p9066_p11 = scmp.ne.s32.totalorder %s235_s23, %s9065_s7  ;;  %p9071_p13 = scmp.lt.s32.totalorder %s9065_s7, %s9065_s7 }
  0x9b   :  { %p9072_p0 = por %p9071_p13, %p9070_p12 }
  0x9d   :  { %p9073_p1 = pnand %p9072_p0, %p9066_p11 }
  0x9f   :  { %9076 = shalt.err (!%p9073_p1)
}
  0xa0   :  { %240 = dma.hbm_to_vmem [thread:$0]  %s9958_s24, 128, %s235_s23, [#allocation21], %s9843_s26, %s9843_s26, %s9844_s28  }
  0xa1   :  { %s9085_s3 = scalar_lea.vmem %s258_s2, 32  ;;  %p9090_p3 = scmp.lt.s32.totalorder %s258_s2, %s258_s2 }
  0xa2   :  { %p9086_p2 = scmp.ne.s32.totalorder %s258_s2, %s9085_s3  ;;  %p9091_p4 = scmp.lt.s32.totalorder %s9085_s3, %s9085_s3 }
  0xa4   :  { %p9092_p5 = por %p9091_p4, %p9090_p3 }
  0xa6   :  { %p9093_p6 = pnand %p9092_p5, %p9086_p2 }
  0xa8   :  { %9096 = shalt.err (!%p9093_p6)
}
  0xa9   :  { %260 = dma.hbm_to_vmem [thread:$0]  %s9968_s6, 32, %s258_s2, [#allocation24]  }
  0xaa   :  { %s9851_s14 = smov [#allocation26]  }
  0xab   :  { %s277_s10 = sshll.u32 %s9851_s14, 4  ;;  %s278_s10 = int_to_ptr.vmem [resolvable:$true] %s277_s10 }
  0xac   :  { %s9105_s11 = scalar_lea.vmem %s278_s10, 64  ;;  %p9110_p8 = scmp.lt.s32.totalorder %s278_s10, %s278_s10 }
  0xad   :  { %p9106_p7 = scmp.ne.s32.totalorder %s278_s10, %s9105_s11  ;;  %p9111_p9 = scmp.lt.s32.totalorder %s9105_s11, %s9105_s11 }
  0xaf   :  { %p9112_p10 = por %p9111_p9, %p9110_p8 }
  0xb1   :  { %p9113_p11 = pnand %p9112_p10, %p9106_p7 }
  0xb3   :  { %9116 = shalt.err (!%p9113_p11)
}
  0xb4   :  { %280 = dma.hbm_to_vmem [thread:$0]  %s9978_s20, 64, %s278_s10, [#allocation27]  }
  0xb5   :  { %s9852_s24 = smov [#allocation29]   ;;  %s9853_s28 = smov [#allocation32]  }
  0xb6   :  { %s296_s26 = sshll.u32 %s9852_s24, 4  ;;  %s319_s15 = sshll.u32 %s9853_s28, 4  ;;  %s297_s26 = int_to_ptr.vmem [resolvable:$true] %s296_s26  ;;  %s320_s15 = int_to_ptr.vmem [resolvable:$true] %s319_s15 }
  0xb7   :  { %s9125_s9 = scalar_lea.vmem %s297_s26, 256  ;;  %p9130_p13 = scmp.lt.s32.totalorder %s297_s26, %s297_s26 }
  0xb8   :  { %p9126_p12 = scmp.ne.s32.totalorder %s297_s26, %s9125_s9  ;;  %p9131_p0 = scmp.lt.s32.totalorder %s9125_s9, %s9125_s9 }
  0xba   :  { %p9132_p1 = por %p9131_p0, %p9130_p13 }
  0xbc   :  { %p9133_p2 = pnand %p9132_p1, %p9126_p12 }
  0xbe   :  { %9136 = shalt.err (!%p9133_p2)
}
  0xbf   :  { %s9854_s6 = smov 64   ;;  %s9855_s16 = smov 4  }
  0xc0   :  { %302 = dma.hbm_to_vmem [thread:$0]  %s9988_s4, 256, %s297_s26, [#allocation30], %s9854_s6, %s9854_s6, %s9855_s16  }
  0xc1   :  { %s9145_s20 = scalar_lea.vmem %s320_s15, 64  ;;  %p9150_p4 = scmp.lt.s32.totalorder %s320_s15, %s320_s15 }
  0xc2   :  { %p9146_p3 = scmp.ne.s32.totalorder %s320_s15, %s9145_s20  ;;  %p9151_p5 = scmp.lt.s32.totalorder %s9145_s20, %s9145_s20 }
  0xc4   :  { %p9152_p6 = por %p9151_p5, %p9150_p4 }
  0xc6   :  { %p9153_p7 = pnand %p9152_p6, %p9146_p3 }
  0xc8   :  { %9156 = shalt.err (!%p9153_p7)
}
  0xc9   :  { %322 = dma.hbm_to_vmem [thread:$0]  %s9998_s30, 64, %s320_s15, [#allocation33]  }
  0xca   :  { %s9856_s18 = smov [#allocation35]   ;;  %s9857_s22 = smov [#allocation38]  }
  0xcb   :  { %s338_s0 = sshll.u32 %s9856_s18, 4  ;;  %s361_s17 = sshll.u32 %s9857_s22, 4  ;;  %s339_s0 = int_to_ptr.vmem [resolvable:$true] %s338_s0  ;;  %s362_s17 = int_to_ptr.vmem [resolvable:$true] %s361_s17 }
  0xcc   :  { %s9165_s25 = scalar_lea.vmem %s339_s0, 256  ;;  %p9170_p9 = scmp.lt.s32.totalorder %s339_s0, %s339_s0 }
  0xcd   :  { %p9166_p8 = scmp.ne.s32.totalorder %s339_s0, %s9165_s25  ;;  %p9171_p10 = scmp.lt.s32.totalorder %s9165_s25, %s9165_s25 }
  0xcf   :  { %p9172_p11 = por %p9171_p10, %p9170_p9 }
  0xd1   :  { %p9173_p12 = pnand %p9172_p11, %p9166_p8 }
  0xd3   :  { %9176 = shalt.err (!%p9173_p12)
}
  0xd4   :  { %344 = dma.hbm_to_vmem [thread:$0]  %s10008_s19, 256, %s339_s0, [#allocation36], %s9854_s6, %s9854_s6, %s9855_s16  }
  0xd5   :  { %s9185_s4 = scalar_lea.vmem %s362_s17, 64  ;;  %p9190_p0 = scmp.lt.s32.totalorder %s362_s17, %s362_s17 }
  0xd6   :  { %p9186_p13 = scmp.ne.s32.totalorder %s362_s17, %s9185_s4  ;;  %p9191_p1 = scmp.lt.s32.totalorder %s9185_s4, %s9185_s4 }
  0xd8   :  { %p9192_p2 = por %p9191_p1, %p9190_p0 }
  0xda   :  { %p9193_p3 = pnand %p9192_p2, %p9186_p13 }
  0xdc   :  { %9196 = shalt.err (!%p9193_p3)
}
  0xdd   :  { %364 = dma.hbm_to_vmem [thread:$0]  %s10018_s8, 64, %s362_s17, [#allocation39]  }
  0xde   :  { %s9858_s30 = smov [#allocation41]   ;;  %s9859_s1 = smov [#allocation44]  }
  0xdf   :  { %s383_s23 = sshll.u32 %s9858_s30, 4  ;;  %s405_s2 = sshll.u32 %s9859_s1, 4  ;;  %s384_s23 = int_to_ptr.vmem [resolvable:$true] %s383_s23  ;;  %s406_s2 = int_to_ptr.vmem [resolvable:$true] %s405_s2 }
  0xe0   :  { %s9205_s7 = scalar_lea.vmem %s384_s23, 128  ;;  %p9210_p5 = scmp.lt.s32.totalorder %s384_s23, %s384_s23 }
  0xe1   :  { %p9206_p4 = scmp.ne.s32.totalorder %s384_s23, %s9205_s7  ;;  %p9211_p6 = scmp.lt.s32.totalorder %s9205_s7, %s9205_s7 }
  0xe3   :  { %p9212_p7 = por %p9211_p6, %p9210_p5 }
  0xe5   :  { %p9213_p8 = pnand %p9212_p7, %p9206_p4 }
  0xe7   :  { %9216 = shalt.err (!%p9213_p8)
}
  0xe8   :  { %386 = dma.hbm_to_vmem [thread:$0]  %s10033_s12, 128, %s384_s23, [#allocation42]  }
  0xe9   :  { %s9225_s19 = scalar_lea.vmem %s406_s2, 128  ;;  %p9230_p10 = scmp.lt.s32.totalorder %s406_s2, %s406_s2 }
  0xea   :  { %p9226_p9 = scmp.ne.s32.totalorder %s406_s2, %s9225_s19  ;;  %p9231_p11 = scmp.lt.s32.totalorder %s9225_s19, %s9225_s19 }
  0xec   :  { %p9232_p12 = por %p9231_p11, %p9230_p10 }
  0xee   :  { %p9233_p13 = pnand %p9232_p12, %p9226_p9 }
  0xf0   :  { %9236 = shalt.err (!%p9233_p13)
}
  0xf1   :  { %408 = dma.hbm_to_vmem [thread:$0]  %s10043_s27, 128, %s406_s2, [#allocation45]  }
  0xf2   :  { %s9860_s8 = smov [#allocation47]   ;;  %s9861_s14 = smov [#allocation50]  }
  0xf3   :  { %s425_s3 = sshll.u32 %s9860_s8, 4  ;;  %s446_s10 = sshll.u32 %s9861_s14, 4  ;;  %s426_s3 = int_to_ptr.vmem [resolvable:$true] %s425_s3  ;;  %s447_s10 = int_to_ptr.vmem [resolvable:$true] %s446_s10 }
  0xf4   :  { %s9245_s11 = scalar_lea.vmem %s426_s3, 128  ;;  %p9250_p1 = scmp.lt.s32.totalorder %s426_s3, %s426_s3 }
  0xf5   :  { %p9246_p0 = scmp.ne.s32.totalorder %s426_s3, %s9245_s11  ;;  %p9251_p2 = scmp.lt.s32.totalorder %s9245_s11, %s9245_s11 }
  0xf7   :  { %p9252_p3 = por %p9251_p2, %p9250_p1 }
  0xf9   :  { %p9253_p4 = pnand %p9252_p3, %p9246_p0 }
  0xfb   :  { %9256 = shalt.err (!%p9253_p4)
}
  0xfc   :  { %s11144_s12 = sld [smem:[#allocation100_spill]]  ;;  %s9265_s24 = scalar_lea.vmem %s447_s10, 512 }
  0xfd   :  { %p9266_p5 = scmp.ne.s32.totalorder %s447_s10, %s9265_s24  ;;  %p9270_p6 = scmp.lt.s32.totalorder %s447_s10, %s447_s10 }
  0xfe   :  { %p9271_p7 = scmp.lt.s32.totalorder %s9265_s24, %s9265_s24 }
 0x100   :  { %p9272_p8 = por %p9271_p7, %p9270_p6 }
 0x102   :  { %428 = dma.hbm_to_vmem [thread:$0]  %s11144_s12, 128, %s426_s3, [#allocation48]  }
 0x103   :  { %p9273_p9 = pnand %p9272_p8, %p9266_p5 }
 0x105   :  { %9276 = shalt.err (!%p9273_p9)
}
 0x106   :  { %s11145_s27 = sld [smem:[#allocation103_spill]]  ;;  %s9862_s26 = smov [#allocation53]  }
 0x107   :  { %s468_s28 = sshll.u32 %s9862_s26, 4  ;;  %s9863_s15 = smov [#allocation56]   ;;  %s469_s28 = int_to_ptr.vmem [resolvable:$true] %s468_s28 }
 0x108   :  { %s490_s9 = sshll.u32 %s9863_s15, 4  ;;  %s9285_s20 = scalar_lea.vmem %s469_s28, 1664  ;;  %s491_s9 = int_to_ptr.vmem [resolvable:$true] %s490_s9 }
 0x109   :  { %p9286_p10 = scmp.ne.s32.totalorder %s469_s28, %s9285_s20  ;;  %p9290_p11 = scmp.lt.s32.totalorder %s469_s28, %s469_s28 }
 0x10a   :  { %p9291_p12 = scmp.lt.s32.totalorder %s9285_s20, %s9285_s20 }
 0x10c   :  { %452 = dma.hbm_to_vmem [thread:$0]  %s11145_s27, 512, %s447_s10, [#allocation51], %s9854_s6, %s9854_s6, %s9855_s16  }
 0x10d   :  { %p9292_p13 = por %p9291_p12, %p9290_p11 }
 0x10f   :  { %p9293_p0 = pnand %p9292_p13, %p9286_p10 }
 0x111   :  { %9296 = shalt.err (!%p9293_p0)
}
 0x112   :  { %s9864_s18 = smov 128   ;;  %s11146_s0 = sld [smem:[#allocation105_spill]] }
 0x113   :  { %s9865_s22 = smov 8   ;;  %s9305_s17 = scalar_lea.vmem %s491_s9, 896 }
 0x114   :  { %p9306_p1 = scmp.ne.s32.totalorder %s491_s9, %s9305_s17  ;;  %p9310_p2 = scmp.lt.s32.totalorder %s491_s9, %s491_s9 }
 0x115   :  { %p9311_p3 = scmp.lt.s32.totalorder %s9305_s17, %s9305_s17 }
 0x117   :  { %p9312_p4 = por %p9311_p3, %p9310_p2 }
 0x118   :  { %474 = dma.hbm_to_vmem [thread:$0]  %s11146_s0, 1664, %s469_s28, [#allocation54], %s9864_s18, %s9864_s18, %s9865_s22  }
 0x119   :  { %p9313_p5 = pnand %p9312_p4, %p9306_p1 }
 0x11b   :  { %9316 = shalt.err (!%p9313_p5)
}
 0x11c   :  { %s11147_s25 = sld [smem:[#allocation107_spill]]  ;;  %s9866_s4 = smov [#allocation59]  }
 0x11d   :  { %s512_s30 = sshll.u32 %s9866_s4, 4  ;;  %s9867_s23 = smov [#allocation2]   ;;  %s513_s30 = int_to_ptr.vmem [resolvable:$true] %s512_s30 }
 0x11e   :  { %s118_s1 = sshll.u32 %s9867_s23, 4  ;;  %s9325_s2 = scalar_lea.vmem %s513_s30, 896  ;;  %s119_s1 = int_to_ptr.vmem [resolvable:$true] %s118_s1 }
 0x11f   :  { %p9326_p6 = scmp.ne.s32.totalorder %s513_s30, %s9325_s2  ;;  %p9330_p7 = scmp.lt.s32.totalorder %s513_s30, %s513_s30 }
 0x120   :  { %p9331_p8 = scmp.lt.s32.totalorder %s9325_s2, %s9325_s2 }
 0x122   :  { %496 = dma.hbm_to_vmem [thread:$0]  %s11147_s25, 896, %s491_s9, [#allocation57], %s9864_s18, %s9864_s18, %s9865_s22  }
 0x123   :  { %p9332_p9 = por %p9331_p8, %p9330_p7 }
 0x125   :  { %p9333_p10 = pnand %p9332_p9, %p9326_p6 }
 0x127   :  { %9336 = shalt.err (!%p9333_p10)
}
 0x128   :  { %s11148_s7 = sld [smem:[#allocation109_spill]]  ;;  %s9345_s19 = scalar_lea.vmem %s119_s1, 128 }
 0x129   :  { %p9346_p11 = scmp.ne.s32.totalorder %s119_s1, %s9345_s19  ;;  %p9350_p12 = scmp.lt.s32.totalorder %s119_s1, %s119_s1 }
 0x12a   :  { %p9351_p13 = scmp.lt.s32.totalorder %s9345_s19, %s9345_s19 }
 0x12c   :  { %p9352_p0 = por %p9351_p13, %p9350_p12 }
 0x12e   :  { %518 = dma.hbm_to_vmem [thread:$0]  %s11148_s7, 896, %s513_s30, [#allocation60], %s9864_s18, %s9864_s18, %s9865_s22  }
 0x12f   :  { %p9353_p1 = pnand %p9352_p0, %p9346_p11 }
 0x131   :  { %9356 = shalt.err (!%p9353_p1)
}
 0x132   :  { %s11149_s8 = sld [smem:[#allocation84_spill]]  ;;  %s9868_s3 = smov [#allocation7]  }
 0x133   :  { %s143_s14 = sshll.u32 %s9868_s3, 4  ;;  %s9869_s10 = smov [#allocation10]   ;;  %s144_s14 = int_to_ptr.vmem [resolvable:$true] %s143_s14 }
 0x134   :  { %s163_s11 = sshll.u32 %s9869_s10, 4  ;;  %s9365_s12 = scalar_lea.vmem %s144_s14, 32  ;;  %s164_s11 = int_to_ptr.vmem [resolvable:$true] %s163_s11 }
 0x135   :  { %p9366_p2 = scmp.ne.s32.totalorder %s144_s14, %s9365_s12  ;;  %p9370_p3 = scmp.lt.s32.totalorder %s144_s14, %s144_s14 }
 0x136   :  { %p9371_p4 = scmp.lt.s32.totalorder %s9365_s12, %s9365_s12 }
 0x138   :  { %124 = dma.hbm_to_vmem [thread:$0]  %s11149_s8, 128, %s119_s1, [#allocation3], %s9854_s6, %s9854_s6, %s9855_s16  }
 0x139   :  { %p9372_p5 = por %p9371_p4, %p9370_p3 }
 0x13b   :  { %p9373_p6 = pnand %p9372_p5, %p9366_p2 }
 0x13d   :  { %9376 = shalt.err (!%p9373_p6)
}
 0x13e   :  { %s11150_s24 = sld [smem:[#allocation85_spill]]  ;;  %s9385_s27 = scalar_lea.vmem %s164_s11, 32 }
 0x13f   :  { %p9386_p7 = scmp.ne.s32.totalorder %s164_s11, %s9385_s27  ;;  %p9390_p8 = scmp.lt.s32.totalorder %s164_s11, %s164_s11 }
 0x140   :  { %p9391_p9 = scmp.lt.s32.totalorder %s9385_s27, %s9385_s27 }
 0x142   :  { %p9392_p10 = por %p9391_p9, %p9390_p8 }
 0x144   :  { %146 = dma.hbm_to_vmem [thread:$0]  %s11150_s24, 32, %s144_s14, [#allocation6]  }
 0x145   :  { %p9393_p11 = pnand %p9392_p10, %p9386_p7 }
 0x147   :  { %9396 = shalt.err (!%p9393_p11)
}
 0x148   :  { %s11151_s6 = sld [smem:[#allocation86_spill]]  ;;  %s9870_s16 = smov [#allocation13]  }
 0x149   :  { %s183_s26 = sshll.u32 %s9870_s16, 4  ;;  %s9871_s28 = smov [#allocation16]   ;;  %s184_s26 = int_to_ptr.vmem [resolvable:$true] %s183_s26 }
 0x14a   :  { %s205_s15 = sshll.u32 %s9871_s28, 4  ;;  %s9405_s9 = scalar_lea.vmem %s184_s26, 32  ;;  %s206_s15 = int_to_ptr.vmem [resolvable:$true] %s205_s15 }
 0x14b   :  { %p9406_p12 = scmp.ne.s32.totalorder %s184_s26, %s9405_s9  ;;  %p9410_p13 = scmp.lt.s32.totalorder %s184_s26, %s184_s26 }
 0x14c   :  { %p9411_p0 = scmp.lt.s32.totalorder %s9405_s9, %s9405_s9 }
 0x14e   :  { %166 = dma.hbm_to_vmem [thread:$0]  %s11151_s6, 32, %s164_s11, [#allocation9]  }
 0x14f   :  { %p9412_p1 = por %p9411_p0, %p9410_p13 }
 0x151   :  { %p9413_p2 = pnand %p9412_p1, %p9406_p12 }
 0x153   :  { %9416 = shalt.err (!%p9413_p2)
}
 0x154   :  { %s11152_s20 = sld [smem:[#allocation87_spill]]  ;;  %s9425_s0 = scalar_lea.vmem %s206_s15, 32 }
 0x155   :  { %p9426_p3 = scmp.ne.s32.totalorder %s206_s15, %s9425_s0  ;;  %p9430_p4 = scmp.lt.s32.totalorder %s206_s15, %s206_s15 }
 0x156   :  { %p9431_p5 = scmp.lt.s32.totalorder %s9425_s0, %s9425_s0 }
 0x158   :  { %p9432_p6 = por %p9431_p5, %p9430_p4 }
 0x15a   :  { %186 = dma.hbm_to_vmem [thread:$0]  %s11152_s20, 32, %s184_s26, [#allocation12]  }
 0x15b   :  { %p9433_p7 = pnand %p9432_p6, %p9426_p3 }
 0x15d   :  { %9436 = shalt.err (!%p9433_p7)
}
 0x15e   :  { %s11153_s17 = sld [smem:[#allocation88_spill]]  ;;  %s9872_s25 = smov [#allocation19]  }
 0x15f   :  { %s225_s4 = sshll.u32 %s9872_s25, 4  ;;  %s9873_s30 = smov [#allocation22]   ;;  %s226_s4 = int_to_ptr.vmem [resolvable:$true] %s225_s4 }
 0x160   :  { %s247_s23 = sshll.u32 %s9873_s30, 4  ;;  %s9445_s1 = scalar_lea.vmem %s226_s4, 32  ;;  %s248_s23 = int_to_ptr.vmem [resolvable:$true] %s247_s23 }
 0x161   :  { %p9446_p8 = scmp.ne.s32.totalorder %s226_s4, %s9445_s1  ;;  %p9450_p9 = scmp.lt.s32.totalorder %s226_s4, %s226_s4 }
 0x162   :  { %p9451_p10 = scmp.lt.s32.totalorder %s9445_s1, %s9445_s1 }
 0x164   :  { %208 = dma.hbm_to_vmem [thread:$0]  %s11153_s17, 32, %s206_s15, [#allocation15]  }
 0x165   :  { %p9452_p11 = por %p9451_p10, %p9450_p9 }
 0x167   :  { %p9453_p12 = pnand %p9452_p11, %p9446_p8 }
 0x169   :  { %9456 = shalt.err (!%p9453_p12)
}
 0x16a   :  { %s11154_s2 = sld [smem:[#allocation89_spill]]  ;;  %s9465_s7 = scalar_lea.vmem %s248_s23, 32 }
 0x16b   :  { %p9466_p13 = scmp.ne.s32.totalorder %s248_s23, %s9465_s7  ;;  %p9470_p0 = scmp.lt.s32.totalorder %s248_s23, %s248_s23 }
 0x16c   :  { %p9471_p1 = scmp.lt.s32.totalorder %s9465_s7, %s9465_s7 }
 0x16e   :  { %p9472_p2 = por %p9471_p1, %p9470_p0 }
 0x170   :  { %228 = dma.hbm_to_vmem [thread:$0]  %s11154_s2, 32, %s226_s4, [#allocation18]  }
 0x171   :  { %p9473_p3 = pnand %p9472_p2, %p9466_p13 }
 0x173   :  { %9476 = shalt.err (!%p9473_p3)
}
 0x174   :  { %s11155_s19 = sld [smem:[#allocation90_spill]]  ;;  %s9874_s8 = smov [#allocation25]  }
 0x175   :  { %s267_s3 = sshll.u32 %s9874_s8, 4  ;;  %s9875_s14 = smov [#allocation28]   ;;  %s268_s3 = int_to_ptr.vmem [resolvable:$true] %s267_s3 }
 0x176   :  { %s287_s10 = sshll.u32 %s9875_s14, 4  ;;  %s9485_s11 = scalar_lea.vmem %s268_s3, 32  ;;  %s288_s10 = int_to_ptr.vmem [resolvable:$true] %s287_s10 }
 0x177   :  { %p9486_p4 = scmp.ne.s32.totalorder %s268_s3, %s9485_s11  ;;  %p9490_p5 = scmp.lt.s32.totalorder %s268_s3, %s268_s3 }
 0x178   :  { %p9491_p6 = scmp.lt.s32.totalorder %s9485_s11, %s9485_s11 }
 0x17a   :  { %250 = dma.hbm_to_vmem [thread:$0]  %s11155_s19, 32, %s248_s23, [#allocation21]  }
 0x17b   :  { %p9492_p7 = por %p9491_p6, %p9490_p5 }
 0x17d   :  { %p9493_p8 = pnand %p9492_p7, %p9486_p4 }
 0x17f   :  { %9496 = shalt.err (!%p9493_p8)
}
 0x180   :  { %s11156_s12 = sld [smem:[#allocation91_spill]]  ;;  %s9505_s24 = scalar_lea.vmem %s288_s10, 64 }
 0x181   :  { %p9506_p9 = scmp.ne.s32.totalorder %s288_s10, %s9505_s24  ;;  %p9510_p10 = scmp.lt.s32.totalorder %s288_s10, %s288_s10 }
 0x182   :  { %p9511_p11 = scmp.lt.s32.totalorder %s9505_s24, %s9505_s24 }
 0x184   :  { %p9512_p12 = por %p9511_p11, %p9510_p10 }
 0x186   :  { %270 = dma.hbm_to_vmem [thread:$0]  %s11156_s12, 32, %s268_s3, [#allocation24]  }
 0x187   :  { %p9513_p13 = pnand %p9512_p12, %p9506_p9 }
 0x189   :  { %9516 = shalt.err (!%p9513_p13)
}
 0x18a   :  { %s11157_s27 = sld [smem:[#allocation92_spill]]  ;;  %s9876_s6 = smov [#allocation31]  }
 0x18b   :  { %s309_s16 = sshll.u32 %s9876_s6, 4  ;;  %s9877_s26 = smov [#allocation34]   ;;  %s310_s16 = int_to_ptr.vmem [resolvable:$true] %s309_s16 }
 0x18c   :  { %s329_s28 = sshll.u32 %s9877_s26, 4  ;;  %s9525_s15 = scalar_lea.vmem %s310_s16, 64  ;;  %s330_s28 = int_to_ptr.vmem [resolvable:$true] %s329_s28 }
 0x18d   :  { %p9526_p0 = scmp.ne.s32.totalorder %s310_s16, %s9525_s15  ;;  %p9530_p1 = scmp.lt.s32.totalorder %s310_s16, %s310_s16 }
 0x18e   :  { %p9531_p2 = scmp.lt.s32.totalorder %s9525_s15, %s9525_s15 }
 0x190   :  { %290 = dma.hbm_to_vmem [thread:$0]  %s11157_s27, 64, %s288_s10, [#allocation27]  }
 0x191   :  { %p9532_p3 = por %p9531_p2, %p9530_p1 }
 0x193   :  { %p9533_p4 = pnand %p9532_p3, %p9526_p0 }
 0x195   :  { %9536 = shalt.err (!%p9533_p4)
}
 0x196   :  { %s11158_s9 = sld [smem:[#allocation93_spill]]  ;;  %s9545_s20 = scalar_lea.vmem %s330_s28, 64 }
 0x197   :  { %p9546_p5 = scmp.ne.s32.totalorder %s330_s28, %s9545_s20  ;;  %p9550_p6 = scmp.lt.s32.totalorder %s330_s28, %s330_s28 }
 0x198   :  { %p9551_p7 = scmp.lt.s32.totalorder %s9545_s20, %s9545_s20 }
 0x19a   :  { %p9552_p8 = por %p9551_p7, %p9550_p6 }
 0x19c   :  { %312 = dma.hbm_to_vmem [thread:$0]  %s11158_s9, 64, %s310_s16, [#allocation30]  }
 0x19d   :  { %p9553_p9 = pnand %p9552_p8, %p9546_p5 }
 0x19f   :  { %9556 = shalt.err (!%p9553_p9)
}
 0x1a0   :  { %s11159_s0 = sld [smem:[#allocation94_spill]]  ;;  %s9878_s17 = smov [#allocation37]  }
 0x1a1   :  { %s351_s25 = sshll.u32 %s9878_s17, 4  ;;  %s9879_s4 = smov [#allocation40]   ;;  %s352_s25 = int_to_ptr.vmem [resolvable:$true] %s351_s25 }
 0x1a2   :  { %s373_s30 = sshll.u32 %s9879_s4, 4  ;;  %s9565_s23 = scalar_lea.vmem %s352_s25, 64  ;;  %s374_s30 = int_to_ptr.vmem [resolvable:$true] %s373_s30 }
 0x1a3   :  { %p9566_p10 = scmp.ne.s32.totalorder %s352_s25, %s9565_s23  ;;  %p9570_p11 = scmp.lt.s32.totalorder %s352_s25, %s352_s25 }
 0x1a4   :  { %p9571_p12 = scmp.lt.s32.totalorder %s9565_s23, %s9565_s23 }
 0x1a6   :  { %332 = dma.hbm_to_vmem [thread:$0]  %s11159_s0, 64, %s330_s28, [#allocation33]  }
 0x1a7   :  { %p9572_p13 = por %p9571_p12, %p9570_p11 }
 0x1a9   :  { %p9573_p0 = pnand %p9572_p13, %p9566_p10 }
 0x1ab   :  { %9576 = shalt.err (!%p9573_p0)
}
 0x1ac   :  { %s11160_s1 = sld [smem:[#allocation95_spill]]  ;;  %s9585_s2 = scalar_lea.vmem %s374_s30, 128 }
 0x1ad   :  { %p9586_p1 = scmp.ne.s32.totalorder %s374_s30, %s9585_s2  ;;  %p9590_p2 = scmp.lt.s32.totalorder %s374_s30, %s374_s30 }
 0x1ae   :  { %p9591_p3 = scmp.lt.s32.totalorder %s9585_s2, %s9585_s2 }
 0x1b0   :  { %p9592_p4 = por %p9591_p3, %p9590_p2 }
 0x1b2   :  { %354 = dma.hbm_to_vmem [thread:$0]  %s11160_s1, 64, %s352_s25, [#allocation36]  }
 0x1b3   :  { %p9593_p5 = pnand %p9592_p4, %p9586_p1 }
 0x1b5   :  { %9596 = shalt.err (!%p9593_p5)
}
 0x1b6   :  { %s11161_s7 = sld [smem:[#allocation97_spill]]  ;;  %s9880_s19 = smov [#allocation43]  }
 0x1b7   :  { %s392_s8 = sshll.u32 %s9880_s19, 4  ;;  %s9881_s3 = smov [#allocation46]   ;;  %s393_s8 = int_to_ptr.vmem [resolvable:$true] %s392_s8 }
 0x1b8   :  { %s415_s14 = sshll.u32 %s9881_s3, 4  ;;  %s9605_s10 = scalar_lea.vmem %s393_s8, 256  ;;  %s416_s14 = int_to_ptr.vmem [resolvable:$true] %s415_s14 }
 0x1b9   :  { %p9606_p6 = scmp.ne.s32.totalorder %s393_s8, %s9605_s10  ;;  %p9610_p7 = scmp.lt.s32.totalorder %s393_s8, %s393_s8 }
 0x1ba   :  { %p9611_p8 = scmp.lt.s32.totalorder %s9605_s10, %s9605_s10 }
 0x1bc   :  { %376 = dma.hbm_to_vmem [thread:$0]  %s11161_s7, 128, %s374_s30, [#allocation39]  }
 0x1bd   :  { %p9612_p9 = por %p9611_p8, %p9610_p7 }
 0x1bf   :  { %p9613_p10 = pnand %p9612_p9, %p9606_p6 }
 0x1c1   :  { %9616 = shalt.err (!%p9613_p10)
}
 0x1c2   :  { %s11162_s11 = sld [smem:[#allocation98_spill]]  ;;  %s9625_s12 = scalar_lea.vmem %s416_s14, 128 }
 0x1c3   :  { %p9626_p11 = scmp.ne.s32.totalorder %s416_s14, %s9625_s12  ;;  %p9630_p12 = scmp.lt.s32.totalorder %s416_s14, %s416_s14 }
 0x1c4   :  { %p9631_p13 = scmp.lt.s32.totalorder %s9625_s12, %s9625_s12 }
 0x1c6   :  { %p9632_p0 = por %p9631_p13, %p9630_p12 }
 0x1c8   :  { %398 = dma.hbm_to_vmem [thread:$0]  %s11162_s11, 256, %s393_s8, [#allocation42], %s9864_s18, %s9864_s18, %s9865_s22  }
 0x1c9   :  { %p9633_p1 = pnand %p9632_p0, %p9626_p11 }
 0x1cb   :  { %9636 = shalt.err (!%p9633_p1)
}
 0x1cc   :  { %s11163_s24 = sld [smem:[#allocation99_spill]]  ;;  %s9882_s27 = smov [#allocation49]  }
 0x1cd   :  { %s437_s6 = sshll.u32 %s9882_s27, 4  ;;  %s9883_s16 = smov [#allocation52]   ;;  %s438_s6 = int_to_ptr.vmem [resolvable:$true] %s437_s6 }
 0x1ce   :  { %s459_s26 = sshll.u32 %s9883_s16, 4  ;;  %s9645_s28 = scalar_lea.vmem %s438_s6, 128  ;;  %s460_s26 = int_to_ptr.vmem [resolvable:$true] %s459_s26 }
 0x1cf   :  { %p9646_p2 = scmp.ne.s32.totalorder %s438_s6, %s9645_s28  ;;  %p9650_p3 = scmp.lt.s32.totalorder %s438_s6, %s438_s6 }
 0x1d0   :  { %p9651_p4 = scmp.lt.s32.totalorder %s9645_s28, %s9645_s28 }
 0x1d2   :  { %418 = dma.hbm_to_vmem [thread:$0]  %s11163_s24, 128, %s416_s14, [#allocation45]  }
 0x1d3   :  { %p9652_p5 = por %p9651_p4, %p9650_p3 }
 0x1d5   :  { %p9653_p6 = pnand %p9652_p5, %p9646_p2 }
 0x1d7   :  { %9656 = shalt.err (!%p9653_p6)
}
 0x1d8   :  { %s11164_s18 = sld [smem:[#allocation102_spill]]  ;;  %s9665_s22 = scalar_lea.vmem %s460_s26, 16 }
 0x1d9   :  { %p9666_p7 = scmp.ne.s32.totalorder %s460_s26, %s9665_s22  ;;  %s9669_s15 = scalar_lea.vmem %s460_s26, 32 }
 0x1da   :  { %p9670_p8 = scmp.lt.s32.totalorder %s460_s26, %s460_s26  ;;  %p9671_p9 = scmp.lt.s32.totalorder %s9669_s15, %s9665_s22 }
 0x1dc   :  { %p9672_p10 = por %p9671_p9, %p9670_p8 }
 0x1de   :  { %440 = dma.hbm_to_vmem [thread:$0]  %s11164_s18, 128, %s438_s6, [#allocation48]  }
 0x1df   :  { %p9673_p11 = pnand %p9672_p10, %p9666_p7 }
 0x1e1   :  { %9676 = shalt.err (!%p9673_p11)
}
 0x1e2   :  { %s11165_s9 = sld [smem:[#allocation104_spill]]  ;;  %s9884_s20 = smov [#allocation55]  }
 0x1e3   :  { %s481_s0 = sshll.u32 %s9884_s20, 4  ;;  %s9885_s17 = smov [#allocation58]   ;;  %s482_s0 = int_to_ptr.vmem [resolvable:$true] %s481_s0 }
 0x1e4   :  { %s503_s25 = sshll.u32 %s9885_s17, 4  ;;  %s9685_s4 = scalar_lea.vmem %s482_s0, 16  ;;  %s504_s25 = int_to_ptr.vmem [resolvable:$true] %s503_s25 }
 0x1e5   :  { %p9686_p12 = scmp.ne.s32.totalorder %s482_s0, %s9685_s4  ;;  %s9689_s30 = scalar_lea.vmem %s482_s0, 32 }
 0x1e6   :  { %p9690_p13 = scmp.lt.s32.totalorder %s482_s0, %s482_s0  ;;  %p9691_p0 = scmp.lt.s32.totalorder %s9689_s30, %s9685_s4 }
 0x1e8   :  { %462 = dma.hbm_to_vmem [thread:$0]  %s11165_s9, 16, %s460_s26, [#allocation51]  }
 0x1e9   :  { %p9692_p1 = por %p9691_p0, %p9690_p13 }
 0x1eb   :  { %p9693_p2 = pnand %p9692_p1, %p9686_p12 }
 0x1ed   :  { %9696 = shalt.err (!%p9693_p2)
}
 0x1ee   :  { %s11166_s23 = sld [smem:[#allocation106_spill]]  ;;  %s9705_s1 = scalar_lea.vmem %s504_s25, 16 }
 0x1ef   :  { %p9706_p3 = scmp.ne.s32.totalorder %s504_s25, %s9705_s1  ;;  %s9709_s2 = scalar_lea.vmem %s504_s25, 32 }
 0x1f0   :  { %p9710_p4 = scmp.lt.s32.totalorder %s504_s25, %s504_s25  ;;  %p9711_p5 = scmp.lt.s32.totalorder %s9709_s2, %s9705_s1 }
 0x1f2   :  { %p9712_p6 = por %p9711_p5, %p9710_p4 }
 0x1f4   :  { %484 = dma.hbm_to_vmem [thread:$0]  %s11166_s23, 16, %s482_s0, [#allocation54]  }
 0x1f5   :  { %p9713_p7 = pnand %p9712_p6, %p9706_p3 }
 0x1f7   :  { %9716 = shalt.err (!%p9713_p7)
}
 0x1f8   :  { %s11167_s7 = sld [smem:[#allocation108_spill]]  ;;  %s9886_s19 = smov [#allocation61]  }
 0x1f9   :  { %s525_s8 = sshll.u32 %s9886_s19, 4  ;;  %s526_s8 = int_to_ptr.vmem [resolvable:$true] %s525_s8 }
 0x1fa   :  { %s9725_s3 = scalar_lea.vmem %s526_s8, 16  ;;  %s9729_s14 = scalar_lea.vmem %s526_s8, 32 }
 0x1fb   :  { %p9726_p8 = scmp.ne.s32.totalorder %s526_s8, %s9725_s3  ;;  %p9730_p9 = scmp.lt.s32.totalorder %s526_s8, %s526_s8 }
 0x1fc   :  { %p9731_p10 = scmp.lt.s32.totalorder %s9729_s14, %s9725_s3 }
 0x1fe   :  { %506 = dma.hbm_to_vmem [thread:$0]  %s11167_s7, 16, %s504_s25, [#allocation57]  }
 0x1ff   :  { %p9732_p11 = por %p9731_p10, %p9730_p9 }
 0x201   :  { %p9733_p12 = pnand %p9732_p11, %p9726_p8 }
 0x203   :  { %9736 = shalt.err (!%p9733_p12)
}
 0x204   :  { %528 = dma.hbm_to_vmem [thread:$0]  %s10103_s5, 16, %s526_s8, [#allocation60]  }
 0x205   :  { %9757 = dma.done.wait [#allocation3], 128  }
 0x206   :  { %9758 = vsyncadd [#allocation3], 4294967168 }
 0x207   :  { %9759 = dma.done.wait [#allocation6], 96  }
 0x208   :  { %9760 = vsyncadd [#allocation6], 4294967200 }
 0x209   :  { %9761 = dma.done.wait [#allocation9], 64  }
 0x20a   :  { %9762 = vsyncadd [#allocation9], 4294967232 }
 0x20b   :  { %9763 = dma.done.wait [#allocation12], 64  }
 0x20c   :  { %9764 = vsyncadd [#allocation12], 4294967232 }
 0x20d   :  { %9765 = dma.done.wait [#allocation15], 160  }
 0x20e   :  { %9766 = vsyncadd [#allocation15], 4294967136 }
 0x20f   :  { %9767 = dma.done.wait [#allocation18], 64  }
 0x210   :  { %9768 = vsyncadd [#allocation18], 4294967232 }
 0x211   :  { %9769 = dma.done.wait [#allocation21], 160  }
 0x212   :  { %9770 = vsyncadd [#allocation21], 4294967136 }
 0x213   :  { %9771 = dma.done.wait [#allocation24], 64  }
 0x214   :  { %9772 = vsyncadd [#allocation24], 4294967232 }
 0x215   :  { %9773 = dma.done.wait [#allocation27], 128  }
 0x216   :  { %9774 = vsyncadd [#allocation27], 4294967168 }
 0x217   :  { %9775 = dma.done.wait [#allocation30], 320  }
 0x218   :  { %9776 = vsyncadd [#allocation30], 4294966976 }
 0x219   :  { %9777 = dma.done.wait [#allocation33], 128  }
 0x21a   :  { %9778 = vsyncadd [#allocation33], 4294967168 }
 0x21b   :  { %9779 = dma.done.wait [#allocation36], 320  }
 0x21c   :  { %9780 = vsyncadd [#allocation36], 4294966976 }
 0x21d   :  { %9781 = dma.done.wait [#allocation39], 192  }
 0x21e   :  { %9782 = vsyncadd [#allocation39], 4294967104 }
 0x21f   :  { %9783 = dma.done.wait [#allocation42], 384  }
 0x220   :  { %9784 = vsyncadd [#allocation42], 4294966912 }
 0x221   :  { %9785 = dma.done.wait [#allocation45], 256  }
 0x222   :  { %9786 = vsyncadd [#allocation45], 4294967040 }
 0x223   :  { %9787 = dma.done.wait [#allocation48], 256  }
 0x224   :  { %9788 = vsyncadd [#allocation48], 4294967040 }
 0x225   :  { %9789 = dma.done.wait [#allocation51], 528  }
 0x226   :  { %9790 = vsyncadd [#allocation51], 4294966768 }
 0x227   :  { %9791 = dma.done.wait [#allocation54], 1680  }
 0x228   :  { %9792 = vsyncadd [#allocation54], 4294965616 }
 0x229   :  { %9793 = dma.done.wait [#allocation57], 912  }
 0x22a   :  { %9794 = vsyncadd [#allocation57], 4294966384 }
 0x22b   :  { %9795 = dma.done.wait [#allocation60], 912  }
 0x22c   :  { %9796 = vsyncadd [#allocation60], 4294966384  ;;  %v9887_v0 = vmov 0.0   ;;  %vm9888_vm0 = vmmov 0   ;;  %v9889_v1 = vmov 0   ;;  %vm724_vm1 = vcmask 1043456  }
 0x22d   :  { %8215 = vmatprep.subr.mxu0 %v9887_v0  ;;  %8217 = vmatprep.mubr.msk.f32.mxu0 %vm9888_vm0, %v9887_v0  ;;  %v711_v2 = vld [vmem:[#allocation2] sm:$0xf]  ;;  %v713_v3 = vld [vmem:[#allocation2 + $0x4] sm:$0xf]  ;;  %s9890_s5 = smov 127   ;;  %vm720_vm2 = vcmask 31744   ;;  %v1244_v54 = vlaneseq }
 0x22e   :  { %8230 = vmatprep.subr.mxu1 %v9887_v0  ;;  %8232 = vmatprep.mubr.msk.f32.mxu1 %vm9888_vm0, %v9887_v0  ;;  %v714_v4 = vld [vmem:[#allocation5] sm:$0x3]  ;;  %v650_v5 = vld [vmem:[#allocation7] sm:$0x3]  ;;  %v716_v6 = vld [vmem:[#allocation5 + $0x2] sm:$0x3] }
 0x22f   :  { %8915 = vset.pattern.permute.xlu1 %v9889_v1  ;;  %8916 = vset.pattern.permute.xlu0 %v9889_v1  ;;  %vm1026_vm3 = vcmask 508928   ;;  %v651_v40 = vld [vmem:[#allocation8] sm:$0x3]  ;;  %v652_v43 = vld [vmem:[#allocation10] sm:$0x3]  ;;  %v10220_v57 = vshrl.u32 %v1244_v54, 7 }
 0x230   :  { %718 = vrot.lane.b32.xlu0 %v711_v2, %s9890_s5  ;;  %8231 = vmatpush3.msk.msra.mxu1 %vm724_vm1, %v713_v3  ;;  %v10225_v59 = vand.u32 127, %v1244_v54  ;;  %vm1090_vm5 = vcmask 1041408   ;;  %vm1086_vm6 = vcmask 15360   ;;  %vm1290_vm9 = vcmask 1046528   ;;  %s9892_s10 = smov 126   ;;  %s9893_s11 = smov 125  }
 0x231   :  { %8233 = vmatmul.mubr.msk.f32.vlgmr.msra.gmra.mxu1 %vm720_vm2, %v714_v4  ;;  %874 = vperm.xlu1 %8915, %v650_v5   ;;  %v10223_v58 = vadd.s32 56, %v10220_v57  ;;  %v10229_v61 = vadd.s32 48, %v10220_v57  ;;  %v10233_v63 = vadd.s32 40, %v10220_v57  ;;  %s11168_s12 = sld [smem:[#allocation96_spill]] }
 0x232   :  { %8240 = vmatprep.subr.mxu1 %v9887_v0  ;;  %8242 = vmatprep.mubr.msk.f32.mxu1 %vm9888_vm0, %v9887_v0  ;;  %s11169_s24 = sld [smem:[#allocation101_spill]] }
 0x233   :  { %v1262_v60 = vadd.s32 3, %v10223_v58  ;;  %v1261_v5 = vadd.s32 3, %v10229_v61 }
 0x234   :  { %879 = vrot.lane.b32.xlu0 %v713_v3, %s9890_s5 }
 0x235   :  { %vm1270_vm4 = vcmp.eq.s32.totalorder %v10225_v59, %v1262_v60  ;;  %vm1269_vm10 = vcmp.eq.s32.totalorder %v10225_v59, %v1261_v5 }
 0x2a2   :  { %v719_v7 = vpop.permute.xlu0 %718 }
 0x2a3   :  { %8216 = vmatpush3.msk.msra.mxu0 %vm724_vm1, %v719_v7 }
 0x2a4   :  { %8218 = vmatmul.mubr.msk.f32.vlgmr.msra.gmra.mxu0 %vm720_vm2, %v716_v6  ;;  %8220 = vmatprep.subr.mxu0 %v9887_v0 }
 0x2a5   :  { %8221 = vmatpush3.msk.msra.mxu0 %vm724_vm1, %v711_v2  ;;  %8222 = vmatprep.mubr.msk.f32.mxu0 %vm9888_vm0, %v9887_v0 }
 0x2a6   :  { %8225 = vmatprep.subr.mxu0 %v9887_v0  ;;  %v880_v8 = vpop.permute.xlu0 %879 }
 0x2a8   :  { %8223 = vmatmul.mubr.msk.f32.vlgmr.msra.gmra.mxu0 %vm720_vm2, %v714_v4  ;;  %v1080_v4 = vld [vmem:[#allocation11] sm:$0x3] }
 0x2a9   :  { %8226 = vmatpush3.msk.msra.mxu0 %vm724_vm1, %v880_v8  ;;  %8227 = vmatprep.mubr.msk.f32.mxu0 %vm9888_vm0, %v9887_v0  ;;  %v7748_v8 = vsel %vm1270_vm4, 1.0, %v9887_v0  ;;  %vm1287_vm4 = vcmask 515072  }
 0x2aa   :  { %8235 = vmatprep.subr.mxu0 %v9887_v0 }
 0x2ac   :  { %8228 = vmatmul.mubr.msk.f32.vlgmr.msra.gmra.mxu0 %vm720_vm2, %v716_v6  ;;  %v875_v14 = vpop.permute.xlu1 %874  ;;  %v10237_v6 = vadd.s32 32, %v10220_v57 }
 0x2ad   :  { %8237 = vmatprep.mubr.msk.f32.mxu0 %vm9888_vm0, %v9887_v0 }
 0x2f1   :  { %v1021_v9 = vpop.f32.mrf.mxu1 }
 0x2f3   :  { %v8234_v10 = vpop.f32.mrf.mxu1 }
 0x2f4   :  { %v1260_v10 = vadd.s32 3, %v10233_v63 }
 0x2f6   :  { %vm1268_vm11 = vcmp.eq.s32.totalorder %v10225_v59, %v1260_v10 }
 0x364   :  { %v793_v11 = vpop.f32.mrf.mxu0 }
 0x366   :  { %v8219_v12 = vpop.f32.mrf.mxu0 }
 0x367   :  { %v1259_v12 = vadd.s32 3, %v10237_v6 }
 0x368   :  { %v868_v13 = vpop.f32.mrf.mxu0 }
 0x369   :  { %v869_v15 = vadd.f32 %v868_v13, %v793_v11  ;;  %v10243_v11 = vadd.s32 24, %v10220_v57  ;;  %v10251_v13 = vadd.s32 16, %v10220_v57  ;;  %vm1267_vm12 = vcmp.eq.s32.totalorder %v10225_v59, %v1259_v12 }
 0x36a   :  { %v8224_v16 = vpop.f32.mrf.mxu0 }
 0x36b   :  { %v877_v17 = vadd.f32 %v875_v14, %v869_v15  ;;  %v10261_v15 = vadd.s32 8, %v10220_v57  ;;  %v9891_v16 = vmov 1.0  }
 0x36c   :  { %v949_v18 = vpop.f32.mrf.mxu0 }
 0x36d   :  { %v1022_v19 = vadd.f32 %v1021_v9, %v949_v18  ;;  %v1027_v20 = vsel %vm1026_vm3, %v877_v17, 0.0  ;;  %v1030_v25 = vmul.f32 %v877_v17, %v877_v17  ;;  %v10278_v18 = vadd.s32 3, %v10261_v15 }
 0x36e   :  { %v8229_v21 = vpop.f32.mrf.mxu0  ;;  %1028 = vadd.xlane.f32.xlu1 %v1027_v20 }
 0x36f   :  { %v1025_v22 = vadd.f32 %v1022_v19, %v875_v14  ;;  %v1031_v27 = vsel %vm1026_vm3, %v1030_v25, 0.0  ;;  %v1258_v14 = vadd.s32 3, %v10243_v11  ;;  %v10286_v19 = vadd.s32 3, %v10220_v57 }
 0x370   :  { %vm1264_vm15 = vcmp.eq.s32.totalorder %v10225_v59, %v10278_v18 }
 0x371   :  { %v1034_v23 = vsel %vm1026_vm3, %v1025_v22, 0.0  ;;  %v1038_v24 = vmul.f32 %v1025_v22, %v1025_v22  ;;  %vm1266_vm13 = vcmp.eq.s32.totalorder %v10225_v59, %v1258_v14 }
 0x372   :  { %1035 = vadd.xlane.f32.xlu0 %v1034_v23 }
 0x373   :  { %v1039_v26 = vsel %vm1026_vm3, %v1038_v24, 0.0  ;;  %vm1263_vm3 = vcmp.eq.s32.totalorder %v10225_v59, %v10286_v19 }
 0x374   :  { %1040 = vadd.xlane.f32.xlu1 %v1039_v26 }
 0x376   :  { %1032 = vadd.xlane.f32.xlu0 %v1031_v27  ;;  %v654_v27 = vld [vmem:[#allocation16] sm:$0x3] }
 0x3f7   :  { %v1029_v28 = vpop.xlane.xlu1 %1028 }
 0x3fb   :  { %v1036_v29 = vpop.xlane.xlu0 %1035 }
 0x3fc   :  { %v1037_v30 = vadd.f32 %v1036_v29, %v1029_v28  ;;  %v1239_v29 = vld [vmem:[#allocation14 + $0x2] sm:$0x3] }
 0x3fd   :  { %v1041_v32 = vpop.xlane.xlu1 %1040 }
 0x3fe   :  { %v1044_v31 = vmul.f32 0.007936508, %v1037_v30 }
 0x3ff   :  { %v1033_v33 = vpop.xlane.xlu0 %1032 }
 0x400   :  { %v1042_v34 = vadd.f32 %v1041_v32, %v1033_v33  ;;  %v1046_v35 = vmul.f32 %v1044_v31, %v1044_v31  ;;  %v1241_v33 = vld [vmem:[#allocation14 + $0x4] sm:$0x3] }
 0x402   :  { %v1045_v36 = vmul.f32 0.007936508, %v1042_v34 }
 0x404   :  { %v1047_v37 = vsub.f32 %v1045_v36, %v1046_v35  ;;  %v1243_v35 = vld [vmem:[#allocation14 + $0x6] sm:$0x3] }
 0x406   :  { %v1048_v38 = vmax.f32 %v1047_v37, 0.0 }
 0x408   :  { %v1049_v39 = vadd.f32 1e-05, %v1048_v38 }
 0x40a   :  { %8917 = vrsqrt.f32 %v1049_v39 }
 0x417   :  { %v8918_v41 = vpop.eup %8917 }
 0x418   :  { %v1051_v42 = vmul.f32 %v8918_v41, %v651_v40 }
 0x41a   :  { %1056 = vperm.xlu0 %8916, %v1051_v42   ;;  %v1052_v44 = vmul.f32 %v1051_v42, %v1044_v31  ;;  %v1237_v31 = vld [vmem:[#allocation14] sm:$0x3] }
 0x41c   :  { %v1053_v45 = vsub.f32 %v652_v43, %v1052_v44 }
 0x41e   :  { %1062 = vperm.xlu1 %8915, %v1053_v45  }
 0x495   :  { %v1057_v46 = vpop.permute.xlu0 %1056 }
 0x496   :  { %v1059_v47 = vmul.f32 %v1057_v46, %v877_v17  ;;  %v1072_v48 = vmul.f32 %v1057_v46, %v1025_v22  ;;  %v1257_v17 = vadd.s32 3, %v10251_v13 }
 0x498   :  { %vm1265_vm14 = vcmp.eq.s32.totalorder %v10225_v59, %v1257_v17 }
 0x499   :  { %v1063_v49 = vpop.permute.xlu1 %1062 }
 0x49a   :  { %v1065_v50 = vadd.f32 %v1063_v49, %v1059_v47  ;;  %v1073_v51 = vadd.f32 %v1072_v48, %v1063_v49 }
 0x49c   :  { %v1067_v52 = vmin.f32 %v1065_v50, 0.0  ;;  %v1075_v53 = vmin.f32 %v1073_v51, 0.0  ;;  %vm1066_vm7 = vcmp.gt.f32.partialorder %v1065_v50, 0.0  ;;  %vm1074_vm8 = vcmp.gt.f32.partialorder %v1073_v51, 0.0 }
 0x49e   :  { %v1068_v55 = vmul.f32 1.442695, %v1067_v52  ;;  %v1076_v56 = vmul.f32 1.442695, %v1075_v53 }
 0x4a0   :  { %8919 = vpow2.f32 %v1068_v55 }
 0x4a1   :  { %8921 = vpow2.f32 %v1076_v56 }
 0x4ad   :  { %v8920_v62 = vpop.eup %8919 }
 0x4ae   :  { %v8922_v1 = vpop.eup %8921  ;;  %v7735_v2 = vadd.f32 -1.0, %v8920_v62 }
 0x4af   :  { %v7736_v3 = vadd.f32 -1.0, %v8922_v1 }
 0x4b0   :  { %v1071_v7 = vsel %vm1066_vm7, %v1065_v50, %v7735_v2  ;;  %vm2049_vm7 = vcmask 533504  }
 0x4b1   :  { %8236 = vmatpush3.msk.msra.mxu0 %vm1090_vm5, %v1071_v7  ;;  %v1079_v9 = vsel %vm1074_vm8, %v1073_v51, %v7736_v3 }
 0x4b2   :  { %8241 = vmatpush3.msk.msra.mxu1 %vm1090_vm5, %v1079_v9  ;;  %8238 = vmatmul.mubr.msk.f32.vlgmr.msra.gmra.mxu0 %vm1086_vm6, %v1080_v4 }
 0x4b3   :  { %8245 = vmatprep.subr.mxu0 %v9887_v0  ;;  %8261 = vmatprep.mubr.msk.f32.mxu0 %vm9888_vm0, %v9887_v0 }
 0x4b4   :  { %8246 = vmatpush3.msk.msra.mxu0 %vm1290_vm9, %v7748_v8  ;;  %8243 = vmatmul.mubr.msk.f32.vlgmr.msra.gmra.mxu1 %vm1086_vm6, %v1080_v4 }
 0x4b5   :  { %8247 = vmatprep.subr.mxu0 %v9887_v0  ;;  %8264 = vmatprep.subr.mxu1 %v9887_v0 }
 0x4b6   :  { %8248 = vmatpush3.msk.msra.mxu0 %vm1269_vm10, %v9891_v16  ;;  %8266 = vmatprep.mubr.msk.f32.mxu1 %vm9888_vm0, %v9887_v0 }
 0x4b7   :  { %8249 = vmatprep.subr.mxu0 %v9887_v0 }
 0x4b8   :  { %8250 = vmatpush3.msk.msra.mxu0 %vm1268_vm11, %v9891_v16 }
 0x4b9   :  { %8251 = vmatprep.subr.mxu0 %v9887_v0 }
 0x4ba   :  { %8252 = vmatpush3.msk.msra.mxu0 %vm1267_vm12, %v9891_v16 }
 0x4bb   :  { %8253 = vmatprep.subr.mxu0 %v9887_v0 }
 0x4bc   :  { %8254 = vmatpush3.msk.msra.mxu0 %vm1266_vm13, %v9891_v16 }
 0x4bd   :  { %8255 = vmatprep.subr.mxu0 %v9887_v0 }
 0x4be   :  { %8256 = vmatpush3.msk.msra.mxu0 %vm1265_vm14, %v9891_v16 }
 0x4bf   :  { %8257 = vmatprep.subr.mxu0 %v9887_v0 }
 0x4c0   :  { %8258 = vmatpush3.msk.msra.mxu0 %vm1264_vm15, %v9891_v16 }
 0x4c1   :  { %8259 = vmatprep.subr.mxu0 %v9887_v0 }
 0x4c2   :  { %8260 = vmatpush3.msk.msra.mxu0 %vm1263_vm3, %v9891_v16 }
 0x4c3   :  { %8262 = vmatmul.mubr.msk.f32.vlgmr.msra.gmra.mxu0 %vm1287_vm4, %v1071_v7  ;;  %8284 = vmatprep.subr.mxu0 %v9887_v0 }
 0x4c4   :  { %8285 = vmatpush3.msk.msra.mxu0 %vm1290_vm9, %v7748_v8  ;;  %8300 = vmatprep.mubr.msk.f32.mxu0 %vm9888_vm0, %v9887_v0 }
 0x4c5   :  { %8286 = vmatprep.subr.mxu0 %v9887_v0 }
 0x4c6   :  { %8287 = vmatpush3.msk.msra.mxu0 %vm1269_vm10, %v9891_v16 }
 0x4c7   :  { %8288 = vmatprep.subr.mxu0 %v9887_v0 }
 0x4c8   :  { %8289 = vmatpush3.msk.msra.mxu0 %vm1268_vm11, %v9891_v16  ;;  %vm2764_vm11 = vcmask 1040384  }
 0x4c9   :  { %8290 = vmatprep.subr.mxu0 %v9887_v0 }
 0x4ca   :  { %8291 = vmatpush3.msk.msra.mxu0 %vm1267_vm12, %v9891_v16 }
 0x4cb   :  { %8292 = vmatprep.subr.mxu0 %v9887_v0 }
 0x4cc   :  { %8293 = vmatpush3.msk.msra.mxu0 %vm1266_vm13, %v9891_v16 }
 0x4cd   :  { %8294 = vmatprep.subr.mxu0 %v9887_v0 }
 0x4ce   :  { %8295 = vmatpush3.msk.msra.mxu0 %vm1265_vm14, %v9891_v16 }
 0x4cf   :  { %8296 = vmatprep.subr.mxu0 %v9887_v0 }
 0x4d0   :  { %8297 = vmatpush3.msk.msra.mxu0 %vm1264_vm15, %v9891_v16 }
 0x4d1   :  { %8298 = vmatprep.subr.mxu0 %v9887_v0 }
 0x4d2   :  { %8299 = vmatpush3.msk.msra.mxu0 %vm1263_vm3, %v9891_v16 }
 0x4d3   :  { %8301 = vmatmul.mubr.msk.f32.vlgmr.msra.gmra.mxu0 %vm1287_vm4, %v1079_v9  ;;  %8323 = vmatprep.subr.mxu0 %v9887_v0 }
 0x4d4   :  { %8325 = vmatprep.mubr.msk.f32.mxu0 %vm9888_vm0, %v9887_v0 }
 0x572   :  { %v10348_v20 = vpop.f32.mrf.mxu0 }
 0x574   :  { %v8239_v21 = vpop.f32.mrf.mxu0  ;;  %v10355_v26 = vpop.f32.mrf.mxu1 }
 0x576   :  { %v8244_v28 = vpop.f32.mrf.mxu1 }
 0x583   :  { %v1360_v22 = vpop.f32.mrf.mxu0 }
 0x584   :  { %1365 = vrot.lane.b32.xlu1 %v1360_v22, %s9890_s5 }
 0x585   :  { %v8263_v23 = vpop.f32.mrf.mxu0 }
 0x588   :  { %1517 = vrot.lane.b32.xlu1 %v1360_v22, %s9892_s10 }
 0x58c   :  { %1595 = vrot.lane.b32.xlu1 %v1360_v22, %s9893_s11 }
 0x593   :  { %v1747_v24 = vpop.f32.mrf.mxu0 }
 0x594   :  { %1752 = vrot.lane.b32.xlu1 %v1747_v24, %s9890_s5 }
 0x595   :  { %v8302_v25 = vpop.f32.mrf.mxu0 }
 0x598   :  { %1898 = vrot.lane.b32.xlu1 %v1747_v24, %s9892_s10 }
 0x59c   :  { %1973 = vrot.lane.b32.xlu1 %v1747_v24, %s9893_s11 }
 0x5a0   :  { %1675 = vperm.xlu1 %8915, %v654_v27  }
 0x5f6   :  { %v1366_v30 = vpop.permute.xlu1 %1365 }
 0x5f7   :  { %8265 = vmatpush3.msk.msra.mxu1 %vm1090_vm5, %v1366_v30 }
 0x5f8   :  { %8267 = vmatmul.mubr.msk.f32.vlgmr.msra.gmra.mxu1 %vm1086_vm6, %v1239_v29  ;;  %8269 = vmatprep.subr.mxu1 %v9887_v0 }
 0x5f9   :  { %8270 = vmatpush3.msk.msra.mxu1 %vm1090_vm5, %v1360_v22  ;;  %8271 = vmatprep.mubr.msk.f32.mxu1 %vm9888_vm0, %v9887_v0 }
 0x5fa   :  { %v1518_v32 = vpop.permute.xlu1 %1517  ;;  %8274 = vmatprep.subr.mxu1 %v9887_v0 }
 0x5fc   :  { %8272 = vmatmul.mubr.msk.f32.vlgmr.msra.gmra.mxu1 %vm1086_vm6, %v1237_v31 }
 0x5fd   :  { %8275 = vmatpush3.msk.msra.mxu1 %vm1090_vm5, %v1518_v32  ;;  %8276 = vmatprep.mubr.msk.f32.mxu1 %vm9888_vm0, %v9887_v0 }
 0x5fe   :  { %v1596_v34 = vpop.permute.xlu1 %1595  ;;  %8279 = vmatprep.subr.mxu1 %v9887_v0 }
 0x600   :  { %8277 = vmatmul.mubr.msk.f32.vlgmr.msra.gmra.mxu1 %vm1086_vm6, %v1241_v33 }
 0x601   :  { %8280 = vmatpush3.msk.msra.mxu1 %vm1090_vm5, %v1596_v34  ;;  %8281 = vmatprep.mubr.msk.f32.mxu1 %vm9888_vm0, %v9887_v0 }
 0x602   :  { %8303 = vmatprep.subr.mxu1 %v9887_v0 }
 0x604   :  { %8282 = vmatmul.mubr.msk.f32.vlgmr.msra.gmra.mxu1 %vm1086_vm6, %v1243_v35 }
 0x605   :  { %8305 = vmatprep.mubr.msk.f32.mxu1 %vm9888_vm0, %v9887_v0 }
 0x606   :  { %v1753_v36 = vpop.permute.xlu1 %1752 }
 0x607   :  { %8304 = vmatpush3.msk.msra.mxu1 %vm1090_vm5, %v1753_v36  ;;  %v656_v36 = vld [vmem:[#allocation19] sm:$0x3] }
 0x608   :  { %8306 = vmatmul.mubr.msk.f32.vlgmr.msra.gmra.mxu1 %vm1086_vm6, %v1239_v29  ;;  %8308 = vmatprep.subr.mxu1 %v9887_v0 }
 0x609   :  { %8309 = vmatpush3.msk.msra.mxu1 %vm1090_vm5, %v1747_v24  ;;  %8310 = vmatprep.mubr.msk.f32.mxu1 %vm9888_vm0, %v9887_v0 }
 0x60a   :  { %v1899_v37 = vpop.permute.xlu1 %1898  ;;  %8313 = vmatprep.subr.mxu1 %v9887_v0 }
 0x60c   :  { %8311 = vmatmul.mubr.msk.f32.vlgmr.msra.gmra.mxu1 %vm1086_vm6, %v1237_v31 }
 0x60d   :  { %8314 = vmatpush3.msk.msra.mxu1 %vm1090_vm5, %v1899_v37  ;;  %8315 = vmatprep.mubr.msk.f32.mxu1 %vm9888_vm0, %v9887_v0 }
 0x60e   :  { %v1974_v38 = vpop.permute.xlu1 %1973  ;;  %8318 = vmatprep.subr.mxu1 %v9887_v0 }
 0x610   :  { %8316 = vmatmul.mubr.msk.f32.vlgmr.msra.gmra.mxu1 %vm1086_vm6, %v1241_v33  ;;  %v655_v33 = vld [vmem:[#allocation17] sm:$0x3] }
 0x611   :  { %8319 = vmatpush3.msk.msra.mxu1 %vm1090_vm5, %v1974_v38  ;;  %8320 = vmatprep.mubr.msk.f32.mxu1 %vm9888_vm0, %v9887_v0 }
 0x612   :  { %8328 = vmatprep.subr.mxu1 %v9887_v0 }
 0x614   :  { %8321 = vmatmul.mubr.msk.f32.vlgmr.msra.gmra.mxu1 %vm1086_vm6, %v1243_v35 }
 0x615   :  { %8330 = vmatprep.mubr.msk.f32.mxu1 %vm9888_vm0, %v9887_v0 }
 0x61b   :  { %v1676_v49 = vpop.permute.xlu1 %1675 }
 0x6b8   :  { %v1438_v39 = vpop.f32.mrf.mxu1 }
 0x6ba   :  { %v8268_v40 = vpop.f32.mrf.mxu1 }
 0x6bc   :  { %v1513_v41 = vpop.f32.mrf.mxu1 }
 0x6bd   :  { %v1514_v44 = vadd.f32 %v1513_v41, %v1438_v39 }
 0x6be   :  { %v8273_v42 = vpop.f32.mrf.mxu1 }
 0x6c0   :  { %v1590_v43 = vpop.f32.mrf.mxu1 }
 0x6c1   :  { %v1594_v46 = vadd.f32 %v1590_v43, %v1514_v44 }
 0x6c2   :  { %v8278_v45 = vpop.f32.mrf.mxu1 }
 0x6c4   :  { %v1668_v47 = vpop.f32.mrf.mxu1 }
 0x6c5   :  { %v1672_v48 = vadd.f32 %v1668_v47, %v1594_v46 }
 0x6c6   :  { %v8283_v50 = vpop.f32.mrf.mxu1 }
 0x6c7   :  { %v1678_v51 = vadd.f32 %v1676_v49, %v1672_v48 }
 0x6c8   :  { %v1822_v52 = vpop.f32.mrf.mxu1 }
 0x6c9   :  { %v2050_v53 = vsel %vm2049_vm7, %v1678_v51, 0.0  ;;  %v2053_v54 = vmul.f32 %v1678_v51, %v1678_v51 }
 0x6ca   :  { %2051 = vadd.xlane.f32.xlu0 %v2050_v53  ;;  %v8307_v55 = vpop.f32.mrf.mxu1 }
 0x6cb   :  { %v2054_v60 = vsel %vm2049_vm7, %v2053_v54, 0.0  ;;  %v2103_v55 = vld [vmem:[#allocation20] sm:$0x3] }
 0x6cc   :  { %v1894_v56 = vpop.f32.mrf.mxu1 }
 0x6cd   :  { %v1895_v2 = vadd.f32 %v1894_v56, %v1822_v52  ;;  %v653_v56 = vld [vmem:[#allocation13] sm:$0x3] }
 0x6ce   :  { %2055 = vadd.xlane.f32.xlu0 %v2054_v60  ;;  %v8312_v62 = vpop.f32.mrf.mxu1  ;;  %v657_v60 = vld [vmem:[#allocation22] sm:$0x3] }
 0x6cf   :  { %v2105_v62 = vld [vmem:[#allocation20 + $0x2] sm:$0x3] }
 0x6d0   :  { %v1968_v1 = vpop.f32.mrf.mxu1 }
 0x6d1   :  { %v1972_v4 = vadd.f32 %v1968_v1, %v1895_v2 }
 0x6d2   :  { %v8317_v3 = vpop.f32.mrf.mxu1 }
 0x6d3   :  { %v2109_v3 = vld [vmem:[#allocation20 + $0x6] sm:$0x3] }
 0x6d4   :  { %v2043_v5 = vpop.f32.mrf.mxu1 }
 0x6d5   :  { %v2047_v7 = vadd.f32 %v2043_v5, %v1972_v4  ;;  %v2107_v4 = vld [vmem:[#allocation20 + $0x4] sm:$0x3] }
 0x6d6   :  { %v8322_v8 = vpop.f32.mrf.mxu1 }
 0x6d7   :  { %v2048_v9 = vadd.f32 %v2047_v7, %v1676_v49 }
 0x6d9   :  { %v2057_v10 = vsel %vm2049_vm7, %v2048_v9, 0.0  ;;  %v2061_v12 = vmul.f32 %v2048_v9, %v2048_v9 }
 0x6da   :  { %2058 = vadd.xlane.f32.xlu1 %v2057_v10 }
 0x6db   :  { %v2062_v14 = vsel %vm2049_vm7, %v2061_v12, 0.0 }
 0x6dc   :  { %2063 = vadd.xlane.f32.xlu0 %v2062_v14 }
 0x753   :  { %v2052_v17 = vpop.xlane.xlu0 %2051 }
 0x757   :  { %v2056_v21 = vpop.xlane.xlu0 %2055 }
 0x763   :  { %v2059_v22 = vpop.xlane.xlu1 %2058 }
 0x764   :  { %v2060_v23 = vadd.f32 %v2059_v22, %v2052_v17 }
 0x765   :  { %v2064_v24 = vpop.xlane.xlu0 %2063 }
 0x766   :  { %v2067_v25 = vmul.f32 0.007575758, %v2060_v23  ;;  %v2065_v27 = vadd.f32 %v2064_v24, %v2056_v21 }
 0x768   :  { %v2069_v28 = vmul.f32 %v2067_v25, %v2067_v25  ;;  %v2068_v29 = vmul.f32 0.007575758, %v2065_v27 }
 0x76a   :  { %v2070_v30 = vsub.f32 %v2068_v29, %v2069_v28 }
 0x76c   :  { %v2071_v31 = vmax.f32 %v2070_v30, 0.0 }
 0x76e   :  { %v2072_v32 = vadd.f32 1e-05, %v2071_v31 }
 0x770   :  { %8923 = vrsqrt.f32 %v2072_v32 }
 0x77d   :  { %v8924_v34 = vpop.eup %8923 }
 0x77e   :  { %v2074_v35 = vmul.f32 %v8924_v34, %v655_v33 }
 0x780   :  { %2079 = vperm.xlu1 %8915, %v2074_v35   ;;  %v2075_v37 = vmul.f32 %v2074_v35, %v2067_v25 }
 0x782   :  { %v2076_v38 = vsub.f32 %v656_v36, %v2075_v37  ;;  %v10450_v37 = vmul.u32 4, %v10225_v59 }
 0x784   :  { %2085 = vperm.xlu0 %8916, %v2076_v38   ;;  %vm2733_vm12 = vcmp.eq.s32.totalorder %v10223_v58, %v10450_v37  ;;  %vm2732_vm13 = vcmp.eq.s32.totalorder %v10229_v61, %v10450_v37  ;;  %vm2731_vm14 = vcmp.eq.s32.totalorder %v10233_v63, %v10450_v37  ;;  %vm2730_vm4 = vcmp.eq.s32.totalorder %v10237_v6, %v10450_v37 }
 0x785   :  { %vm2729_vm7 = vcmp.eq.s32.totalorder %v10243_v11, %v10450_v37 }
 0x7fb   :  { %v2080_v39 = vpop.permute.xlu1 %2079 }
 0x7fc   :  { %v2082_v40 = vmul.f32 %v2080_v39, %v1678_v51  ;;  %v2095_v41 = vmul.f32 %v2080_v39, %v2048_v9 }
 0x7ff   :  { %v2086_v42 = vpop.permute.xlu0 %2085 }
 0x800   :  { %v2088_v43 = vadd.f32 %v2086_v42, %v2082_v40  ;;  %v2096_v44 = vadd.f32 %v2095_v41, %v2086_v42 }
 0x802   :  { %v2090_v45 = vmin.f32 %v2088_v43, 0.0  ;;  %v2098_v46 = vmin.f32 %v2096_v44, 0.0  ;;  %vm2089_vm8 = vcmp.gt.f32.partialorder %v2088_v43, 0.0  ;;  %vm2097_vm10 = vcmp.gt.f32.partialorder %v2096_v44, 0.0 }
 0x804   :  { %v2091_v47 = vmul.f32 1.442695, %v2090_v45  ;;  %v2099_v48 = vmul.f32 1.442695, %v2098_v46 }
 0x806   :  { %8925 = vpow2.f32 %v2091_v47 }
 0x807   :  { %8927 = vpow2.f32 %v2099_v48 }
 0x813   :  { %v8926_v49 = vpop.eup %8925 }
 0x814   :  { %v8928_v50 = vpop.eup %8927  ;;  %v7783_v52 = vadd.f32 -1.0, %v8926_v49 }
 0x815   :  { %v7784_v54 = vadd.f32 -1.0, %v8928_v50 }
 0x816   :  { %v2094_v53 = vsel %vm2089_vm8, %v2088_v43, %v7783_v52  ;;  %v7808_v43 = vsel %vm2733_vm12, 1.0, %v9887_v0  ;;  %vm2728_vm8 = vcmp.eq.s32.totalorder %v10251_v13, %v10450_v37  ;;  %vm2726_vm12 = vcmp.eq.s32.totalorder %v10220_v57, %v10450_v37 }
 0x817   :  { %2341 = vrot.lane.b32.xlu0 %v2094_v53, %s9893_s11  ;;  %2111 = vrot.lane.b32.xlu1 %v2094_v53, %s9890_s5  ;;  %v2102_v51 = vsel %vm2097_vm10, %v2096_v44, %v7784_v54  ;;  %vm2727_vm10 = vcmp.eq.s32.totalorder %v10261_v15, %v10450_v37 }
 0x818   :  { %8329 = vmatpush3.msk.msra.mxu1 %vm1090_vm5, %v2094_v53 }
 0x819   :  { %8331 = vmatmul.mubr.msk.f32.vlgmr.msra.gmra.mxu1 %vm1086_vm6, %v2103_v55  ;;  %8338 = vmatprep.subr.mxu1 %v9887_v0 }
 0x81a   :  { %8340 = vmatprep.mubr.msk.f32.mxu1 %vm9888_vm0, %v9887_v0 }
 0x81b   :  { %2263 = vrot.lane.b32.xlu1 %v2094_v53, %s9892_s10  ;;  %2572 = vrot.lane.b32.xlu0 %v2102_v51, %s9892_s10 }
 0x81f   :  { %1083 = vperm.xlu0 %8916, %v653_v56   ;;  %2426 = vrot.lane.b32.xlu1 %v2102_v51, %s9890_s5 }
 0x823   :  { %2647 = vrot.lane.b32.xlu1 %v2102_v51, %s9893_s11 }
 0x827   :  { %2421 = vperm.xlu1 %8915, %v657_v60  }
 0x889   :  { %v2342_v1 = vpop.permute.xlu0 %2341  ;;  %v2112_v2 = vpop.permute.xlu1 %2111 }
 0x88a   :  { %8324 = vmatpush3.msk.msra.mxu0 %vm1090_vm5, %v2112_v2  ;;  %8339 = vmatpush3.msk.msra.mxu1 %vm1090_vm5, %v2342_v1 }
 0x88b   :  { %8326 = vmatmul.mubr.msk.f32.vlgmr.msra.gmra.mxu0 %vm1086_vm6, %v2105_v62  ;;  %8348 = vmatprep.subr.mxu1 %v9887_v0 }
 0x88c   :  { %8341 = vmatmul.mubr.msk.f32.vlgmr.msra.gmra.mxu1 %vm1086_vm6, %v2109_v3  ;;  %8333 = vmatprep.subr.mxu0 %v9887_v0 }
 0x88d   :  { %8349 = vmatpush3.msk.msra.mxu1 %vm1090_vm5, %v2102_v51  ;;  %v2264_v5 = vpop.permute.xlu1 %2263  ;;  %8335 = vmatprep.mubr.msk.f32.mxu0 %vm9888_vm0, %v9887_v0  ;;  %v2573_v8 = vpop.permute.xlu0 %2572 }
 0x88e   :  { %8334 = vmatpush3.msk.msra.mxu0 %vm1090_vm5, %v2264_v5  ;;  %8350 = vmatprep.mubr.msk.f32.mxu1 %vm9888_vm0, %v9887_v0 }
 0x88f   :  { %8336 = vmatmul.mubr.msk.f32.vlgmr.msra.gmra.mxu0 %vm1086_vm6, %v2107_v4  ;;  %8343 = vmatprep.subr.mxu0 %v9887_v0 }
 0x890   :  { %8345 = vmatprep.mubr.msk.f32.mxu0 %vm9888_vm0, %v9887_v0  ;;  %8351 = vmatmul.mubr.msk.f32.vlgmr.msra.gmra.mxu1 %vm1086_vm6, %v2103_v55 }
 0x891   :  { %v2427_v7 = vpop.permute.xlu1 %2426  ;;  %8358 = vmatprep.subr.mxu1 %v9887_v0  ;;  %8360 = vmatprep.mubr.msk.f32.mxu1 %vm9888_vm0, %v9887_v0 }
 0x892   :  { %8344 = vmatpush3.msk.msra.mxu0 %vm1090_vm5, %v2427_v7 }
 0x893   :  { %8346 = vmatmul.mubr.msk.f32.vlgmr.msra.gmra.mxu0 %vm1086_vm6, %v2105_v62  ;;  %8353 = vmatprep.subr.mxu0 %v9887_v0 }
 0x894   :  { %8354 = vmatpush3.msk.msra.mxu0 %vm1090_vm5, %v2573_v8  ;;  %8355 = vmatprep.mubr.msk.f32.mxu0 %vm9888_vm0, %v9887_v0 }
 0x895   :  { %v2648_v9 = vpop.permute.xlu1 %2647  ;;  %8363 = vmatprep.subr.mxu0 %v9887_v0 }
 0x896   :  { %8359 = vmatpush3.msk.msra.mxu1 %vm1090_vm5, %v2648_v9 }
 0x897   :  { %8356 = vmatmul.mubr.msk.f32.vlgmr.msra.gmra.mxu0 %vm1086_vm6, %v2107_v4  ;;  %8361 = vmatmul.mubr.msk.f32.vlgmr.msra.gmra.mxu1 %vm1086_vm6, %v2109_v3 }
 0x898   :  { %8382 = vmatprep.subr.mxu1 %v9887_v0  ;;  %8379 = vmatprep.mubr.msk.f32.mxu0 %vm9888_vm0, %v9887_v0 }
 0x899   :  { %8398 = vmatprep.mubr.msk.f32.mxu1 %vm9888_vm0, %v9887_v0  ;;  %8364 = vmatpush3.msk.msra.mxu0 %vm2764_vm11, %v7808_v43 }
 0x89a   :  { %v1084_v28 = vpop.permute.xlu0 %1083  ;;  %8383 = vmatpush3.msk.msra.mxu1 %vm2764_vm11, %v7808_v43  ;;  %8365 = vmatprep.subr.mxu0 %v9887_v0 }
 0x89b   :  { %v1161_v34 = vadd.f32 %v10348_v20, %v1084_v28  ;;  %8384 = vmatprep.subr.mxu1 %v9887_v0  ;;  %8366 = vmatpush3.msk.msra.mxu0 %vm2732_vm13, %v9891_v16  ;;  %v1234_v58 = vadd.f32 %v10355_v26, %v1084_v28 }
 0x89c   :  { %8385 = vmatpush3.msk.msra.mxu1 %vm2732_vm13, %v9891_v16  ;;  %8367 = vmatprep.subr.mxu0 %v9887_v0  ;;  %vm2760_vm13 = vcmask 465920  }
 0x89d   :  { %8386 = vmatprep.subr.mxu1 %v9887_v0  ;;  %8368 = vmatpush3.msk.msra.mxu0 %vm2731_vm14, %v9891_v16 }
 0x89e   :  { %8387 = vmatpush3.msk.msra.mxu1 %vm2731_vm14, %v9891_v16  ;;  %8369 = vmatprep.subr.mxu0 %v9887_v0  ;;  %vm2921_vm14 = vcmask 115712  }
 0x89f   :  { %8388 = vmatprep.subr.mxu1 %v9887_v0  ;;  %8370 = vmatpush3.msk.msra.mxu0 %vm2730_vm4, %v9891_v16 }
 0x8a0   :  { %8389 = vmatpush3.msk.msra.mxu1 %vm2730_vm4, %v9891_v16  ;;  %8371 = vmatprep.subr.mxu0 %v9887_v0 }
 0x8a1   :  { %8372 = vmatpush3.msk.msra.mxu0 %vm2729_vm7, %v9891_v16  ;;  %8390 = vmatprep.subr.mxu1 %v9887_v0 }
 0x8a2   :  { %v2422_v32 = vpop.permute.xlu1 %2421  ;;  %8373 = vmatprep.subr.mxu0 %v9887_v0  ;;  %8391 = vmatpush3.msk.msra.mxu1 %vm2729_vm7, %v9891_v16 }
 0x8a3   :  { %8374 = vmatpush3.msk.msra.mxu0 %vm2728_vm8, %v9891_v16  ;;  %8392 = vmatprep.subr.mxu1 %v9887_v0 }
 0x8a4   :  { %8375 = vmatprep.subr.mxu0 %v9887_v0  ;;  %8393 = vmatpush3.msk.msra.mxu1 %vm2728_vm8, %v9891_v16  ;;  %vm3137_vm8 = vcmask 121856  }
 0x8a5   :  { %8376 = vmatpush3.msk.msra.mxu0 %vm2727_vm10, %v9891_v16  ;;  %8394 = vmatprep.subr.mxu1 %v9887_v0 }
 0x8a6   :  { %8377 = vmatprep.subr.mxu0 %v9887_v0  ;;  %8395 = vmatpush3.msk.msra.mxu1 %vm2727_vm10, %v9891_v16 }
 0x8a7   :  { %8396 = vmatprep.subr.mxu1 %v9887_v0  ;;  %8378 = vmatpush3.msk.msra.mxu0 %vm2726_vm12, %v9891_v16 }
 0x8a8   :  { %8397 = vmatpush3.msk.msra.mxu1 %vm2726_vm12, %v9891_v16  ;;  %8401 = vmatprep.subr.mxu0 %v9887_v0 }
 0x8a9   :  { %8406 = vmatprep.subr.mxu1 %v9887_v0 }
 0x8d9   :  { %v2259_v10 = vpop.f32.mrf.mxu1 }
 0x8db   :  { %v8332_v12 = vpop.f32.mrf.mxu1 }
 0x94b   :  { %v2184_v14 = vpop.f32.mrf.mxu0 }
 0x94c   :  { %v2414_v17 = vpop.f32.mrf.mxu1  ;;  %v2260_v22 = vadd.f32 %v2259_v10, %v2184_v14 }
 0x94d   :  { %v8327_v21 = vpop.f32.mrf.mxu0 }
 0x94e   :  { %v8342_v23 = vpop.f32.mrf.mxu1 }
 0x94f   :  { %v2336_v24 = vpop.f32.mrf.mxu0 }
 0x950   :  { %v2340_v25 = vadd.f32 %v2336_v24, %v2260_v22  ;;  %v2568_v27 = vpop.f32.mrf.mxu1  ;;  %v658_v22 = vld [vmem:[#allocation23] sm:$0x3] }
 0x951   :  { %v8337_v29 = vpop.f32.mrf.mxu0 }
 0x952   :  { %v2418_v30 = vadd.f32 %v2414_v17, %v2340_v25  ;;  %v8352_v31 = vpop.f32.mrf.mxu1  ;;  %v659_v25 = vld [vmem:[#allocation25] sm:$0x3] }
 0x953   :  { %v2496_v33 = vpop.f32.mrf.mxu0 }
 0x954   :  { %v2424_v35 = vadd.f32 %v2422_v32, %v2418_v30  ;;  %v2569_v38 = vadd.f32 %v2568_v27, %v2496_v33 }
 0x955   :  { %v8347_v36 = vpop.f32.mrf.mxu0 }
 0x956   :  { %v2723_v39 = vadd.f32 %v2424_v35, %v1161_v34 }
 0x957   :  { %v2642_v40 = vpop.f32.mrf.mxu0  ;;  %v2717_v41 = vpop.f32.mrf.mxu1 }
 0x958   :  { %v2646_v42 = vadd.f32 %v2642_v40, %v2569_v38  ;;  %2751 = vrot.lane.b32.xlu0 %v2723_v39, %s9890_s5 }
 0x959   :  { %v8357_v20 = vpop.f32.mrf.mxu0  ;;  %v8362_v44 = vpop.f32.mrf.mxu1 }
 0x95a   :  { %v2721_v45 = vadd.f32 %v2717_v41, %v2646_v42  ;;  %v2975_v20 = vld [vmem:[#allocation26] sm:$0xf] }
 0x95c   :  { %v2722_v61 = vadd.f32 %v2721_v45, %v2422_v32 }
 0x95e   :  { %v2724_v63 = vadd.f32 %v2722_v61, %v1234_v58  ;;  %v7742_v58 = vsel %vm1264_vm15, 1.0, %v9887_v0 }
 0x960   :  { %2839 = vrot.lane.b32.xlu1 %v2724_v63, %s9890_s5 }
 0x9ca   :  { %v2752_v6 = vpop.permute.xlu0 %2751 }
 0x9cb   :  { %v2754_v11 = vmax.f32 %v2723_v39, %v2752_v6 }
 0x9cd   :  { %2756 = vrot.lane.b32.xlu0 %v2754_v11, %s9892_s10 }
 0x9d2   :  { %v2840_v13 = vpop.permute.xlu1 %2839 }
 0x9d3   :  { %v2842_v26 = vmax.f32 %v2724_v63, %v2840_v13  ;;  %v3130_v13 = vld [vmem:[#allocation29] sm:$0xf] }
 0x9d5   :  { %2844 = vrot.lane.b32.xlu1 %v2842_v26, %s9892_s10 }
 0xa3f   :  { %v2757_v46 = vpop.permute.xlu0 %2756 }
 0xa40   :  { %v2759_v47 = vmax.f32 %v2754_v11, %v2757_v46  ;;  %v3132_v46 = vld [vmem:[#allocation29 + $0x4] sm:$0xf] }
 0xa42   :  { %8380 = vmatmul.mubr.msk.f32.vlgmr.msra.gmra.mxu0 %vm2760_vm13, %v2759_v47 }
 0xa43   :  { %8403 = vmatprep.mubr.msk.f32.mxu0 %vm9888_vm0, %v9887_v0 }
 0xa47   :  { %v2845_v48 = vpop.permute.xlu1 %2844 }
 0xa48   :  { %v2847_v49 = vmax.f32 %v2842_v26, %v2845_v48 }
 0xa4a   :  { %8399 = vmatmul.mubr.msk.f32.vlgmr.msra.gmra.mxu1 %vm2760_vm13, %v2847_v49  ;;  %v3136_v49 = vld [vmem:[#allocation29 + $0xc] sm:$0xf] }
 0xa4b   :  { %8408 = vmatprep.mubr.msk.f32.mxu1 %vm9888_vm0, %v9887_v0 }
 0xb02   :  { %v2834_v50 = vpop.f32.mrf.mxu0 }
 0xb03   :  { %v2922_v52 = vsel %vm2921_vm14, %v2834_v50, 0.0  ;;  %v2925_v53 = vmul.f32 %v2834_v50, %v2834_v50 }
 0xb04   :  { %2923 = vadd.xlane.f32.xlu0 %v2922_v52  ;;  %v8381_v54 = vpop.f32.mrf.mxu0 }
 0xb05   :  { %v2926_v55 = vsel %vm2921_vm14, %v2925_v53, 0.0 }
 0xb08   :  { %2927 = vadd.xlane.f32.xlu0 %v2926_v55 }
 0xb0a   :  { %v2917_v51 = vpop.f32.mrf.mxu1 }
 0xb0b   :  { %v2929_v56 = vsel %vm2921_vm14, %v2917_v51, 0.0  ;;  %v2933_v60 = vmul.f32 %v2917_v51, %v2917_v51 }
 0xb0c   :  { %2930 = vadd.xlane.f32.xlu1 %v2929_v56  ;;  %v8400_v62 = vpop.f32.mrf.mxu1 }
 0xb0d   :  { %v2934_v1 = vsel %vm2921_vm14, %v2933_v60, 0.0  ;;  %vm4963_vm14 = vcmask 1042432  }
 0xb0e   :  { %2935 = vadd.xlane.f32.xlu0 %v2934_v1 }
 0xb8d   :  { %v2924_v2 = vpop.xlane.xlu0 %2923 }
 0xb91   :  { %v2928_v3 = vpop.xlane.xlu0 %2927 }
 0xb95   :  { %v2931_v4 = vpop.xlane.xlu1 %2930 }
 0xb96   :  { %v2932_v5 = vadd.f32 %v2931_v4, %v2924_v2 }
 0xb97   :  { %v2936_v7 = vpop.xlane.xlu0 %2935 }
 0xb98   :  { %v2939_v8 = vmul.f32 0.033333335, %v2932_v5  ;;  %v2937_v9 = vadd.f32 %v2936_v7, %v2928_v3  ;;  %v661_v7 = vld [vmem:[#allocation31] sm:$0xf] }
 0xb9a   :  { %v2941_v10 = vmul.f32 %v2939_v8, %v2939_v8  ;;  %v2940_v12 = vmul.f32 0.033333335, %v2937_v9 }
 0xb9c   :  { %v2942_v14 = vsub.f32 %v2940_v12, %v2941_v10 }
 0xb9e   :  { %v2943_v17 = vmax.f32 %v2942_v14, 0.0 }
 0xba0   :  { %v2944_v21 = vadd.f32 1e-05, %v2943_v17 }
 0xba2   :  { %8929 = vrsqrt.f32 %v2944_v21 }
 0xbaf   :  { %v8930_v23 = vpop.eup %8929 }
 0xbb0   :  { %v2946_v24 = vmul.f32 %v8930_v23, %v658_v22 }
 0xbb2   :  { %2951 = vperm.xlu1 %8915, %v2946_v24   ;;  %v2947_v27 = vmul.f32 %v2946_v24, %v2939_v8 }
 0xbb4   :  { %v2948_v28 = vsub.f32 %v659_v25, %v2947_v27 }
 0xbb6   :  { %2957 = vperm.xlu0 %8916, %v2948_v28  }
 0xc2d   :  { %v2952_v29 = vpop.permute.xlu1 %2951 }
 0xc2e   :  { %v2954_v30 = vmul.f32 %v2952_v29, %v2834_v50  ;;  %v2967_v31 = vmul.f32 %v2952_v29, %v2917_v51  ;;  %v3134_v50 = vld [vmem:[#allocation29 + $0x8] sm:$0xf] }
 0xc31   :  { %v2958_v32 = vpop.permute.xlu0 %2957 }
 0xc32   :  { %v2960_v33 = vadd.f32 %v2958_v32, %v2954_v30  ;;  %v2968_v34 = vadd.f32 %v2967_v31, %v2958_v32 }
 0xc34   :  { %v2962_v35 = vmin.f32 %v2960_v33, 0.0  ;;  %v2970_v36 = vmin.f32 %v2968_v34, 0.0  ;;  %vm2961_vm4 = vcmp.gt.f32.partialorder %v2960_v33, 0.0  ;;  %vm2969_vm7 = vcmp.gt.f32.partialorder %v2968_v34, 0.0 }
 0xc36   :  { %v2963_v38 = vmul.f32 1.442695, %v2962_v35  ;;  %v2971_v39 = vmul.f32 1.442695, %v2970_v36 }
 0xc38   :  { %8931 = vpow2.f32 %v2963_v38 }
 0xc39   :  { %8933 = vpow2.f32 %v2971_v39 }
 0xc45   :  { %v8932_v40 = vpop.eup %8931 }
 0xc46   :  { %v8934_v41 = vpop.eup %8933  ;;  %v7827_v42 = vadd.f32 -1.0, %v8932_v40 }
 0xc47   :  { %v7828_v43 = vadd.f32 -1.0, %v8934_v41 }
 0xc48   :  { %v2966_v44 = vsel %vm2961_vm4, %v2960_v33, %v7827_v42  ;;  %vm4960_vm4 = vcmask 23552  }
 0xc49   :  { %8402 = vmatpush3.msk.msra.mxu0 %vm1090_vm5, %v2966_v44  ;;  %v2974_v45 = vsel %vm2969_vm7, %v2968_v34, %v7828_v43  ;;  %vm5476_vm7 = vcmask 64512  }
 0xc4a   :  { %8407 = vmatpush3.msk.msra.mxu1 %vm1090_vm5, %v2974_v45  ;;  %8404 = vmatmul.mubr.msk.f32.vlgmr.msra.gmra.mxu0 %vm1086_vm6, %v2975_v20 }
 0xc4b   :  { %8411 = vmatprep.subr.mxu0 %v9887_v0  ;;  %8415 = vmatprep.mubr.msk.f32.mxu0 %vm9888_vm0, %v9887_v0 }
 0xc4c   :  { %8412 = vmatpush3.msk.msra.mxu0 %vm1290_vm9, %v7742_v58  ;;  %8409 = vmatmul.mubr.msk.f32.vlgmr.msra.gmra.mxu1 %vm1086_vm6, %v2975_v20 }
 0xc4d   :  { %8413 = vmatprep.subr.mxu0 %v9887_v0  ;;  %8418 = vmatprep.subr.mxu1 %v9887_v0 }
 0xc4e   :  { %8414 = vmatpush3.msk.msra.mxu0 %vm1263_vm3, %v9891_v16  ;;  %8420 = vmatprep.mubr.msk.f32.mxu1 %vm9888_vm0, %v9887_v0 }
 0xc4f   :  { %8416 = vmatmul.mubr.msk.f32.vlgmr.msra.gmra.mxu0 %vm3137_vm8, %v2966_v44  ;;  %8423 = vmatprep.subr.mxu0 %v9887_v0 }
 0xc50   :  { %8425 = vmatprep.mubr.msk.f32.mxu0 %vm9888_vm0, %v9887_v0 }
 0xd0a   :  { %v10546_v18 = vpop.f32.mrf.mxu0 }
 0xd0c   :  { %v8405_v61 = vpop.f32.mrf.mxu0  ;;  %v10548_v63 = vpop.f32.mrf.mxu1 }
 0xd0e   :  { %v8410_v6 = vpop.f32.mrf.mxu1 }
 0xd0f   :  { %v3209_v11 = vpop.f32.mrf.mxu0 }
 0xd10   :  { %3444 = vrot.lane.b32.xlu0 %v3209_v11, %s9893_s11  ;;  %3214 = vrot.lane.b32.xlu1 %v3209_v11, %s9890_s5 }
 0xd11   :  { %8424 = vmatpush3.msk.msra.mxu0 %vm1090_vm5, %v3209_v11  ;;  %v8417_v26 = vpop.f32.mrf.mxu0 }
 0xd12   :  { %8433 = vmatprep.subr.mxu0 %v9887_v0  ;;  %8426 = vmatmul.mubr.msk.f32.vlgmr.msra.gmra.mxu0 %vm1086_vm6, %v3130_v13  ;;  %v662_v26 = vld [vmem:[#allocation32] sm:$0xf] }
 0xd13   :  { %8435 = vmatprep.mubr.msk.f32.mxu0 %vm9888_vm0, %v9887_v0 }
 0xd14   :  { %3366 = vrot.lane.b32.xlu1 %v3209_v11, %s9892_s10 }
 0xd82   :  { %v3445_v47 = vpop.permute.xlu0 %3444  ;;  %v3215_v48 = vpop.permute.xlu1 %3214 }
 0xd83   :  { %8419 = vmatpush3.msk.msra.mxu1 %vm1090_vm5, %v3215_v48  ;;  %8434 = vmatpush3.msk.msra.mxu0 %vm1090_vm5, %v3445_v47  ;;  %v663_v48 = vld [vmem:[#allocation34] sm:$0xf] }
 0xd84   :  { %8421 = vmatmul.mubr.msk.f32.vlgmr.msra.gmra.mxu1 %vm1086_vm6, %v3132_v46  ;;  %8428 = vmatprep.subr.mxu1 %v9887_v0 }
 0xd85   :  { %8430 = vmatprep.mubr.msk.f32.mxu1 %vm9888_vm0, %v9887_v0  ;;  %8436 = vmatmul.mubr.msk.f32.vlgmr.msra.gmra.mxu0 %vm1086_vm6, %v3136_v49 }
 0xd86   :  { %v3367_v52 = vpop.permute.xlu1 %3366  ;;  %8445 = vmatprep.subr.mxu0 %v9887_v0  ;;  %8447 = vmatprep.mubr.msk.f32.mxu0 %vm9888_vm0, %v9887_v0 }
 0xd87   :  { %8429 = vmatpush3.msk.msra.mxu1 %vm1090_vm5, %v3367_v52 }
 0xd88   :  { %8431 = vmatmul.mubr.msk.f32.vlgmr.msra.gmra.mxu1 %vm1086_vm6, %v3134_v50  ;;  %8438 = vmatprep.subr.mxu1 %v9887_v0 }
 0xd89   :  { %8439 = vmatpush3.msk.msra.mxu1 %vm1290_vm9, %v7742_v58  ;;  %8442 = vmatprep.mubr.msk.f32.mxu1 %vm9888_vm0, %v9887_v0  ;;  %vm3898_vm9 = vcmask 142336  }
 0xd8a   :  { %8440 = vmatprep.subr.mxu1 %v9887_v0 }
 0xd8b   :  { %8441 = vmatpush3.msk.msra.mxu1 %vm1263_vm3, %v9891_v16  ;;  %vm4584_vm3 = vcmask 72704  }
 0xd8c   :  { %8443 = vmatmul.mubr.msk.f32.vlgmr.msra.gmra.mxu1 %vm3137_vm8, %v2974_v45  ;;  %8450 = vmatprep.subr.mxu1 %v9887_v0 }
 0xd8d   :  { %8452 = vmatprep.mubr.msk.f32.mxu1 %vm9888_vm0, %v9887_v0 }
 0xdd2   :  { %v3362_v53 = vpop.f32.mrf.mxu0 }
 0xdd4   :  { %v8427_v54 = vpop.f32.mrf.mxu0 }
 0xe44   :  { %v3287_v55 = vpop.f32.mrf.mxu1 }
 0xe45   :  { %v3517_v51 = vpop.f32.mrf.mxu0  ;;  %v3363_v60 = vadd.f32 %v3362_v53, %v3287_v55 }
 0xe46   :  { %v8422_v56 = vpop.f32.mrf.mxu1 }
 0xe47   :  { %v8437_v62 = vpop.f32.mrf.mxu0 }
 0xe48   :  { %v3439_v1 = vpop.f32.mrf.mxu1 }
 0xe49   :  { %v3443_v2 = vadd.f32 %v3439_v1, %v3363_v60 }
 0xe4a   :  { %v8432_v3 = vpop.f32.mrf.mxu1 }
 0xe4b   :  { %v3521_v4 = vadd.f32 %v3517_v51, %v3443_v2 }
 0xe4c   :  { %v3596_v19 = vpop.f32.mrf.mxu1 }
 0xe4d   :  { %3747 = vrot.lane.b32.xlu0 %v3596_v19, %s9892_s10  ;;  %3601 = vrot.lane.b32.xlu1 %v3596_v19, %s9890_s5 }
 0xe4e   :  { %8451 = vmatpush3.msk.msra.mxu1 %vm1090_vm5, %v3596_v19  ;;  %v8444_v5 = vpop.f32.mrf.mxu1 }
 0xe4f   :  { %8453 = vmatmul.mubr.msk.f32.vlgmr.msra.gmra.mxu1 %vm1086_vm6, %v3130_v13  ;;  %8460 = vmatprep.subr.mxu1 %v9887_v0 }
 0xe50   :  { %8462 = vmatprep.mubr.msk.f32.mxu1 %vm9888_vm0, %v9887_v0 }
 0xe51   :  { %3524 = vperm.xlu0 %8916, %v661_v7   ;;  %3822 = vrot.lane.b32.xlu1 %v3596_v19, %s9893_s11 }
 0xebf   :  { %v3602_v8 = vpop.permute.xlu1 %3601  ;;  %v3748_v9 = vpop.permute.xlu0 %3747 }
 0xec0   :  { %8446 = vmatpush3.msk.msra.mxu0 %vm1090_vm5, %v3602_v8  ;;  %v3952_v8 = vld [vmem:[#allocation35] sm:$0xf] }
 0xec1   :  { %8448 = vmatmul.mubr.msk.f32.vlgmr.msra.gmra.mxu0 %vm1086_vm6, %v3132_v46  ;;  %8455 = vmatprep.subr.mxu0 %v9887_v0 }
 0xec2   :  { %8456 = vmatpush3.msk.msra.mxu0 %vm1090_vm5, %v3748_v9  ;;  %8457 = vmatprep.mubr.msk.f32.mxu0 %vm9888_vm0, %v9887_v0 }
 0xec3   :  { %v3823_v10 = vpop.permute.xlu1 %3822  ;;  %8465 = vmatprep.subr.mxu0 %v9887_v0 }
 0xec4   :  { %8461 = vmatpush3.msk.msra.mxu1 %vm1090_vm5, %v3823_v10  ;;  %v660_v10 = vld [vmem:[#allocation28] sm:$0xf] }
 0xec5   :  { %8458 = vmatmul.mubr.msk.f32.vlgmr.msra.gmra.mxu0 %vm1086_vm6, %v3134_v50  ;;  %8463 = vmatmul.mubr.msk.f32.vlgmr.msra.gmra.mxu1 %vm1086_vm6, %v3136_v49 }
 0xec6   :  { %8470 = vmatprep.subr.mxu1 %v9887_v0  ;;  %8467 = vmatprep.mubr.msk.f32.mxu0 %vm9888_vm0, %v9887_v0 }
 0xec7   :  { %8472 = vmatprep.mubr.msk.f32.mxu1 %vm9888_vm0, %v9887_v0 }
 0xecc   :  { %v3525_v12 = vpop.permute.xlu0 %3524 }
 0xecd   :  { %v3527_v14 = vadd.f32 %v3525_v12, %v3521_v4 }
 0xecf   :  { %v3899_v17 = vsel %vm3898_vm9, %v3527_v14, 0.0  ;;  %v3902_v36 = vmul.f32 %v3527_v14, %v3527_v14 }
 0xed0   :  { %3900 = vadd.xlane.f32.xlu1 %v3899_v17 }
 0xed1   :  { %v3903_v39 = vsel %vm3898_vm9, %v3902_v36, 0.0 }
 0xf0f   :  { %v3743_v21 = vpop.f32.mrf.mxu1 }
 0xf11   :  { %v8454_v22 = vpop.f32.mrf.mxu1 }
 0xf12   :  { %v3956_v22 = vld [vmem:[#allocation35 + $0x8] sm:$0xf] }
 0xf59   :  { %v3901_v40 = vpop.xlane.xlu1 %3900 }
 0xf81   :  { %v3671_v23 = vpop.f32.mrf.mxu0 }
 0xf82   :  { %v3744_v25 = vadd.f32 %v3743_v21, %v3671_v23  ;;  %v3958_v23 = vld [vmem:[#allocation35 + $0xc] sm:$0xf] }
 0xf83   :  { %v8449_v24 = vpop.f32.mrf.mxu0 }
 0xf85   :  { %v3817_v27 = vpop.f32.mrf.mxu0  ;;  %v3892_v28 = vpop.f32.mrf.mxu1 }
 0xf86   :  { %v3821_v29 = vadd.f32 %v3817_v27, %v3744_v25 }
 0xf87   :  { %v8459_v30 = vpop.f32.mrf.mxu0  ;;  %v8464_v31 = vpop.f32.mrf.mxu1 }
 0xf88   :  { %v3896_v32 = vadd.f32 %v3892_v28, %v3821_v29 }
 0xf8a   :  { %v3897_v33 = vadd.f32 %v3896_v32, %v3525_v12  ;;  %v664_v12 = vld [vmem:[#allocation37] sm:$0xf] }
 0xf8c   :  { %v3906_v34 = vsel %vm3898_vm9, %v3897_v33, 0.0  ;;  %v3910_v35 = vmul.f32 %v3897_v33, %v3897_v33 }
 0xf8d   :  { %3907 = vadd.xlane.f32.xlu0 %v3906_v34 }
 0xf8e   :  { %v3911_v38 = vsel %vm3898_vm9, %v3910_v35, 0.0 }
 0xf8f   :  { %3912 = vadd.xlane.f32.xlu1 %v3911_v38 }
 0xf91   :  { %3904 = vadd.xlane.f32.xlu0 %v3903_v39 }
0x1016   :  { %v3908_v41 = vpop.xlane.xlu0 %3907 }
0x1017   :  { %v3909_v42 = vadd.f32 %v3908_v41, %v3901_v40 }
0x1018   :  { %v3913_v20 = vpop.xlane.xlu1 %3912 }
0x1019   :  { %v3916_v43 = vmul.f32 0.027777778, %v3909_v42 }
0x101a   :  { %v3905_v44 = vpop.xlane.xlu0 %3904 }
0x101b   :  { %v3914_v45 = vadd.f32 %v3913_v20, %v3905_v44  ;;  %v3918_v58 = vmul.f32 %v3916_v43, %v3916_v43 }
0x101d   :  { %v3917_v61 = vmul.f32 0.027777778, %v3914_v45 }
0x101f   :  { %v3919_v6 = vsub.f32 %v3917_v61, %v3918_v58  ;;  %v7802_v61 = vsel %vm2727_vm10, 1.0, %v9887_v0 }
0x1021   :  { %v3920_v11 = vmax.f32 %v3919_v6, 0.0 }
0x1023   :  { %v3921_v13 = vadd.f32 1e-05, %v3920_v11 }
0x1025   :  { %8935 = vrsqrt.f32 %v3921_v13 }
0x1032   :  { %v8936_v46 = vpop.eup %8935 }
0x1033   :  { %v3923_v47 = vmul.f32 %v8936_v46, %v662_v26 }
0x1035   :  { %3928 = vperm.xlu0 %8916, %v3923_v47   ;;  %v3924_v49 = vmul.f32 %v3923_v47, %v3916_v43 }
0x1037   :  { %v3925_v50 = vsub.f32 %v663_v48, %v3924_v49 }
0x1039   :  { %3934 = vperm.xlu1 %8915, %v3925_v50  }
0x10b0   :  { %v3929_v52 = vpop.permute.xlu0 %3928 }
0x10b1   :  { %v3931_v53 = vmul.f32 %v3929_v52, %v3527_v14  ;;  %v3944_v54 = vmul.f32 %v3929_v52, %v3897_v33  ;;  %v3954_v14 = vld [vmem:[#allocation35 + $0x4] sm:$0xf] }
0x10b4   :  { %v3935_v55 = vpop.permute.xlu1 %3934 }
0x10b5   :  { %v3937_v51 = vadd.f32 %v3935_v55, %v3931_v53  ;;  %v3945_v56 = vadd.f32 %v3944_v54, %v3935_v55 }
0x10b7   :  { %v3939_v60 = vmin.f32 %v3937_v51, 0.0  ;;  %v3947_v62 = vmin.f32 %v3945_v56, 0.0  ;;  %vm3938_vm6 = vcmp.gt.f32.partialorder %v3937_v51, 0.0  ;;  %vm3946_vm15 = vcmp.gt.f32.partialorder %v3945_v56, 0.0 }
0x10b9   :  { %v3940_v1 = vmul.f32 1.442695, %v3939_v60  ;;  %v3948_v2 = vmul.f32 1.442695, %v3947_v62 }
0x10bb   :  { %8937 = vpow2.f32 %v3940_v1 }
0x10bc   :  { %8939 = vpow2.f32 %v3948_v2 }
0x10c8   :  { %v8938_v3 = vpop.eup %8937 }
0x10c9   :  { %v8940_v4 = vpop.eup %8939  ;;  %v7855_v19 = vadd.f32 -1.0, %v8938_v3 }
0x10ca   :  { %v7856_v7 = vadd.f32 -1.0, %v8940_v4 }
0x10cb   :  { %v3943_v5 = vsel %vm3938_vm6, %v3937_v51, %v7855_v19  ;;  %vm6419_vm6 = vcmask 818176  }
0x10cc   :  { %4112 = vrot.lane.b32.xlu0 %v3943_v5, %s9892_s10  ;;  %3960 = vrot.lane.b32.xlu1 %v3943_v5, %s9890_s5  ;;  %v3951_v9 = vsel %vm3946_vm15, %v3945_v56, %v7856_v7  ;;  %vm6497_vm15 = vcmask 408576  }
0x10cd   :  { %8471 = vmatpush3.msk.msra.mxu1 %vm724_vm1, %v3943_v5 }
0x10ce   :  { %8473 = vmatmul.mubr.msk.f32.vlgmr.msra.gmra.mxu1 %vm720_vm2, %v3952_v8  ;;  %8480 = vmatprep.subr.mxu1 %v9887_v0 }
0x10cf   :  { %8482 = vmatprep.mubr.msk.f32.mxu1 %vm9888_vm0, %v9887_v0 }
0x10d0   :  { %4190 = vrot.lane.b32.xlu1 %v3943_v5, %s9893_s11  ;;  %4275 = vrot.lane.b32.xlu0 %v3951_v9, %s9890_s5 }
0x10d4   :  { %4421 = vrot.lane.b32.xlu1 %v3951_v9, %s9892_s10  ;;  %4496 = vrot.lane.b32.xlu0 %v3951_v9, %s9893_s11 }
0x10d8   :  { %2978 = vperm.xlu1 %8915, %v660_v10   ;;  %4270 = vperm.xlu0 %8916, %v664_v12  }
0x113e   :  { %v4113_v17 = vpop.permute.xlu0 %4112  ;;  %v3961_v21 = vpop.permute.xlu1 %3960 }
0x113f   :  { %8466 = vmatpush3.msk.msra.mxu0 %vm724_vm1, %v3961_v21 }
0x1140   :  { %8468 = vmatmul.mubr.msk.f32.vlgmr.msra.gmra.mxu0 %vm720_vm2, %v3954_v14  ;;  %8475 = vmatprep.subr.mxu0 %v9887_v0 }
0x1141   :  { %8476 = vmatpush3.msk.msra.mxu0 %vm724_vm1, %v4113_v17  ;;  %8477 = vmatprep.mubr.msk.f32.mxu0 %vm9888_vm0, %v9887_v0 }
0x1142   :  { %v4191_v24 = vpop.permute.xlu1 %4190  ;;  %v4276_v25 = vpop.permute.xlu0 %4275  ;;  %8485 = vmatprep.subr.mxu0 %v9887_v0 }
0x1143   :  { %8481 = vmatpush3.msk.msra.mxu1 %vm724_vm1, %v4191_v24 }
0x1144   :  { %8478 = vmatmul.mubr.msk.f32.vlgmr.msra.gmra.mxu0 %vm720_vm2, %v3956_v22  ;;  %8483 = vmatmul.mubr.msk.f32.vlgmr.msra.gmra.mxu1 %vm720_vm2, %v3958_v23 }
0x1145   :  { %8486 = vmatpush3.msk.msra.mxu0 %vm724_vm1, %v4276_v25  ;;  %8490 = vmatprep.subr.mxu1 %v9887_v0 }
0x1146   :  { %8491 = vmatpush3.msk.msra.mxu1 %vm724_vm1, %v3951_v9  ;;  %v4422_v27 = vpop.permute.xlu1 %4421  ;;  %8487 = vmatprep.mubr.msk.f32.mxu0 %vm9888_vm0, %v9887_v0  ;;  %v4497_v28 = vpop.permute.xlu0 %4496 }
0x1147   :  { %8492 = vmatprep.mubr.msk.f32.mxu1 %vm9888_vm0, %v9887_v0  ;;  %8495 = vmatprep.subr.mxu0 %v9887_v0 }
0x1148   :  { %8500 = vmatprep.subr.mxu1 %v9887_v0  ;;  %8488 = vmatmul.mubr.msk.f32.vlgmr.msra.gmra.mxu0 %vm720_vm2, %v3954_v14 }
0x1149   :  { %8493 = vmatmul.mubr.msk.f32.vlgmr.msra.gmra.mxu1 %vm720_vm2, %v3952_v8  ;;  %8496 = vmatpush3.msk.msra.mxu0 %vm724_vm1, %v4422_v27 }
0x114a   :  { %8501 = vmatpush3.msk.msra.mxu1 %vm724_vm1, %v4497_v28  ;;  %8497 = vmatprep.mubr.msk.f32.mxu0 %vm9888_vm0, %v9887_v0 }
0x114b   :  { %8502 = vmatprep.mubr.msk.f32.mxu1 %vm9888_vm0, %v9887_v0  ;;  %8505 = vmatprep.subr.mxu0 %v9887_v0 }
0x114c   :  { %8498 = vmatmul.mubr.msk.f32.vlgmr.msra.gmra.mxu0 %vm720_vm2, %v3956_v22  ;;  %8512 = vmatprep.subr.mxu1 %v9887_v0 }
0x114d   :  { %8503 = vmatmul.mubr.msk.f32.vlgmr.msra.gmra.mxu1 %vm720_vm2, %v3958_v23  ;;  %8509 = vmatprep.mubr.msk.f32.mxu0 %vm9888_vm0, %v9887_v0 }
0x114e   :  { %8516 = vmatprep.mubr.msk.f32.mxu1 %vm9888_vm0, %v9887_v0  ;;  %8506 = vmatpush3.msk.msra.mxu0 %vm2764_vm11, %v7802_v61 }
0x114f   :  { %8513 = vmatpush3.msk.msra.mxu1 %vm2764_vm11, %v7802_v61  ;;  %8507 = vmatprep.subr.mxu0 %v9887_v0  ;;  %vm4744_vm11 = vcmask 19456  }
0x1150   :  { %8514 = vmatprep.subr.mxu1 %v9887_v0  ;;  %8508 = vmatpush3.msk.msra.mxu0 %vm2726_vm12, %v9891_v16 }
0x1151   :  { %8515 = vmatpush3.msk.msra.mxu1 %vm2726_vm12, %v9891_v16  ;;  %8519 = vmatprep.subr.mxu0 %v9887_v0 }
0x1152   :  { %8524 = vmatprep.subr.mxu1 %v9887_v0 }
0x1153   :  { %v2979_v36 = vpop.permute.xlu1 %2978  ;;  %v4271_v42 = vpop.permute.xlu0 %4270 }
0x1154   :  { %v3054_v20 = vadd.f32 %v10546_v18, %v2979_v36  ;;  %v3127_v49 = vadd.f32 %v10548_v63, %v2979_v36 }
0x118e   :  { %v4108_v29 = vpop.f32.mrf.mxu1 }
0x1190   :  { %v8474_v30 = vpop.f32.mrf.mxu1 }
0x1200   :  { %v4033_v31 = vpop.f32.mrf.mxu0 }
0x1201   :  { %v4109_v33 = vadd.f32 %v4108_v29, %v4033_v31  ;;  %v665_v29 = vld [vmem:[#allocation38] sm:$0xf] }
0x1202   :  { %v8469_v32 = vpop.f32.mrf.mxu0 }
0x1203   :  { %v666_v32 = vld [vmem:[%s11168_s12] sm:$0xf] }
0x1204   :  { %v4185_v34 = vpop.f32.mrf.mxu0  ;;  %v4263_v35 = vpop.f32.mrf.mxu1 }
0x1205   :  { %v4189_v38 = vadd.f32 %v4185_v34, %v4109_v33 }
0x1206   :  { %v8479_v39 = vpop.f32.mrf.mxu0  ;;  %v8484_v40 = vpop.f32.mrf.mxu1 }
0x1207   :  { %v4267_v41 = vadd.f32 %v4263_v35, %v4189_v38 }
0x1208   :  { %v4345_v43 = vpop.f32.mrf.mxu0 }
0x1209   :  { %v4273_v44 = vadd.f32 %v4271_v42, %v4267_v41  ;;  %v4417_v45 = vpop.f32.mrf.mxu1 }
0x120a   :  { %v8489_v58 = vpop.f32.mrf.mxu0  ;;  %v4418_v6 = vadd.f32 %v4417_v45, %v4345_v43  ;;  %v4956_v45 = vadd.s32 1, %v10220_v57 }
0x120b   :  { %v8494_v11 = vpop.f32.mrf.mxu1  ;;  %v4572_v13 = vadd.f32 %v4273_v44, %v3054_v20 }
0x120c   :  { %v4491_v26 = vpop.f32.mrf.mxu0  ;;  %vm4957_vm10 = vcmp.eq.s32.totalorder %v10225_v59, %v4956_v45 }
0x120d   :  { %v4495_v18 = vadd.f32 %v4491_v26, %v4418_v6  ;;  %v4566_v46 = vpop.f32.mrf.mxu1  ;;  %4575 = vrot.lane.b32.xlu1 %v4572_v13, %s9890_s5 }
0x120e   :  { %v8499_v15 = vpop.f32.mrf.mxu0 }
0x120f   :  { %v4570_v47 = vadd.f32 %v4566_v46, %v4495_v18  ;;  %v8504_v48 = vpop.f32.mrf.mxu1  ;;  %v7885_v46 = vsel %vm4957_vm10, 1.0, %v9887_v0  ;;  %v4953_v15 = vld [vmem:[#allocation43] sm:$0xff] }
0x1211   :  { %v4571_v50 = vadd.f32 %v4570_v47, %v4271_v42 }
0x1213   :  { %v4573_v52 = vadd.f32 %v4571_v50, %v3127_v49  ;;  %v668_v50 = vld [vmem:[#allocation44] sm:$0xff] }
0x1215   :  { %4662 = vrot.lane.b32.xlu0 %v4573_v52, %s9890_s5 }
0x127f   :  { %v4576_v53 = vpop.permute.xlu1 %4575 }
0x1280   :  { %v4578_v54 = vmax.f32 %v4572_v13, %v4576_v53  ;;  %v4798_v13 = vld [vmem:[#allocation40] sm:$0xff]  ;;  %v4955_v53 = vld [vmem:[#allocation43 + $0x8] sm:$0xff] }
0x1282   :  { %4580 = vrot.lane.b32.xlu1 %v4578_v54, %s9892_s10 }
0x1287   :  { %v4663_v55 = vpop.permute.xlu0 %4662 }
0x1288   :  { %v4665_v51 = vmax.f32 %v4573_v52, %v4663_v55 }
0x128a   :  { %4667 = vrot.lane.b32.xlu0 %v4665_v51, %s9892_s10 }
0x12f4   :  { %v4581_v16 = vpop.permute.xlu1 %4580 }
0x12f5   :  { %v4583_v37 = vmax.f32 %v4578_v54, %v4581_v16 }
0x12f7   :  { %8510 = vmatmul.mubr.msk.f32.vlgmr.msra.gmra.mxu0 %vm4584_vm3, %v4583_v37 }
0x12f8   :  { %8521 = vmatprep.mubr.msk.f32.mxu0 %vm9888_vm0, %v9887_v0 }
0x12fc   :  { %v4668_v63 = vpop.permute.xlu0 %4667 }
0x12fd   :  { %v4670_v56 = vmax.f32 %v4665_v51, %v4668_v63 }
0x12ff   :  { %8517 = vmatmul.mubr.msk.f32.vlgmr.msra.gmra.mxu1 %vm4584_vm3, %v4670_v56 }
0x1300   :  { %8526 = vmatprep.mubr.msk.f32.mxu1 %vm9888_vm0, %v9887_v0 }
0x13b7   :  { %v4657_v60 = vpop.f32.mrf.mxu0 }
0x13b8   :  { %v4745_v62 = vsel %vm4744_vm11, %v4657_v60, 0.0  ;;  %v4748_v19 = vmul.f32 %v4657_v60, %v4657_v60 }
0x13b9   :  { %4746 = vadd.xlane.f32.xlu1 %v4745_v62  ;;  %v8511_v1 = vpop.f32.mrf.mxu0 }
0x13ba   :  { %v4749_v8 = vsel %vm4744_vm11, %v4748_v19, 0.0 }
0x13bf   :  { %v4740_v2 = vpop.f32.mrf.mxu1 }
0x13c0   :  { %v4752_v3 = vsel %vm4744_vm11, %v4740_v2, 0.0  ;;  %v4756_v4 = vmul.f32 %v4740_v2, %v4740_v2 }
0x13c1   :  { %4753 = vadd.xlane.f32.xlu0 %v4752_v3  ;;  %v8518_v5 = vpop.f32.mrf.mxu1 }
0x13c2   :  { %v4757_v7 = vsel %vm4744_vm11, %v4756_v4, 0.0 }
0x13c3   :  { %4758 = vadd.xlane.f32.xlu1 %v4757_v7 }
0x13c5   :  { %4750 = vadd.xlane.f32.xlu0 %v4749_v8 }
0x1442   :  { %v4747_v9 = vpop.xlane.xlu1 %4746 }
0x144a   :  { %v4754_v10 = vpop.xlane.xlu0 %4753 }
0x144b   :  { %v4755_v12 = vadd.f32 %v4754_v10, %v4747_v9 }
0x144c   :  { %v4759_v17 = vpop.xlane.xlu1 %4758 }
0x144d   :  { %v4762_v14 = vmul.f32 0.16666667, %v4755_v12 }
0x144e   :  { %v4751_v21 = vpop.xlane.xlu0 %4750 }
0x144f   :  { %v4760_v22 = vadd.f32 %v4759_v17, %v4751_v21  ;;  %v4764_v23 = vmul.f32 %v4762_v14, %v4762_v14 }
0x1451   :  { %v4763_v24 = vmul.f32 0.16666667, %v4760_v22 }
0x1453   :  { %v4765_v25 = vsub.f32 %v4763_v24, %v4764_v23 }
0x1455   :  { %v4766_v27 = vmax.f32 %v4765_v25, 0.0 }
0x1457   :  { %v4767_v28 = vadd.f32 1e-05, %v4766_v27 }
0x1459   :  { %8941 = vrsqrt.f32 %v4767_v28 }
0x1466   :  { %v8942_v30 = vpop.eup %8941 }
0x1467   :  { %v4769_v31 = vmul.f32 %v8942_v30, %v665_v29 }
0x1469   :  { %4774 = vperm.xlu0 %8916, %v4769_v31   ;;  %v4770_v33 = vmul.f32 %v4769_v31, %v4762_v14 }
0x146b   :  { %v4771_v34 = vsub.f32 %v666_v32, %v4770_v33 }
0x146d   :  { %4780 = vperm.xlu1 %8915, %v4771_v34  }
0x14e4   :  { %v4775_v35 = vpop.permute.xlu0 %4774 }
0x14e5   :  { %v4777_v36 = vmul.f32 %v4775_v35, %v4657_v60  ;;  %v4790_v38 = vmul.f32 %v4775_v35, %v4740_v2  ;;  %v669_v35 = vld [vmem:[#allocation46] sm:$0xff] }
0x14e8   :  { %v4781_v39 = vpop.permute.xlu1 %4780 }
0x14e9   :  { %v4783_v40 = vadd.f32 %v4781_v39, %v4777_v36  ;;  %v4791_v41 = vadd.f32 %v4790_v38, %v4781_v39  ;;  %v670_v39 = vld [vmem:[#allocation47] sm:$0xff] }
0x14eb   :  { %v4785_v42 = vmin.f32 %v4783_v40, 0.0  ;;  %v4793_v43 = vmin.f32 %v4791_v41, 0.0  ;;  %vm4784_vm12 = vcmp.gt.f32.partialorder %v4783_v40, 0.0  ;;  %vm4792_vm13 = vcmp.gt.f32.partialorder %v4791_v41, 0.0 }
0x14ed   :  { %v4786_v20 = vmul.f32 1.442695, %v4785_v42  ;;  %v4794_v44 = vmul.f32 1.442695, %v4793_v43  ;;  %v671_v42 = vld [vmem:[#allocation49] sm:$0xff] }
0x14ef   :  { %8943 = vpow2.f32 %v4786_v20 }
0x14f0   :  { %8945 = vpow2.f32 %v4794_v44 }
0x14fc   :  { %v8944_v58 = vpop.eup %8943 }
0x14fd   :  { %v8946_v61 = vpop.eup %8945  ;;  %v7879_v6 = vadd.f32 -1.0, %v8944_v58 }
0x14fe   :  { %v7880_v11 = vadd.f32 -1.0, %v8946_v61 }
0x14ff   :  { %v4789_v26 = vsel %vm4784_vm12, %v4783_v40, %v7879_v6 }
0x1500   :  { %8520 = vmatpush3.msk.msra.mxu0 %vm724_vm1, %v4789_v26  ;;  %v4797_v18 = vsel %vm4792_vm13, %v4791_v41, %v7880_v11 }
0x1501   :  { %8525 = vmatpush3.msk.msra.mxu1 %vm724_vm1, %v4797_v18  ;;  %8522 = vmatmul.mubr.msk.f32.vlgmr.msra.gmra.mxu0 %vm720_vm2, %v4798_v13 }
0x1502   :  { %8529 = vmatprep.subr.mxu0 %v9887_v0  ;;  %8531 = vmatprep.mubr.msk.f32.mxu0 %vm9888_vm0, %v9887_v0 }
0x1503   :  { %8530 = vmatpush3.msk.msra.mxu0 %vm4963_vm14, %v7885_v46  ;;  %8527 = vmatmul.mubr.msk.f32.vlgmr.msra.gmra.mxu1 %vm720_vm2, %v4798_v13 }
0x1504   :  { %8539 = vmatprep.subr.mxu0 %v9887_v0  ;;  %8534 = vmatprep.subr.mxu1 %v9887_v0 }
0x1505   :  { %8532 = vmatmul.mubr.msk.f32.vlgmr.msra.gmra.mxu0 %vm4960_vm4, %v4789_v26  ;;  %8536 = vmatprep.mubr.msk.f32.mxu1 %vm9888_vm0, %v9887_v0 }
0x1506   :  { %8541 = vmatprep.mubr.msk.f32.mxu0 %vm9888_vm0, %v9887_v0 }
0x15c1   :  { %v10703_v57 = vpop.f32.mrf.mxu0 }
0x15c3   :  { %v8523_v59 = vpop.f32.mrf.mxu0  ;;  %v10705_v48 = vpop.f32.mrf.mxu1 }
0x15c5   :  { %v5033_v47 = vpop.f32.mrf.mxu0  ;;  %v8528_v52 = vpop.f32.mrf.mxu1 }
0x15c6   :  { %5038 = vrot.lane.b32.xlu1 %v5033_v47, %s9890_s5  ;;  %8540 = vmatpush3.msk.msra.mxu0 %vm724_vm1, %v5033_v47  ;;  %v667_v52 = vld [vmem:[#allocation41] sm:$0xff] }
0x15c7   :  { %v8533_v49 = vpop.f32.mrf.mxu0  ;;  %8542 = vmatmul.mubr.msk.f32.vlgmr.msra.gmra.mxu0 %vm720_vm2, %v4953_v15  ;;  %8549 = vmatprep.subr.mxu0 %v9887_v0 }
0x15c8   :  { %8551 = vmatprep.mubr.msk.f32.mxu0 %vm9888_vm0, %v9887_v0 }
0x15ca   :  { %5192 = vperm.xlu1 %8915, %v668_v50  }
0x1638   :  { %v5039_v54 = vpop.permute.xlu1 %5038 }
0x1639   :  { %8535 = vmatpush3.msk.msra.mxu1 %vm724_vm1, %v5039_v54 }
0x163a   :  { %8537 = vmatmul.mubr.msk.f32.vlgmr.msra.gmra.mxu1 %vm720_vm2, %v4955_v53  ;;  %8544 = vmatprep.subr.mxu1 %v9887_v0 }
0x163b   :  { %8545 = vmatpush3.msk.msra.mxu1 %vm4963_vm14, %v7885_v46  ;;  %8546 = vmatprep.mubr.msk.f32.mxu1 %vm9888_vm0, %v9887_v0 }
0x163c   :  { %8554 = vmatprep.subr.mxu1 %v9887_v0 }
0x163e   :  { %8547 = vmatmul.mubr.msk.f32.vlgmr.msra.gmra.mxu1 %vm4960_vm4, %v4797_v18 }
0x163f   :  { %8556 = vmatprep.mubr.msk.f32.mxu1 %vm9888_vm0, %v9887_v0 }
0x1645   :  { %v5193_v62 = vpop.permute.xlu1 %5192 }
0x1687   :  { %v5186_v55 = vpop.f32.mrf.mxu0 }
0x1689   :  { %v8543_v51 = vpop.f32.mrf.mxu0 }
0x16fa   :  { %v5111_v16 = vpop.f32.mrf.mxu1 }
0x16fb   :  { %v5187_v60 = vadd.f32 %v5186_v55, %v5111_v16 }
0x16fc   :  { %v8538_v37 = vpop.f32.mrf.mxu1 }
0x16fd   :  { %v5195_v1 = vadd.f32 %v5193_v62, %v5187_v60  ;;  %v5788_v60 = vld [vmem:[#allocation50] sm:$0x7] }
0x16fe   :  { %v5264_v63 = vpop.f32.mrf.mxu1 }
0x16ff   :  { %5269 = vrot.lane.b32.xlu0 %v5264_v63, %s9890_s5  ;;  %8555 = vmatpush3.msk.msra.mxu1 %vm724_vm1, %v5264_v63  ;;  %v5416_v2 = vsel %vm720_vm2, %v5195_v1, 0.0  ;;  %v5419_v3 = vmul.f32 %v5195_v1, %v5195_v1 }
0x1700   :  { %v8548_v56 = vpop.f32.mrf.mxu1  ;;  %8557 = vmatmul.mubr.msk.f32.vlgmr.msra.gmra.mxu1 %vm720_vm2, %v4953_v15  ;;  %8564 = vmatprep.subr.mxu1 %v9887_v0  ;;  %v5469_v15 = vld [vmem:[%s11169_s24] sm:$0xff] }
0x1701   :  { %8566 = vmatprep.mubr.msk.f32.mxu1 %vm9888_vm0, %v9887_v0  ;;  %v5420_v4 = vsel %vm720_vm2, %v5419_v3, 0.0 }
0x171e   :  { %5417 = vadd.xlane.f32.xlu0 %v5416_v2 }
0x1722   :  { %5421 = vadd.xlane.f32.xlu0 %v5420_v4 }
0x1771   :  { %v5270_v19 = vpop.permute.xlu0 %5269 }
0x1772   :  { %8550 = vmatpush3.msk.msra.mxu0 %vm724_vm1, %v5270_v19 }
0x1773   :  { %8552 = vmatmul.mubr.msk.f32.vlgmr.msra.gmra.mxu0 %vm720_vm2, %v4955_v53  ;;  %8559 = vmatprep.subr.mxu0 %v9887_v0  ;;  %v7900_v53 = vld [vmem:[%s11169_s24 + $0x8] sm:$0xff] }
0x1774   :  { %8561 = vmatprep.mubr.msk.f32.mxu0 %vm9888_vm0, %v9887_v0 }
0x17a7   :  { %v5418_v22 = vpop.xlane.xlu0 %5417 }
0x17ab   :  { %v5422_v23 = vpop.xlane.xlu0 %5421 }
0x17c0   :  { %v5411_v5 = vpop.f32.mrf.mxu1 }
0x17c2   :  { %v8558_v7 = vpop.f32.mrf.mxu1 }
0x1833   :  { %v5339_v8 = vpop.f32.mrf.mxu0 }
0x1834   :  { %v5412_v9 = vadd.f32 %v5411_v5, %v5339_v8 }
0x1835   :  { %v8553_v10 = vpop.f32.mrf.mxu0 }
0x1836   :  { %v5415_v12 = vadd.f32 %v5412_v9, %v5193_v62  ;;  %v5867_v62 = vld [vmem:[#allocation50 + $0x4] sm:$0x7] }
0x1838   :  { %v5423_v14 = vsel %vm720_vm2, %v5415_v12, 0.0  ;;  %v5427_v17 = vmul.f32 %v5415_v12, %v5415_v12 }
0x1839   :  { %5424 = vadd.xlane.f32.xlu1 %v5423_v14 }
0x183a   :  { %v5428_v21 = vsel %vm720_vm2, %v5427_v17, 0.0 }
0x183b   :  { %5429 = vadd.xlane.f32.xlu0 %v5428_v21 }
0x18c2   :  { %v5425_v24 = vpop.xlane.xlu1 %5424 }
0x18c3   :  { %v5426_v25 = vadd.f32 %v5425_v24, %v5418_v22 }
0x18c4   :  { %v5430_v27 = vpop.xlane.xlu0 %5429 }
0x18c5   :  { %v5433_v28 = vmul.f32 0.125, %v5426_v25  ;;  %v5431_v29 = vadd.f32 %v5430_v27, %v5422_v23  ;;  %v5946_v25 = vld [vmem:[#allocation50 + $0x8] sm:$0x7] }
0x18c7   :  { %v5435_v30 = vmul.f32 %v5433_v28, %v5433_v28  ;;  %v5434_v31 = vmul.f32 0.125, %v5431_v29  ;;  %v6104_v29 = vld [vmem:[#allocation50 + $0x10] sm:$0x7] }
0x18c9   :  { %v5436_v32 = vsub.f32 %v5434_v31, %v5435_v30  ;;  %v6183_v31 = vld [vmem:[#allocation50 + $0x14] sm:$0x7] }
0x18cb   :  { %v5437_v33 = vmax.f32 %v5436_v32, 0.0 }
0x18cd   :  { %v5438_v34 = vadd.f32 1e-05, %v5437_v33  ;;  %v6262_v33 = vld [vmem:[#allocation50 + $0x18] sm:$0x7] }
0x18cf   :  { %8947 = vrsqrt.f32 %v5438_v34 }
0x18dc   :  { %v8948_v36 = vpop.eup %8947 }
0x18dd   :  { %v5440_v38 = vmul.f32 %v8948_v36, %v669_v35  ;;  %v6341_v35 = vld [vmem:[#allocation50 + $0x1c] sm:$0x7] }
0x18df   :  { %5445 = vperm.xlu1 %8915, %v5440_v38   ;;  %v5441_v40 = vmul.f32 %v5440_v38, %v5433_v28  ;;  %v6025_v28 = vld [vmem:[#allocation50 + $0xc] sm:$0x7]  ;;  %v10792_v38 = vld [vmem:[#allocation53 + $0x60] sm:$0xf] }
0x18e1   :  { %v5442_v41 = vsub.f32 %v670_v39, %v5441_v40  ;;  %v10798_v40 = vld [vmem:[#allocation53 + $0x58] sm:$0xff] }
0x18e3   :  { %5451 = vperm.xlu0 %8916, %v5442_v41   ;;  %v10807_v41 = vld [vmem:[#allocation53 + $0x50] sm:$0xff] }
0x18e7   :  { %5625 = vperm.xlu0 %8916, %v671_v42   ;;  %v10813_v42 = vld [vmem:[#allocation53 + $0x48] sm:$0xff] }
0x195a   :  { %v5446_v43 = vpop.permute.xlu1 %5445 }
0x195b   :  { %v5448_v20 = vmul.f32 %v5446_v43, %v5195_v1  ;;  %v5461_v44 = vmul.f32 %v5446_v43, %v5415_v12  ;;  %v10819_v43 = vld [vmem:[#allocation53 + $0x40] sm:$0xff] }
0x195e   :  { %v5452_v45 = vpop.permute.xlu0 %5451 }
0x195f   :  { %v5454_v58 = vadd.f32 %v5452_v45, %v5448_v20  ;;  %v5462_v61 = vadd.f32 %v5461_v44, %v5452_v45  ;;  %v10823_v20 = vld [vmem:[#allocation53 + $0x38] sm:$0xff]  ;;  %v10827_v44 = vld [vmem:[#allocation53 + $0x30] sm:$0xff]  ;;  %v10831_v45 = vld [vmem:[#allocation53 + $0x28] sm:$0xff] }
0x1961   :  { %v5456_v6 = vmin.f32 %v5454_v58, 0.0  ;;  %v5464_v11 = vmin.f32 %v5462_v61, 0.0  ;;  %vm5455_vm2 = vcmp.gt.f32.partialorder %v5454_v58, 0.0  ;;  %vm5463_vm8 = vcmp.gt.f32.partialorder %v5462_v61, 0.0 }
0x1962   :  { %v5626_v3 = vpop.permute.xlu0 %5625 }
0x1963   :  { %v5457_v13 = vmul.f32 1.442695, %v5456_v6  ;;  %v5465_v26 = vmul.f32 1.442695, %v5464_v11  ;;  %v10843_v6 = vld [vmem:[#allocation53 + $0x10] sm:$0xff]  ;;  %v10847_v11 = vld [vmem:[#allocation53 + $0x8] sm:$0xff] }
0x1965   :  { %8949 = vpow2.f32 %v5457_v13  ;;  %v10850_v13 = vld [vmem:[#allocation53] sm:$0xff] }
0x1966   :  { %8951 = vpow2.f32 %v5465_v26  ;;  %v10853_v26 = vld [vmem:[#allocation56 + $0x30] sm:$0x3] }
0x1972   :  { %v8950_v18 = vpop.eup %8949 }
0x1973   :  { %v8952_v46 = vpop.eup %8951  ;;  %v7898_v59 = vadd.f32 -1.0, %v8950_v18  ;;  %v10855_v18 = vld [vmem:[#allocation56 + $0x28] sm:$0xff] }
0x1974   :  { %v7899_v47 = vadd.f32 -1.0, %v8952_v46  ;;  %v10861_v46 = vld [vmem:[#allocation56 + $0x20] sm:$0xff] }
0x1975   :  { %v5460_v49 = vsel %vm5455_vm2, %v5454_v58, %v7898_v59  ;;  %v10835_v58 = vld [vmem:[#allocation53 + $0x20] sm:$0xff] }
0x1976   :  { %5473 = vrot.lane.b32.xlu1 %v5460_v49, %s9890_s5  ;;  %8565 = vmatpush3.msra.mxu1 %v5460_v49  ;;  %v5468_v50 = vsel %vm5463_vm8, %v5462_v61, %v7899_v47  ;;  %v10839_v61 = vld [vmem:[#allocation53 + $0x18] sm:$0xff]  ;;  %v10866_v59 = vld [vmem:[#allocation56 + $0x18] sm:$0xff] }
0x1977   :  { %8574 = vmatprep.subr.mxu1 %v9887_v0  ;;  %8567 = vmatmul.mubr.msk.f32.vlgmr.msra.gmra.mxu1 %vm5476_vm7, %v5469_v15 }
0x1978   :  { %8575 = vmatpush3.msra.mxu1 %v5468_v50  ;;  %8576 = vmatprep.mubr.msk.f32.mxu1 %vm9888_vm0, %v9887_v0 }
0x1979   :  { %8584 = vmatprep.subr.mxu1 %v9887_v0 }
0x197a   :  { %4801 = vperm.xlu1 %8915, %v667_v52  }
0x197b   :  { %8577 = vmatmul.mubr.msk.f32.vlgmr.msra.gmra.mxu1 %vm5476_vm7, %v5469_v15  ;;  %v10872_v15 = vld [vmem:[#allocation52] sm:$0x1] }
0x197c   :  { %8586 = vmatprep.mubr.msk.f32.mxu1 %vm9888_vm0, %v9887_v0  ;;  %8585 = vmatpush3.msk.msra.mxu1 %vm4963_vm14, %v5867_v62 }
0x197d   :  { %8594 = vmatprep.subr.mxu1 %v9887_v0 }
0x197e   :  { %5630 = vrot.lane.b32.xlu1 %v5468_v50, %s9890_s5 }
0x19e8   :  { %v5474_v54 = vpop.permute.xlu1 %5473 }
0x19e9   :  { %8560 = vmatpush3.msra.mxu0 %v5474_v54 }
0x19ea   :  { %8562 = vmatmul.mubr.msk.f32.vlgmr.msra.gmra.mxu0 %vm5476_vm7, %v7900_v53  ;;  %8569 = vmatprep.subr.mxu0 %v9887_v0 }
0x19eb   :  { %8571 = vmatprep.mubr.msk.f32.mxu0 %vm9888_vm0, %v9887_v0 }
0x19f5   :  { %v4802_v55 = vpop.permute.xlu1 %4801 }
0x19f6   :  { %v4877_v19 = vadd.f32 %v10703_v57, %v4802_v55  ;;  %v4950_v17 = vadd.f32 %v10705_v48, %v4802_v55 }
0x19f9   :  { %v5631_v51 = vpop.permute.xlu1 %5630 }
0x19fa   :  { %8570 = vmatpush3.msra.mxu0 %v5631_v51 }
0x19fb   :  { %8572 = vmatmul.mubr.msk.f32.vlgmr.msra.gmra.mxu0 %vm5476_vm7, %v7900_v53  ;;  %8579 = vmatprep.subr.mxu0 %v9887_v0 }
0x19fc   :  { %8581 = vmatprep.mubr.msk.f32.mxu0 %vm9888_vm0, %v9887_v0  ;;  %8580 = vmatpush3.msk.msra.mxu0 %vm4963_vm14, %v5788_v60 }
0x19fd   :  { %8589 = vmatprep.subr.mxu0 %v9887_v0 }
0x1a37   :  { %v5619_v16 = vpop.f32.mrf.mxu1 }
0x1a39   :  { %v8568_v37 = vpop.f32.mrf.mxu1 }
0x1a3b   :  { %v5769_v63 = vpop.f32.mrf.mxu1 }
0x1a3d   :  { %v8578_v56 = vpop.f32.mrf.mxu1 }
0x1aaa   :  { %v5546_v1 = vpop.f32.mrf.mxu0 }
0x1aab   :  { %v5620_v2 = vadd.f32 %v5619_v16, %v5546_v1 }
0x1aac   :  { %v8563_v4 = vpop.f32.mrf.mxu0 }
0x1aad   :  { %v5628_v5 = vadd.f32 %v5626_v3, %v5620_v2 }
0x1aaf   :  { %v5774_v7 = vadd.f32 %v5628_v5, %v4877_v19 }
0x1ab1   :  { %v5777_v8 = vmin.f32 %v5774_v7, 0.0  ;;  %vm5776_vm9 = vcmp.gt.f32.partialorder %v5774_v7, 0.0 }
0x1ab3   :  { %v5778_v9 = vmul.f32 1.442695, %v5777_v8 }
0x1ab5   :  { %8953 = vpow2.f32 %v5778_v9 }
0x1abb   :  { %v5699_v10 = vpop.f32.mrf.mxu0 }
0x1abc   :  { %v5770_v12 = vadd.f32 %v5769_v63, %v5699_v10 }
0x1abd   :  { %v8573_v14 = vpop.f32.mrf.mxu0 }
0x1abe   :  { %v5773_v21 = vadd.f32 %v5770_v12, %v5626_v3  ;;  %v10878_v12 = vld [vmem:[#allocation56 + $0x10] sm:$0xff]  ;;  %v10882_v14 = vld [vmem:[#allocation56 + $0x8] sm:$0xff] }
0x1ac0   :  { %v10764_v22 = vadd.f32 %v5773_v21, %v4950_v17  ;;  %v10884_v17 = vld [vmem:[#allocation56] sm:$0xff]  ;;  %v10890_v21 = vld [vmem:[#allocation55] sm:$0x1] }
0x1ac2   :  { %v8954_v23 = vpop.eup %8953  ;;  %vm5782_vm3 = vcmp.gt.f32.partialorder %v10764_v22, 0.0 }
0x1ac3   :  { %v7905_v24 = vadd.f32 -1.0, %v8954_v23 }
0x1ac5   :  { %v5781_v27 = vsel %vm5776_vm9, %v5774_v7, %v7905_v24 }
0x1ac6   :  { %8582 = vmatmul.mubr.msk.f32.vlgmr.msra.gmra.mxu0 %vm4960_vm4, %v5781_v27  ;;  %v5868_v57 = vrot.slane %v5781_v27, 1  ;;  %v5947_v48 = vrot.slane %v5781_v27, 2  ;;  %v6026_v30 = vrot.slane %v5781_v27, 3  ;;  %v6105_v32 = vrot.slane %v5781_v27, 4 }
0x1ac7   :  { %8590 = vmatpush3.msk.msra.mxu0 %vm4963_vm14, %v5946_v25  ;;  %8591 = vmatprep.mubr.msk.f32.mxu0 %vm9888_vm0, %v9887_v0  ;;  %v6184_v34 = vrot.slane %v5781_v27, 5  ;;  %v6263_v36 = vrot.slane %v5781_v27, 6  ;;  %v6342_v39 = vrot.slane %v5781_v27, 7 }
0x1ac8   :  { %8587 = vmatmul.mubr.msk.f32.vlgmr.msra.gmra.mxu1 %vm4960_vm4, %v5868_v57  ;;  %8599 = vmatprep.subr.mxu0 %v9887_v0  ;;  %v10893_v57 = vld [vmem:[#allocation59 + $0x30] sm:$0x3] }
0x1ac9   :  { %8595 = vmatpush3.msk.msra.mxu1 %vm4963_vm14, %v6025_v28  ;;  %8596 = vmatprep.mubr.msk.f32.mxu1 %vm9888_vm0, %v9887_v0  ;;  %v10896_v28 = vld [vmem:[#allocation59 + $0x28] sm:$0xff] }
0x1aca   :  { %8592 = vmatmul.mubr.msk.f32.vlgmr.msra.gmra.mxu0 %vm4960_vm4, %v5947_v48  ;;  %8604 = vmatprep.subr.mxu1 %v9887_v0  ;;  %v10903_v48 = vld [vmem:[#allocation59 + $0x20] sm:$0xff] }
0x1acb   :  { %8600 = vmatpush3.msk.msra.mxu0 %vm4963_vm14, %v6104_v29  ;;  %8601 = vmatprep.mubr.msk.f32.mxu0 %vm9888_vm0, %v9887_v0  ;;  %v10907_v29 = vld [vmem:[#allocation59 + $0x18] sm:$0xff] }
0x1acc   :  { %8597 = vmatmul.mubr.msk.f32.vlgmr.msra.gmra.mxu1 %vm4960_vm4, %v6026_v30  ;;  %8609 = vmatprep.subr.mxu0 %v9887_v0  ;;  %v10913_v30 = vld [vmem:[#allocation59 + $0x10] sm:$0xff] }
0x1acd   :  { %8605 = vmatpush3.msk.msra.mxu1 %vm4963_vm14, %v6183_v31  ;;  %8606 = vmatprep.mubr.msk.f32.mxu1 %vm9888_vm0, %v9887_v0  ;;  %v10917_v31 = vld [vmem:[#allocation59 + $0x8] sm:$0xff] }
0x1ace   :  { %8602 = vmatmul.mubr.msk.f32.vlgmr.msra.gmra.mxu0 %vm4960_vm4, %v6105_v32  ;;  %8614 = vmatprep.subr.mxu1 %v9887_v0  ;;  %v10919_v32 = vld [vmem:[#allocation59] sm:$0xff] }
0x1acf   :  { %8610 = vmatpush3.msk.msra.mxu0 %vm4963_vm14, %v6262_v33  ;;  %8611 = vmatprep.mubr.msk.f32.mxu0 %vm9888_vm0, %v9887_v0  ;;  %v10926_v33 = vld [vmem:[%s10108_s29 + $0x30] sm:$0x3] }
0x1ad0   :  { %8607 = vmatmul.mubr.msk.f32.vlgmr.msra.gmra.mxu1 %vm4960_vm4, %v6184_v34  ;;  %8619 = vmatprep.subr.mxu0 %v9887_v0  ;;  %v10929_v34 = vld [vmem:[%s10108_s29 + $0x28] sm:$0xff] }
0x1ad1   :  { %8615 = vmatpush3.msk.msra.mxu1 %vm4963_vm14, %v6341_v35  ;;  %8616 = vmatprep.mubr.msk.f32.mxu1 %vm9888_vm0, %v9887_v0  ;;  %v10935_v35 = vld [vmem:[%s10108_s29 + $0x20] sm:$0xff] }
0x1ad2   :  { %8612 = vmatmul.mubr.msk.f32.vlgmr.msra.gmra.mxu0 %vm4960_vm4, %v6263_v36  ;;  %8648 = vmatprep.subr.mxu1 %v9887_v0  ;;  %v10940_v36 = vld [vmem:[%s10108_s29 + $0x18] sm:$0xff] }
0x1ad3   :  { %8620 = vmatpush3.msk.msra.mxu0 %vm724_vm1, %v10792_v38  ;;  %8645 = vmatprep.mubr.msk.f32.mxu0 %vm9888_vm0, %v9887_v0 }
0x1ad4   :  { %8617 = vmatmul.mubr.msk.f32.vlgmr.msra.gmra.mxu1 %vm4960_vm4, %v6342_v39  ;;  %8621 = vmatprep.subr.mxu0 %v9887_v0  ;;  %v5783_v39 = vmin.f32 %v10764_v22, 0.0 }
0x1ad5   :  { %8622 = vmatpush3.msra.mxu0 %v10798_v40  ;;  %8662 = vmatprep.mubr.msk.f32.mxu1 %vm9888_vm0, %v9887_v0 }
0x1ad6   :  { %8623 = vmatprep.subr.mxu0 %v9887_v0  ;;  %8649 = vmatpush3.msk.msra.mxu1 %vm1090_vm5, %v10853_v26 }
0x1ad7   :  { %8624 = vmatpush3.msra.mxu0 %v10807_v41  ;;  %8650 = vmatprep.subr.mxu1 %v9887_v0 }
0x1ad8   :  { %8625 = vmatprep.subr.mxu0 %v9887_v0  ;;  %8651 = vmatpush3.msra.mxu1 %v10855_v18 }
0x1ad9   :  { %8626 = vmatpush3.msra.mxu0 %v10813_v42  ;;  %8652 = vmatprep.subr.mxu1 %v9887_v0 }
0x1ada   :  { %8627 = vmatprep.subr.mxu0 %v9887_v0  ;;  %8653 = vmatpush3.msra.mxu1 %v10861_v46 }
0x1adb   :  { %8628 = vmatpush3.msra.mxu0 %v10819_v43  ;;  %8654 = vmatprep.subr.mxu1 %v9887_v0 }
0x1adc   :  { %8629 = vmatprep.subr.mxu0 %v9887_v0  ;;  %8655 = vmatpush3.msra.mxu1 %v10866_v59 }
0x1add   :  { %8630 = vmatpush3.msra.mxu0 %v10823_v20  ;;  %8656 = vmatprep.subr.mxu1 %v9887_v0 }
0x1ade   :  { %8631 = vmatprep.subr.mxu0 %v9887_v0  ;;  %8657 = vmatpush3.msra.mxu1 %v10878_v12 }
0x1adf   :  { %8632 = vmatpush3.msra.mxu0 %v10827_v44  ;;  %8658 = vmatprep.subr.mxu1 %v9887_v0 }
0x1ae0   :  { %8633 = vmatprep.subr.mxu0 %v9887_v0  ;;  %8659 = vmatpush3.msra.mxu1 %v10882_v14 }
0x1ae1   :  { %8634 = vmatpush3.msra.mxu0 %v10831_v45  ;;  %8660 = vmatprep.subr.mxu1 %v9887_v0 }
0x1ae2   :  { %8635 = vmatprep.subr.mxu0 %v9887_v0  ;;  %8661 = vmatpush3.msra.mxu1 %v10884_v17 }
0x1ae3   :  { %8636 = vmatpush3.msra.mxu0 %v10835_v58  ;;  %8665 = vmatprep.subr.mxu1 %v9887_v0 }
0x1ae4   :  { %8637 = vmatprep.subr.mxu0 %v9887_v0 }
0x1ae5   :  { %8638 = vmatpush3.msra.mxu0 %v10839_v61 }
0x1ae6   :  { %8639 = vmatprep.subr.mxu0 %v9887_v0 }
0x1ae7   :  { %8640 = vmatpush3.msra.mxu0 %v10843_v6 }
0x1ae8   :  { %8641 = vmatprep.subr.mxu0 %v9887_v0 }
0x1ae9   :  { %8642 = vmatpush3.msra.mxu0 %v10847_v11 }
0x1aea   :  { %8643 = vmatprep.subr.mxu0 %v9887_v0 }
0x1aeb   :  { %8644 = vmatpush3.msra.mxu0 %v10850_v13 }
0x1aec   :  { %8682 = vmatprep.subr.mxu0 %v9887_v0 }
0x1b86   :  { %v5861_v47 = vpop.f32.mrf.mxu0 }
0x1b87   :  { %v5865_v49 = vadd.f32 %v5861_v47, %v10872_v15  ;;  %v5784_v47 = vmul.f32 1.442695, %v5783_v39 }
0x1b88   :  { %v8583_v50 = vpop.f32.mrf.mxu0  ;;  %v5940_v52 = vpop.f32.mrf.mxu1 }
0x1b89   :  { %v5944_v53 = vadd.f32 %v5940_v52, %v5865_v49  ;;  %8955 = vpow2.f32 %v5784_v47  ;;  %v10947_v49 = vld [vmem:[#allocation58] sm:$0x1] }
0x1b8a   :  { %v8588_v54 = vpop.f32.mrf.mxu1  ;;  %v6019_v55 = vpop.f32.mrf.mxu0 }
0x1b8b   :  { %v6023_v51 = vadd.f32 %v6019_v55, %v5944_v53 }
0x1b8c   :  { %v8593_v16 = vpop.f32.mrf.mxu0  ;;  %v6098_v37 = vpop.f32.mrf.mxu1 }
0x1b8d   :  { %v6102_v63 = vadd.f32 %v6098_v37, %v6023_v51  ;;  %v6730_v51 = vld [vmem:[#allocation50] sm:$0x7]  ;;  %v6808_v37 = vld [vmem:[#allocation50 + $0x4] sm:$0x7] }
0x1b8e   :  { %v8598_v56 = vpop.f32.mrf.mxu1  ;;  %v6177_v60 = vpop.f32.mrf.mxu0 }
0x1b8f   :  { %v6181_v62 = vadd.f32 %v6177_v60, %v6102_v63  ;;  %v6886_v60 = vld [vmem:[#allocation50 + $0x8] sm:$0x7] }
0x1b90   :  { %v8603_v1 = vpop.f32.mrf.mxu0  ;;  %v6256_v2 = vpop.f32.mrf.mxu1 }
0x1b91   :  { %v6260_v3 = vadd.f32 %v6256_v2, %v6181_v62  ;;  %v7042_v62 = vld [vmem:[#allocation50 + $0x10] sm:$0x7]  ;;  %v7198_v2 = vld [vmem:[#allocation50 + $0x18] sm:$0x7] }
0x1b92   :  { %v8608_v4 = vpop.f32.mrf.mxu1  ;;  %v6335_v19 = vpop.f32.mrf.mxu0 }
0x1b93   :  { %v6339_v5 = vadd.f32 %v6335_v19, %v6260_v3  ;;  %v7120_v4 = vld [vmem:[#allocation50 + $0x14] sm:$0x7] }
0x1b94   :  { %v8613_v7 = vpop.f32.mrf.mxu0  ;;  %v6414_v8 = vpop.f32.mrf.mxu1 }
0x1b95   :  { %v6418_v9 = vadd.f32 %v6414_v8, %v6339_v5 }
0x1b96   :  { %v8618_v10 = vpop.f32.mrf.mxu1  ;;  %v8956_v52 = vpop.eup %8955 }
0x1b97   :  { %8646 = vmatmul.mubr.msk.f32.vlgmr.msra.gmra.mxu0 %vm6419_vm6, %v6418_v9  ;;  %v7906_v16 = vadd.f32 -1.0, %v8956_v52 }
0x1b98   :  { %8696 = vmatprep.mubr.msk.f32.mxu0 %vm9888_vm0, %v9887_v0  ;;  %8683 = vmatpush3.msk.msra.mxu0 %vm1090_vm5, %v10926_v33 }
0x1b99   :  { %8684 = vmatprep.subr.mxu0 %v9887_v0  ;;  %v10957_v63 = vsel %vm5782_vm3, %v10764_v22, %v7906_v16 }
0x1b9a   :  { %8685 = vmatpush3.msra.mxu0 %v10929_v34  ;;  %v6809_v56 = vrot.slane %v10957_v63, 1  ;;  %v6887_v22 = vrot.slane %v10957_v63, 2  ;;  %v7043_v1 = vrot.slane %v10957_v63, 4  ;;  %v7199_v3 = vrot.slane %v10957_v63, 6 }
0x1b9b   :  { %8686 = vmatprep.subr.mxu0 %v9887_v0  ;;  %v7121_v8 = vrot.slane %v10957_v63, 5 }
0x1b9c   :  { %8687 = vmatpush3.msra.mxu0 %v10935_v35 }
0x1b9d   :  { %8688 = vmatprep.subr.mxu0 %v9887_v0 }
0x1b9e   :  { %8689 = vmatpush3.msra.mxu0 %v10940_v36 }
0x1b9f   :  { %8690 = vmatprep.subr.mxu0 %v9887_v0 }
0x1c57   :  { %v6492_v23 = vpop.f32.mrf.mxu0 }
0x1c58   :  { %v6493_v24 = vadd.f32 %v6492_v23, %v10890_v21 }
0x1c59   :  { %v8647_v25 = vpop.f32.mrf.mxu0 }
0x1c5a   :  { %v6496_v27 = vmax.f32 %v6493_v24, 0.0  ;;  %v7277_v24 = vrot.slane %v10957_v63, 7 }
0x1c5c   :  { %8663 = vmatmul.mubr.msk.f32.vlgmr.msra.gmra.mxu1 %vm6497_vm15, %v6496_v27 }
0x1c5d   :  { %8666 = vmatpush3.msk.msra.mxu1 %vm1090_vm5, %v10893_v57  ;;  %8679 = vmatprep.mubr.msk.f32.mxu1 %vm9888_vm0, %v9887_v0 }
0x1c5e   :  { %8667 = vmatprep.subr.mxu1 %v9887_v0 }
0x1c5f   :  { %8668 = vmatpush3.msra.mxu1 %v10896_v28 }
0x1c60   :  { %8669 = vmatprep.subr.mxu1 %v9887_v0 }
0x1c61   :  { %8670 = vmatpush3.msra.mxu1 %v10903_v48 }
0x1c62   :  { %8671 = vmatprep.subr.mxu1 %v9887_v0 }
0x1c63   :  { %8672 = vmatpush3.msra.mxu1 %v10907_v29 }
0x1c64   :  { %8673 = vmatprep.subr.mxu1 %v9887_v0 }
0x1c65   :  { %8674 = vmatpush3.msra.mxu1 %v10913_v30 }
0x1c66   :  { %8675 = vmatprep.subr.mxu1 %v9887_v0 }
0x1c67   :  { %8676 = vmatpush3.msra.mxu1 %v10917_v31 }
0x1c68   :  { %8677 = vmatprep.subr.mxu1 %v9887_v0 }
0x1c69   :  { %8678 = vmatpush3.msra.mxu1 %v10919_v32 }
0x1c6a   :  { %8699 = vmatprep.subr.mxu1 %v9887_v0 }
0x1d1c   :  { %v6570_v50 = vpop.f32.mrf.mxu1 }
0x1d1d   :  { %v6571_v53 = vadd.f32 %v6570_v50, %v10947_v49 }
0x1d1e   :  { %v8664_v54 = vpop.f32.mrf.mxu1 }
0x1d1f   :  { %v6574_v55 = vmax.f32 %v6571_v53, 0.0 }
0x1d21   :  { %8680 = vmatmul.mubr.msk.f32.vlgmr.msra.gmra.mxu1 %vm6497_vm15, %v6574_v55 }
0x1d22   :  { %8700 = vmatpush3.msk.msra.mxu1 %vm4963_vm14, %v6730_v51  ;;  %8701 = vmatprep.mubr.msk.f32.mxu1 %vm9888_vm0, %v9887_v0 }
0x1d23   :  { %8704 = vmatprep.subr.mxu1 %v9887_v0 }
0x1d25   :  { %8702 = vmatmul.mubr.msk.f32.vlgmr.msra.gmra.mxu1 %vm4960_vm4, %v10957_v63 }
0x1d26   :  { %8705 = vmatpush3.msk.msra.mxu1 %vm4963_vm14, %v6808_v37  ;;  %8706 = vmatprep.mubr.msk.f32.mxu1 %vm9888_vm0, %v9887_v0 }
0x1d27   :  { %8709 = vmatprep.subr.mxu1 %v9887_v0 }
0x1d29   :  { %8707 = vmatmul.mubr.msk.f32.vlgmr.msra.gmra.mxu1 %vm4960_vm4, %v6809_v56 }
0x1d2a   :  { %8710 = vmatpush3.msk.msra.mxu1 %vm4963_vm14, %v6886_v60  ;;  %8711 = vmatprep.mubr.msk.f32.mxu1 %vm9888_vm0, %v9887_v0 }
0x1d2b   :  { %8719 = vmatprep.subr.mxu1 %v9887_v0 }
0x1d2d   :  { %8712 = vmatmul.mubr.msk.f32.vlgmr.msra.gmra.mxu1 %vm4960_vm4, %v6887_v22 }
0x1d2e   :  { %8720 = vmatpush3.msk.msra.mxu1 %vm4963_vm14, %v7042_v62  ;;  %8721 = vmatprep.mubr.msk.f32.mxu1 %vm9888_vm0, %v9887_v0 }
0x1d2f   :  { %8729 = vmatprep.subr.mxu1 %v9887_v0 }
0x1d31   :  { %8722 = vmatmul.mubr.msk.f32.vlgmr.msra.gmra.mxu1 %vm4960_vm4, %v7043_v1 }
0x1d32   :  { %8730 = vmatpush3.msk.msra.mxu1 %vm4963_vm14, %v7198_v2  ;;  %8731 = vmatprep.mubr.msk.f32.mxu1 %vm9888_vm0, %v9887_v0 }
0x1d33   :  { %8739 = vmatprep.subr.mxu1 %v9887_v0 }
0x1d35   :  { %8732 = vmatmul.mubr.msk.f32.vlgmr.msra.gmra.mxu1 %vm4960_vm4, %v7199_v3 }
0x1d36   :  { %8740 = vmatpush3.msk.msra.mxu1 %vm724_vm1, %v10792_v38  ;;  %8765 = vmatprep.mubr.msk.f32.mxu1 %vm9888_vm0, %v9887_v0  ;;  %v11015_v38 = vld [vmem:[%s10108_s29 + $0x10] sm:$0xff]  ;;  %vm6728_vm1 = vcmask 155648  }
0x1d37   :  { %8741 = vmatprep.subr.mxu1 %v9887_v0  ;;  %8691 = vmatpush3.msra.mxu0 %v11015_v38 }
0x1d38   :  { %8742 = vmatpush3.msra.mxu1 %v10798_v40  ;;  %8692 = vmatprep.subr.mxu0 %v9887_v0  ;;  %v11020_v40 = vld [vmem:[%s10108_s29 + $0x8] sm:$0xff] }
0x1d39   :  { %8743 = vmatprep.subr.mxu1 %v9887_v0  ;;  %8693 = vmatpush3.msra.mxu0 %v11020_v40 }
0x1d3a   :  { %8744 = vmatpush3.msra.mxu1 %v10807_v41  ;;  %v11023_v41 = vld [vmem:[%s10108_s29] sm:$0xff]  ;;  %8694 = vmatprep.subr.mxu0 %v9887_v0 }
0x1d3b   :  { %8745 = vmatprep.subr.mxu1 %v9887_v0  ;;  %8695 = vmatpush3.msra.mxu0 %v11023_v41 }
0x1d3c   :  { %8746 = vmatpush3.msra.mxu1 %v10813_v42  ;;  %8714 = vmatprep.subr.mxu0 %v9887_v0  ;;  %v11029_v42 = vld [vmem:[#allocation61] sm:$0x1] }
0x1d3d   :  { %8747 = vmatprep.subr.mxu1 %v9887_v0 }
0x1d3e   :  { %8748 = vmatpush3.msra.mxu1 %v10819_v43 }
0x1d3f   :  { %8749 = vmatprep.subr.mxu1 %v9887_v0 }
0x1d40   :  { %8750 = vmatpush3.msra.mxu1 %v10823_v20 }
0x1d41   :  { %8751 = vmatprep.subr.mxu1 %v9887_v0 }
0x1d42   :  { %8752 = vmatpush3.msra.mxu1 %v10827_v44 }
0x1d43   :  { %8753 = vmatprep.subr.mxu1 %v9887_v0 }
0x1d44   :  { %8754 = vmatpush3.msra.mxu1 %v10831_v45 }
0x1d45   :  { %8755 = vmatprep.subr.mxu1 %v9887_v0 }
0x1d46   :  { %8756 = vmatpush3.msra.mxu1 %v10835_v58  ;;  %v6964_v58 = vld [vmem:[#allocation50 + $0xc] sm:$0x7] }
0x1d47   :  { %8757 = vmatprep.subr.mxu1 %v9887_v0 }
0x1d48   :  { %8758 = vmatpush3.msra.mxu1 %v10839_v61 }
0x1d49   :  { %8759 = vmatprep.subr.mxu1 %v9887_v0 }
0x1d4a   :  { %8760 = vmatpush3.msra.mxu1 %v10843_v6 }
0x1d4b   :  { %8761 = vmatprep.subr.mxu1 %v9887_v0 }
0x1d4c   :  { %8762 = vmatpush3.msra.mxu1 %v10847_v11 }
0x1d4d   :  { %8763 = vmatprep.subr.mxu1 %v9887_v0 }
0x1d4e   :  { %8764 = vmatpush3.msra.mxu1 %v10850_v13  ;;  %v6965_v13 = vrot.slane %v10957_v63, 3 }
0x1d4f   :  { %8802 = vmatprep.subr.mxu1 %v9887_v0 }
0x1de1   :  { %v6647_v43 = vpop.f32.mrf.mxu1 }
0x1de2   :  { %v6648_v20 = vadd.f32 %v6647_v43, %v11029_v42 }
0x1de3   :  { %v8681_v44 = vpop.f32.mrf.mxu1 }
0x1de4   :  { %v6651_v45 = vmax.f32 %v6648_v20, 0.0 }
0x1de5   :  { %v6803_v61 = vpop.f32.mrf.mxu1 }
0x1de6   :  { %8697 = vmatmul.mubr.msk.f32.vlgmr.msra.gmra.mxu0 %vm6497_vm15, %v6651_v45  ;;  %v6807_v11 = vadd.f32 %v6803_v61, %v10872_v15  ;;  %v7276_v15 = vld [vmem:[#allocation50 + $0x1c] sm:$0x7] }
0x1de7   :  { %v8703_v6 = vpop.f32.mrf.mxu1  ;;  %8715 = vmatpush3.msk.msra.mxu0 %vm4963_vm14, %v6964_v58  ;;  %8716 = vmatprep.mubr.msk.f32.mxu0 %vm9888_vm0, %v9887_v0 }
0x1de8   :  { %8724 = vmatprep.subr.mxu0 %v9887_v0 }
0x1de9   :  { %v6881_v19 = vpop.f32.mrf.mxu1 }
0x1dea   :  { %v6885_v5 = vadd.f32 %v6881_v19, %v6807_v11  ;;  %8717 = vmatmul.mubr.msk.f32.vlgmr.msra.gmra.mxu0 %vm4960_vm4, %v6965_v13 }
0x1deb   :  { %v8708_v7 = vpop.f32.mrf.mxu1  ;;  %8725 = vmatpush3.msk.msra.mxu0 %vm4963_vm14, %v7120_v4  ;;  %8726 = vmatprep.mubr.msk.f32.mxu0 %vm9888_vm0, %v9887_v0 }
0x1dec   :  { %8734 = vmatprep.subr.mxu0 %v9887_v0 }
0x1ded   :  { %v6959_v9 = vpop.f32.mrf.mxu1 }
0x1dee   :  { %v6963_v10 = vadd.f32 %v6959_v9, %v6885_v5  ;;  %8727 = vmatmul.mubr.msk.f32.vlgmr.msra.gmra.mxu0 %vm4960_vm4, %v7121_v8 }
0x1def   :  { %v8713_v23 = vpop.f32.mrf.mxu1  ;;  %8735 = vmatpush3.msk.msra.mxu0 %vm4963_vm14, %v7276_v15  ;;  %8736 = vmatprep.mubr.msk.f32.mxu0 %vm9888_vm0, %v9887_v0 }
0x1df0   :  { %8768 = vmatprep.subr.mxu0 %v9887_v0 }
0x1df1   :  { %v7115_v25 = vpop.f32.mrf.mxu1 }
0x1df2   :  { %8737 = vmatmul.mubr.msk.f32.vlgmr.msra.gmra.mxu0 %vm4960_vm4, %v7277_v24 }
0x1df3   :  { %v8723_v27 = vpop.f32.mrf.mxu1  ;;  %8769 = vmatpush3.msk.msra.mxu0 %vm1090_vm5, %v10853_v26  ;;  %8782 = vmatprep.mubr.msk.f32.mxu0 %vm9888_vm0, %v9887_v0  ;;  %v11070_v26 = vld [vmem:[%s10113_s13] sm:$0x1]  ;;  %s9894_s13 = smov [#allocation62]  }
0x1df4   :  { %8770 = vmatprep.subr.mxu0 %v9887_v0  ;;  %s7656_s29 = sshll.u32 %s9894_s13, 4  ;;  %s7657_s29 = int_to_ptr.vmem [resolvable:$true] %s7656_s29 }
0x1df5   :  { %v7271_v39 = vpop.f32.mrf.mxu1  ;;  %8771 = vmatpush3.msra.mxu0 %v10855_v18  ;;  %s9737_s27 = scalar_lea.vmem %s7657_s29, 32  ;;  %p9742_p0 = scmp.lt.s32.totalorder %s7657_s29, %s7657_s29 }
0x1df6   :  { %8772 = vmatprep.subr.mxu0 %v9887_v0  ;;  %p9738_p13 = scmp.ne.s32.totalorder %s7657_s29, %s9737_s27  ;;  %p9743_p1 = scmp.lt.s32.totalorder %s9737_s27, %s9737_s27 }
0x1df7   :  { %v8733_v47 = vpop.f32.mrf.mxu1  ;;  %8773 = vmatpush3.msra.mxu0 %v10861_v46 }
0x1df8   :  { %8774 = vmatprep.subr.mxu0 %v9887_v0  ;;  %p9744_p2 = por %p9743_p1, %p9742_p0 }
0x1df9   :  { %8775 = vmatpush3.msra.mxu0 %v10866_v59 }
0x1dfa   :  { %8776 = vmatprep.subr.mxu0 %v9887_v0  ;;  %p9745_p3 = pnand %p9744_p2, %p9738_p13 }
0x1dfb   :  { %8777 = vmatpush3.msra.mxu0 %v10878_v12 }
0x1dfc   :  { %8778 = vmatprep.subr.mxu0 %v9887_v0 }
0x1dfd   :  { %8779 = vmatpush3.msra.mxu0 %v10882_v14 }
0x1dfe   :  { %8780 = vmatprep.subr.mxu0 %v9887_v0 }
0x1dff   :  { %8781 = vmatpush3.msra.mxu0 %v10884_v17 }
0x1e00   :  { %8785 = vmatprep.subr.mxu0 %v9887_v0 }
0x1ea6   :  { %v6724_v18 = vpop.f32.mrf.mxu0 }
0x1ea7   :  { %v6725_v46 = vadd.f32 %v6724_v18, %v11070_v26 }
0x1ea8   :  { %v8698_v59 = vpop.f32.mrf.mxu0 }
0x1ea9   :  { %6729 = vst.msk [vmem:[#allocation62] sm:$0x1] %vm6728_vm1, %v6725_v46 }
0x1eaa   :  { %v7037_v12 = vpop.f32.mrf.mxu0 }
0x1eab   :  { %v7041_v50 = vadd.f32 %v7037_v12, %v6963_v10 }
0x1eac   :  { %v8718_v52 = vpop.f32.mrf.mxu0 }
0x1ead   :  { %v7119_v53 = vadd.f32 %v7115_v25, %v7041_v50 }
0x1eae   :  { %v7193_v14 = vpop.f32.mrf.mxu0 }
0x1eaf   :  { %v7197_v54 = vadd.f32 %v7193_v14, %v7119_v53 }
0x1eb0   :  { %v8728_v55 = vpop.f32.mrf.mxu0 }
0x1eb1   :  { %v7275_v51 = vadd.f32 %v7271_v39, %v7197_v54 }
0x1eb2   :  { %v7349_v17 = vpop.f32.mrf.mxu0 }
0x1eb3   :  { %v7353_v16 = vadd.f32 %v7349_v17, %v7275_v51 }
0x1eb4   :  { %v8738_v37 = vpop.f32.mrf.mxu0 }
0x1eb5   :  { %8766 = vmatmul.mubr.msk.f32.vlgmr.msra.gmra.mxu1 %vm6419_vm6, %v7353_v16 }
0x1eb6   :  { %8803 = vmatpush3.msk.msra.mxu1 %vm1090_vm5, %v10926_v33  ;;  %8816 = vmatprep.mubr.msk.f32.mxu1 %vm9888_vm0, %v9887_v0 }
0x1eb7   :  { %8804 = vmatprep.subr.mxu1 %v9887_v0 }
0x1eb8   :  { %8805 = vmatpush3.msra.mxu1 %v10929_v34 }
0x1eb9   :  { %8806 = vmatprep.subr.mxu1 %v9887_v0 }
0x1eba   :  { %8807 = vmatpush3.msra.mxu1 %v10935_v35 }
0x1ebb   :  { %8808 = vmatprep.subr.mxu1 %v9887_v0 }
0x1ebc   :  { %8809 = vmatpush3.msra.mxu1 %v10940_v36 }
0x1ebd   :  { %8810 = vmatprep.subr.mxu1 %v9887_v0 }
0x1ebe   :  { %8811 = vmatpush3.msra.mxu1 %v11015_v38 }
0x1ebf   :  { %8812 = vmatprep.subr.mxu1 %v9887_v0 }
0x1ec0   :  { %8813 = vmatpush3.msra.mxu1 %v11020_v40 }
0x1ec1   :  { %8814 = vmatprep.subr.mxu1 %v9887_v0 }
0x1ec2   :  { %8815 = vmatpush3.msra.mxu1 %v11023_v41 }
0x1f75   :  { %v7423_v33 = vpop.f32.mrf.mxu1 }
0x1f76   :  { %v7424_v34 = vadd.f32 %v7423_v33, %v10890_v21 }
0x1f77   :  { %v8767_v35 = vpop.f32.mrf.mxu1 }
0x1f78   :  { %v7427_v63 = vmax.f32 %v7424_v34, 0.0 }
0x1f7a   :  { %8783 = vmatmul.mubr.msk.f32.vlgmr.msra.gmra.mxu0 %vm6497_vm15, %v7427_v63 }
0x1f7b   :  { %8786 = vmatpush3.msk.msra.mxu0 %vm1090_vm5, %v10893_v57  ;;  %8799 = vmatprep.mubr.msk.f32.mxu0 %vm9888_vm0, %v9887_v0 }
0x1f7c   :  { %8787 = vmatprep.subr.mxu0 %v9887_v0 }
0x1f7d   :  { %8788 = vmatpush3.msra.mxu0 %v10896_v28 }
0x1f7e   :  { %8789 = vmatprep.subr.mxu0 %v9887_v0 }
0x1f7f   :  { %8790 = vmatpush3.msra.mxu0 %v10903_v48 }
0x1f80   :  { %8791 = vmatprep.subr.mxu0 %v9887_v0 }
0x1f81   :  { %8792 = vmatpush3.msra.mxu0 %v10907_v29 }
0x1f82   :  { %8793 = vmatprep.subr.mxu0 %v9887_v0 }
0x1f83   :  { %8794 = vmatpush3.msra.mxu0 %v10913_v30 }
0x1f84   :  { %8795 = vmatprep.subr.mxu0 %v9887_v0 }
0x1f85   :  { %8796 = vmatpush3.msra.mxu0 %v10917_v31 }
0x1f86   :  { %8797 = vmatprep.subr.mxu0 %v9887_v0 }
0x1f87   :  { %8798 = vmatpush3.msra.mxu0 %v10919_v32 }
0x203a   :  { %v7497_v21 = vpop.f32.mrf.mxu0 }
0x203b   :  { %v7498_v57 = vadd.f32 %v7497_v21, %v10947_v49 }
0x203c   :  { %v8784_v28 = vpop.f32.mrf.mxu0 }
0x203d   :  { %v7501_v48 = vmax.f32 %v7498_v57, 0.0 }
0x203f   :  { %8800 = vmatmul.mubr.msk.f32.vlgmr.msra.gmra.mxu0 %vm6497_vm15, %v7501_v48 }
0x20ff   :  { %v7571_v29 = vpop.f32.mrf.mxu0 }
0x2100   :  { %v7572_v36 = vadd.f32 %v7571_v29, %v11029_v42 }
0x2101   :  { %v8801_v56 = vpop.f32.mrf.mxu0 }
0x2102   :  { %v7575_v30 = vmax.f32 %v7572_v36, 0.0 }
0x2104   :  { %8817 = vmatmul.mubr.msk.f32.vlgmr.msra.gmra.mxu1 %vm6497_vm15, %v7575_v30 }
0x21c4   :  { %v7645_v31 = vpop.f32.mrf.mxu1 }
0x21c5   :  { %v7646_v0 = vadd.f32 %v7645_v31, %v11070_v26 }
0x21c6   :  { %v8818_v32 = vpop.f32.mrf.mxu1 }
0x21c7   :  { %7649 = vst.msk [vmem:[#allocation62 + $0x1] sm:$0x1] %vm6728_vm1, %v7646_v0 }
0x21c8   :  { %9748 = shalt.err (!%p9745_p3)
}
0x21c9   :  { %7659 = dma.vmem_to_hbm [thread:$0]  %s7657_s29, 32, %s10118_s21, [#allocation4]  }
0x21ca   :  { %9797 = dma.done.wait [#allocation4], 32  }
0x21cb   :  { %9798 = vsyncadd [#allocation4], 4294967264 }
0x21cc   :  { %7663 = vsyncpa [#allocation3], 1 }
0x21cd   :  { %7664 = vsyncpa [#allocation6], 1 }
0x21ce   :  { %7665 = vsyncpa [#allocation9], 1 }
0x21cf   :  { %7666 = vsyncpa [#allocation12], 1 }
0x21d0   :  { %7667 = vsyncpa [#allocation15], 1 }
0x21d1   :  { %7668 = vsyncpa [#allocation18], 1 }
0x21d2   :  { %7669 = vsyncpa [#allocation21], 1 }
0x21d3   :  { %7670 = vsyncpa [#allocation24], 1 }
0x21d4   :  { %7671 = vsyncpa [#allocation27], 1 }
0x21d5   :  { %7672 = vsyncpa [#allocation30], 1 }
0x21d6   :  { %7673 = vsyncpa [#allocation33], 1 }
0x21d7   :  { %7674 = vsyncpa [#allocation36], 1 }
0x21d8   :  { %7675 = vsyncpa [#allocation39], 1 }
0x21d9   :  { %7676 = vsyncpa [#allocation42], 1 }
0x21da   :  { %7677 = vsyncpa [#allocation45], 1 }
0x21db   :  { %7678 = vsyncpa [#allocation48], 1 }
0x21dc   :  { %7679 = vsyncpa [#allocation51], 1 }
0x21dd   :  { %7680 = vsyncpa [#allocation54], 1 }
0x21de   :  { %7681 = vsyncpa [#allocation57], 1 }
0x21df   :  { %7682 = vsyncpa [#allocation60], 1 }
0x21e0   :  { %7683 = vsyncpa [#allocation4], 1 }

</bundles_post_ra>
